<compile_context>
chip_gen: v6e
topology: v6e:2x2x1
jax: 0.10.0
libtpu: 0.0.40
codegen_flags: <defaults>
</compile_context>

<pallas_src>
import functools

import jax
import jax.numpy as jnp
from jax.experimental import pallas as pl
from jax.experimental.pallas import tpu as pltpu

# ----------------------------- model config ---------------------------------
CHANNELS = (32, 64)        # per-encoder-level channels
NUM_POINTS = (32, 16)      # per-encoder-level point counts
CHANNEL = sum(CHANNELS)    # fused channel = 96
GRID_SIZE = 2
UP = GRID_SIZE * GRID_SIZE                              # folding upsample = 4
NUM_DENSE = NUM_POINTS[-1] * (UP ** len(CHANNELS))      # 256


# --------------------------- in-kernel helpers --------------------------------
def _gelu(x):
    # tanh-approx GELU (PyTorch nn.GELU uses erf; tanh approx maps onto TPU EUP)
    return 0.5 * x * (1.0 + jnp.tanh(0.7978845608028654 * (x + 0.044715 * x * x * x)))


def _small_k_matmul(x, w):
    """x @ w for tiny K (=2/3): VPU broadcast-FMAs instead of a <3%-util MXU push."""
    out = x[:, 0:1] * w[0:1, :]
    for k in range(1, w.shape[0]):
        out = out + x[:, k:k + 1] * w[k:k + 1, :]
    return out


# ------------------------------- the kernel -----------------------------------
def _forward_kernel(pts_ref, slab_ref, coarse_ref, p1_ref, p2_ref, *, meta):
    N0, M = NUM_POINTS
    C0, C1 = CHANNELS

    def wb(name):
        r0, cin, cout, has_b = meta[name]
        w = slab_ref[r0:r0 + cin, :cout]
        b = slab_ref[r0 + cin:r0 + cin + 1, :cout] if has_b else None
        return w, b

    def dense(x, name, act=True):
        w, b = wb(name)
        y = jnp.dot(x, w, preferred_element_type=jnp.float32) + b
        return _gelu(y) if act else y

    # ---- encoders (pointwise feature lifts) ----
    # TODO(synk): the reference encoder's FPS / knn grouping has no clean Pallas
    # equivalent; points are subsampled to the first npts at each level.
    x0 = pts_ref[...]                                   # (N0, 3)
    w0, b0 = wb("enc0")
    f0 = _gelu(_small_k_matmul(x0, w0) + b0)            # (N0, C0)   K=3 on VPU
    f1 = dense(f0[:M, :], "enc1")                       # (M,  C1)

    # ---- global branch: max-pool -> fc1 ----
    pooled = jnp.max(f1, axis=0, keepdims=True)         # (1, C1)  (reused as dec-0 skip)
    gf = dense(dense(pooled, "fc1a"), "fc1b")           # (1, CHANNEL)

    # ---- per-point branch: fc2, then fc3 over concat([feats, global]) ----
    f = dense(dense(f1, "fc2a"), "fc2b")                # (M, CHANNEL)
    w3a, b3 = wb("fc3a")
    w3b, _ = wb("fc3b")
    y = (jnp.dot(f, w3a, preferred_element_type=jnp.float32)
         + jnp.dot(gf, w3b, preferred_element_type=jnp.float32)   # (1,C) broadcasts
         + b3)
    f = dense(_gelu(y), "fc3c")                         # (M, CHANNEL)

    # TODO(synk): the neck module is configured externally in the reference;
    # approximated as a residual pointwise MLP (ignores feats_list).
    f = f + dense(f, "neck")

    feats = dense(f, "fc4")                             # (M, C1)

    # ---- points head: C1 -> C1 -> 64 -> 3 (last layer is a plain Linear) ----
    p = dense(dense(feats, "pts0"), "pts1")
    points = dense(p, "pts2", act=False)                # (M, 3)
    coarse_ref[...] = points

    # ---- folding decoders ----
    skip_pool = (pooled, jnp.max(f0, axis=0, keepdims=True))   # feats_list[1 - i] pooled
    out_refs = (p1_ref, p2_ref)
    for i in range(len(CHANNELS)):
        wf, b = wb(f"dec{i}_wf")
        ws, _ = wb(f"dec{i}_ws")
        wp, _ = wb(f"dec{i}_wp")
        g0, gin, gout, _ = meta[f"dec{i}_gproj"]
        gproj = slab_ref[g0:g0 + gin, :gout]            # (UP, Cout): grid @ wg (precomputed)

        # concat([feats | skip | grid | xyz]) @ W == sum of partial matmuls,
        # evaluated at the PARENT-point level (dot commutes with replication).
        base = (jnp.dot(feats, wf, preferred_element_type=jnp.float32)
                + _small_k_matmul(points, wp)                         # K=3 on VPU
                + jnp.dot(skip_pool[i], ws, preferred_element_type=jnp.float32)
                + b)                                                  # (S, Cout)

        # TODO(synk): reference decoder module is external/unspecified; children
        # are emitted grid-corner-major (tile order) — order-invariant for CD loss.
        y = jnp.concatenate([base + gproj[u:u + 1, :] for u in range(UP)], axis=0)
        h = _gelu(y)                                                  # (S*UP, Cout)
        delta = dense(h, f"dec{i}_delta", act=False)                  # (S*UP, 3)
        points = jnp.concatenate([points] * UP, axis=0) + delta       # (S*UP, 3)
        feats = h
        out_refs[i][...] = points


# ------------------------------ parameters ------------------------------------
def make_grid():
    g = jnp.linspace(-0.05, 0.05, GRID_SIZE)
    gx = jnp.tile(g[None, :], (GRID_SIZE, 1)).reshape(-1)
    gy = jnp.tile(g[:, None], (1, GRID_SIZE)).reshape(-1)
    return jnp.stack([gx, gy], axis=-1)                 # (UP, 2)


def build_packed_params(key=None):
    """Build all (BN-folded) weights and pack them into one (R,128) f32 slab."""
    if key is None:
        key = jax.random.PRNGKey(0)
    counter = [0]

    def folded(cin, cout):
        counter[0] += 1
        k = jax.random.fold_in(key, counter[0])
        w = jax.random.normal(k, (cin, cout), jnp.float32) * 0.02
        b = jnp.zeros((cout,), jnp.float32)
        g = jnp.ones((cout,), jnp.float32)      # BN gamma (eval-mode affine)
        bt = jnp.zeros((cout,), jnp.float32)    # BN beta
        # fold eval-mode BN into linear: (x@w + b)*g + bt == x@(w*g) + (b*g + bt)
        return w * g[None, :], b * g + bt

    C0, C1 = CHANNELS
    entries = []   # (name, w (cin,cout), bias (cout,) or None)

    def add(name, w, b):
        entries.append((name, w, b))

    w, b = folded(3, C0);        add("enc0", w, b)
    w, b = folded(C0, C1);       add("enc1", w, b)
    for name, cin, cout in [("fc1a", C1, CHANNEL), ("fc1b", CHANNEL, CHANNEL),
                            ("fc2a", C1, CHANNEL), ("fc2b", CHANNEL, CHANNEL)]:
        w, b = folded(cin, cout); add(name, w, b)
    w3, b3 = folded(2 * CHANNEL, CHANNEL)                # fc3 first layer, split row-wise
    add("fc3a", w3[:CHANNEL, :], b3)
    add("fc3b", w3[CHANNEL:, :], None)
    w, b = folded(CHANNEL, CHANNEL); add("fc3c", w, b)
    w, b = folded(CHANNEL, CHANNEL); add("neck", w, b)
    w, b = folded(CHANNEL, C1);      add("fc4", w, b)
    w, b = folded(C1, C1);           add("pts0", w, b)
    w, b = folded(C1, 64);           add("pts1", w, b)
    w, b = folded(64, 3);            add("pts2", w, b)

    # decoders in reversed-channel order (like the reference loop); the fused
    # concat-weight is split row-wise and the grid seed is pre-projected.
    grid = make_grid()
    feat_in = C1
    for i in range(len(CHANNELS)):
        out_ch = CHANNELS[len(CHANNELS) - 1 - i]
        skip_ch = CHANNELS[1 - i]
        in_dim = feat_in + skip_ch + 2 + 3               # [feats | skip | grid(2) | xyz(3)]
        wm, bm = folded(in_dim, out_ch)
        add(f"dec{i}_wf", wm[:feat_in, :], bm)
        add(f"dec{i}_ws", wm[feat_in:feat_in + skip_ch, :], None)
        add(f"dec{i}_wp", wm[feat_in + skip_ch + 2:, :], None)
        add(f"dec{i}_gproj", jnp.dot(grid, wm[feat_in + skip_ch:feat_in + skip_ch + 2, :]),
            None)
        wd, bd = folded(out_ch, 3)
        add(f"dec{i}_delta", wd, bd)
        feat_in = out_ch

    # ---- pack into a single (R,128) f32 slab; each block starts 8-row aligned ----
    blocks, meta, row = [], {}, 0
    for name, w, b in entries:
        cin, cout = w.shape
        nrows = cin + (1 if b is not None else 0)
        pad = (-nrows) % 8
        blk = jnp.zeros((nrows + pad, 128), jnp.float32)
        blk = blk.at[:cin, :cout].set(w)
        if b is not None:
            blk = blk.at[cin, :cout].set(b)
        blocks.append(blk)
        meta[name] = (row, cin, cout, b is not None)
        row += nrows + pad
    return jnp.concatenate(blocks, axis=0), meta


# -------------------------------- forward -------------------------------------
def make_forward(meta):
    kern = functools.partial(_forward_kernel, meta=meta)

    @jax.jit
    def forward(points_in, slab):
        """points_in: (B, N, 3) — same convention as the PyTorch forward input."""
        B = points_in.shape[0]
        N0, M = NUM_POINTS
        # TODO(synk): FPS/knn grouping replaced by a first-N subsample.
        pts0 = points_in[:, :N0, :].reshape(B * N0, 3)
        R = slab.shape[0]
        n1, n2 = M * UP, M * UP * UP

        coarse, p1, p2 = pl.pallas_call(
            kern,
            grid=(B,),
            out_shape=(jax.ShapeDtypeStruct((B * M, 3), jnp.float32),
                       jax.ShapeDtypeStruct((B * n1, 3), jnp.float32),
                       jax.ShapeDtypeStruct((B * n2, 3), jnp.float32)),
            in_specs=[pl.BlockSpec((N0, 3), lambda b: (b, 0)),
                      pl.BlockSpec((R, 128), lambda b: (0, 0))],
            out_specs=(pl.BlockSpec((M, 3), lambda b: (b, 0)),
                       pl.BlockSpec((n1, 3), lambda b: (b, 0)),
                       pl.BlockSpec((n2, 3), lambda b: (b, 0))),
            compiler_params=pltpu.CompilerParams(
                dimension_semantics=("parallel",)),
        )(pts0, slab)

        return {
            "coarse": coarse.reshape(B, M, 3),
            str(n1): p1.reshape(B, n1, 3),
            str(n2): p2.reshape(B, n2, 3),
        }

    return forward


# --------------------------------- driver --------------------------------------
if __name__ == "__main__":
    B, N = 2, 64
    key = jax.random.PRNGKey(0)
    pts = jax.random.normal(key, (B, N, 3), jnp.float32)

    slab, meta = build_packed_params(jax.random.PRNGKey(0))
    forward = make_forward(meta)

    preds = forward(pts, slab)
    preds = jax.tree_util.tree_map(jax.block_until_ready, preds)

    M = NUM_POINTS[-1]
    assert preds["coarse"].shape == (B, M, 3)
    assert preds[str(M * UP)].shape == (B, M * UP, 3)
    assert preds[str(NUM_DENSE)].shape == (B, NUM_DENSE, 3)
    for v in preds.values():
        assert bool(jnp.all(jnp.isfinite(v)))
    print("KERNEL_OK")
</pallas_src>

<mosaic_0001>
module attributes {stable_mosaic.version = 11 : i64} {
  func.func @_forward_kernel(%arg0: i32, %arg1: memref<32x3xf32, #tpu.memory_space<vmem>>, %arg2: memref<1512x128xf32, #tpu.memory_space<vmem>>, %arg3: memref<16x3xf32, #tpu.memory_space<vmem>>, %arg4: memref<64x3xf32, #tpu.memory_space<vmem>>, %arg5: memref<256x3xf32, #tpu.memory_space<vmem>>) attributes {dimension_semantics = [#tpu.dimension_semantics<parallel>], iteration_bounds = array<i64: 2>, scalar_prefetch = 0 : i64, scratch_operands = 0 : i64, tpu.core_type = #tpu.core_type<tc>, window_params = [{transform_indices = @transform_0, window_bounds = array<i64: 32, 3>}, {pipeline_mode = #tpu.pipeline_mode<synchronous>, transform_indices = @transform_1, window_bounds = array<i64: 1512, 128>}, {transform_indices = @transform_2, window_bounds = array<i64: 16, 3>}, {transform_indices = @transform_3, window_bounds = array<i64: 64, 3>}, {transform_indices = @transform_4, window_bounds = array<i64: 256, 3>}]} {
    %c0 = arith.constant 0 : index
    %c0_0 = arith.constant 0 : index
    %0 = vector.load %arg1[%c0, %c0_0] : memref<32x3xf32, #tpu.memory_space<vmem>>, vector<32x3xf32>
    %c0_1 = arith.constant 0 : index
    %c0_2 = arith.constant 0 : index
    %1 = vector.load %arg2[%c0_1, %c0_2] : memref<1512x128xf32, #tpu.memory_space<vmem>>, vector<3x32xf32>
    %c3 = arith.constant 3 : index
    %c0_3 = arith.constant 0 : index
    %2 = vector.load %arg2[%c3, %c0_3] : memref<1512x128xf32, #tpu.memory_space<vmem>>, vector<1x32xf32>
    %3 = vector.extract_strided_slice %0 {offsets = [0, 0], sizes = [32, 1], strides = [1, 1]} : vector<32x3xf32> to vector<32x1xf32>
    %4 = vector.extract_strided_slice %1 {offsets = [0, 0], sizes = [1, 32], strides = [1, 1]} : vector<3x32xf32> to vector<1x32xf32>
    %5 = vector.broadcast %3 : vector<32x1xf32> to vector<32x32xf32>
    %6 = vector.broadcast %4 : vector<1x32xf32> to vector<32x32xf32>
    %7 = arith.mulf %5, %6 : vector<32x32xf32>
    %8 = vector.extract_strided_slice %0 {offsets = [0, 1], sizes = [32, 1], strides = [1, 1]} : vector<32x3xf32> to vector<32x1xf32>
    %9 = vector.extract_strided_slice %1 {offsets = [1, 0], sizes = [1, 32], strides = [1, 1]} : vector<3x32xf32> to vector<1x32xf32>
    %10 = vector.broadcast %8 : vector<32x1xf32> to vector<32x32xf32>
    %11 = vector.broadcast %9 : vector<1x32xf32> to vector<32x32xf32>
    %12 = arith.mulf %10, %11 : vector<32x32xf32>
    %13 = arith.addf %7, %12 : vector<32x32xf32>
    %14 = vector.extract_strided_slice %0 {offsets = [0, 2], sizes = [32, 1], strides = [1, 1]} : vector<32x3xf32> to vector<32x1xf32>
    %15 = vector.extract_strided_slice %1 {offsets = [2, 0], sizes = [1, 32], strides = [1, 1]} : vector<3x32xf32> to vector<1x32xf32>
    %16 = vector.broadcast %14 : vector<32x1xf32> to vector<32x32xf32>
    %17 = vector.broadcast %15 : vector<1x32xf32> to vector<32x32xf32>
    %18 = arith.mulf %16, %17 : vector<32x32xf32>
    %19 = arith.addf %13, %18 : vector<32x32xf32>
    %20 = vector.broadcast %2 : vector<1x32xf32> to vector<32x32xf32>
    %21 = arith.addf %19, %20 : vector<32x32xf32>
    %cst = arith.constant 5.000000e-01 : f32
    %22 = vector.broadcast %cst : f32 to vector<32x32xf32>
    %23 = arith.mulf %22, %21 : vector<32x32xf32>
    %cst_4 = arith.constant 4.471500e-02 : f32
    %24 = vector.broadcast %cst_4 : f32 to vector<32x32xf32>
    %25 = arith.mulf %24, %21 : vector<32x32xf32>
    %26 = arith.mulf %25, %21 : vector<32x32xf32>
    %27 = arith.mulf %26, %21 : vector<32x32xf32>
    %28 = arith.addf %21, %27 : vector<32x32xf32>
    %cst_5 = arith.constant 0.797884583 : f32
    %29 = vector.broadcast %cst_5 : f32 to vector<32x32xf32>
    %30 = arith.mulf %29, %28 : vector<32x32xf32>
    %31 = math.tanh %30 : vector<32x32xf32>
    %cst_6 = arith.constant 1.000000e+00 : f32
    %32 = vector.broadcast %cst_6 : f32 to vector<32x32xf32>
    %33 = arith.addf %32, %31 : vector<32x32xf32>
    %34 = arith.mulf %23, %33 : vector<32x32xf32>
    %35 = vector.extract_strided_slice %34 {offsets = [0, 0], sizes = [16, 32], strides = [1, 1]} : vector<32x32xf32> to vector<16x32xf32>
    %c8 = arith.constant 8 : index
    %c0_7 = arith.constant 0 : index
    %36 = vector.load %arg2[%c8, %c0_7] : memref<1512x128xf32, #tpu.memory_space<vmem>>, vector<32x64xf32>
    %c40 = arith.constant 40 : index
    %c0_8 = arith.constant 0 : index
    %37 = vector.load %arg2[%c40, %c0_8] : memref<1512x128xf32, #tpu.memory_space<vmem>>, vector<1x64xf32>
    %cst_9 = arith.constant dense<0.000000e+00> : vector<16x64xf32>
    %38 = tpu.matmul %35, %36, %cst_9 {dimension_numbers = #tpu.dot_dimension_numbers<[1], [0], [0], [1], [0, 0, 1, 1], [], []>} : vector<16x32xf32>, vector<32x64xf32>, vector<16x64xf32> -> vector<16x64xf32>
    %39 = vector.broadcast %37 : vector<1x64xf32> to vector<16x64xf32>
    %40 = arith.addf %38, %39 : vector<16x64xf32>
    %cst_10 = arith.constant 5.000000e-01 : f32
    %41 = vector.broadcast %cst_10 : f32 to vector<16x64xf32>
    %42 = arith.mulf %41, %40 : vector<16x64xf32>
    %cst_11 = arith.constant 4.471500e-02 : f32
    %43 = vector.broadcast %cst_11 : f32 to vector<16x64xf32>
    %44 = arith.mulf %43, %40 : vector<16x64xf32>
    %45 = arith.mulf %44, %40 : vector<16x64xf32>
    %46 = arith.mulf %45, %40 : vector<16x64xf32>
    %47 = arith.addf %40, %46 : vector<16x64xf32>
    %cst_12 = arith.constant 0.797884583 : f32
    %48 = vector.broadcast %cst_12 : f32 to vector<16x64xf32>
    %49 = arith.mulf %48, %47 : vector<16x64xf32>
    %50 = math.tanh %49 : vector<16x64xf32>
    %cst_13 = arith.constant 1.000000e+00 : f32
    %51 = vector.broadcast %cst_13 : f32 to vector<16x64xf32>
    %52 = arith.addf %51, %50 : vector<16x64xf32>
    %53 = arith.mulf %42, %52 : vector<16x64xf32>
    %cst_14 = arith.constant dense<0xFF800000> : vector<64xf32>
    %54 = vector.multi_reduction <maximumf>, %53, %cst_14 [0] : vector<16x64xf32> to vector<64xf32>
    %55 = vector.shape_cast %54 : vector<64xf32> to vector<1x64xf32>
    %c48 = arith.constant 48 : index
    %c0_15 = arith.constant 0 : index
    %56 = vector.load %arg2[%c48, %c0_15] : memref<1512x128xf32, #tpu.memory_space<vmem>>, vector<64x96xf32>
    %c112 = arith.constant 112 : index
    %c0_16 = arith.constant 0 : index
    %57 = vector.load %arg2[%c112, %c0_16] : memref<1512x128xf32, #tpu.memory_space<vmem>>, vector<1x96xf32>
    %cst_17 = arith.constant dense<0.000000e+00> : vector<1x96xf32>
    %58 = tpu.matmul %55, %56, %cst_17 {dimension_numbers = #tpu.dot_dimension_numbers<[1], [0], [0], [1], [0, 0, 1, 1], [], []>} : vector<1x64xf32>, vector<64x96xf32>, vector<1x96xf32> -> vector<1x96xf32>
    %59 = arith.addf %58, %57 : vector<1x96xf32>
    %cst_18 = arith.constant 5.000000e-01 : f32
    %60 = vector.broadcast %cst_18 : f32 to vector<1x96xf32>
    %61 = arith.mulf %60, %59 : vector<1x96xf32>
    %cst_19 = arith.constant 4.471500e-02 : f32
    %62 = vector.broadcast %cst_19 : f32 to vector<1x96xf32>
    %63 = arith.mulf %62, %59 : vector<1x96xf32>
    %64 = arith.mulf %63, %59 : vector<1x96xf32>
    %65 = arith.mulf %64, %59 : vector<1x96xf32>
    %66 = arith.addf %59, %65 : vector<1x96xf32>
    %cst_20 = arith.constant 0.797884583 : f32
    %67 = vector.broadcast %cst_20 : f32 to vector<1x96xf32>
    %68 = arith.mulf %67, %66 : vector<1x96xf32>
    %69 = math.tanh %68 : vector<1x96xf32>
    %cst_21 = arith.constant 1.000000e+00 : f32
    %70 = vector.broadcast %cst_21 : f32 to vector<1x96xf32>
    %71 = arith.addf %70, %69 : vector<1x96xf32>
    %72 = arith.mulf %61, %71 : vector<1x96xf32>
    %c120 = arith.constant 120 : index
    %c0_22 = arith.constant 0 : index
    %73 = vector.load %arg2[%c120, %c0_22] : memref<1512x128xf32, #tpu.memory_space<vmem>>, vector<96x96xf32>
    %c216 = arith.constant 216 : index
    %c0_23 = arith.constant 0 : index
    %74 = vector.load %arg2[%c216, %c0_23] : memref<1512x128xf32, #tpu.memory_space<vmem>>, vector<1x96xf32>
    %cst_24 = arith.constant dense<0.000000e+00> : vector<1x96xf32>
    %75 = tpu.matmul %72, %73, %cst_24 {dimension_numbers = #tpu.dot_dimension_numbers<[1], [0], [0], [1], [0, 0, 1, 1], [], []>} : vector<1x96xf32>, vector<96x96xf32>, vector<1x96xf32> -> vector<1x96xf32>
    %76 = arith.addf %75, %74 : vector<1x96xf32>
    %cst_25 = arith.constant 5.000000e-01 : f32
    %77 = vector.broadcast %cst_25 : f32 to vector<1x96xf32>
    %78 = arith.mulf %77, %76 : vector<1x96xf32>
    %cst_26 = arith.constant 4.471500e-02 : f32
    %79 = vector.broadcast %cst_26 : f32 to vector<1x96xf32>
    %80 = arith.mulf %79, %76 : vector<1x96xf32>
    %81 = arith.mulf %80, %76 : vector<1x96xf32>
    %82 = arith.mulf %81, %76 : vector<1x96xf32>
    %83 = arith.addf %76, %82 : vector<1x96xf32>
    %cst_27 = arith.constant 0.797884583 : f32
    %84 = vector.broadcast %cst_27 : f32 to vector<1x96xf32>
    %85 = arith.mulf %84, %83 : vector<1x96xf32>
    %86 = math.tanh %85 : vector<1x96xf32>
    %cst_28 = arith.constant 1.000000e+00 : f32
    %87 = vector.broadcast %cst_28 : f32 to vector<1x96xf32>
    %88 = arith.addf %87, %86 : vector<1x96xf32>
    %89 = arith.mulf %78, %88 : vector<1x96xf32>
    %c224 = arith.constant 224 : index
    %c0_29 = arith.constant 0 : index
    %90 = vector.load %arg2[%c224, %c0_29] : memref<1512x128xf32, #tpu.memory_space<vmem>>, vector<64x96xf32>
    %c288 = arith.constant 288 : index
    %c0_30 = arith.constant 0 : index
    %91 = vector.load %arg2[%c288, %c0_30] : memref<1512x128xf32, #tpu.memory_space<vmem>>, vector<1x96xf32>
    %cst_31 = arith.constant dense<0.000000e+00> : vector<16x96xf32>
    %92 = tpu.matmul %53, %90, %cst_31 {dimension_numbers = #tpu.dot_dimension_numbers<[1], [0], [0], [1], [0, 0, 1, 1], [], []>} : vector<16x64xf32>, vector<64x96xf32>, vector<16x96xf32> -> vector<16x96xf32>
    %93 = vector.broadcast %91 : vector<1x96xf32> to vector<16x96xf32>
    %94 = arith.addf %92, %93 : vector<16x96xf32>
    %cst_32 = arith.constant 5.000000e-01 : f32
    %95 = vector.broadcast %cst_32 : f32 to vector<16x96xf32>
    %96 = arith.mulf %95, %94 : vector<16x96xf32>
    %cst_33 = arith.constant 4.471500e-02 : f32
    %97 = vector.broadcast %cst_33 : f32 to vector<16x96xf32>
    %98 = arith.mulf %97, %94 : vector<16x96xf32>
    %99 = arith.mulf %98, %94 : vector<16x96xf32>
    %100 = arith.mulf %99, %94 : vector<16x96xf32>
    %101 = arith.addf %94, %100 : vector<16x96xf32>
    %cst_34 = arith.constant 0.797884583 : f32
    %102 = vector.broadcast %cst_34 : f32 to vector<16x96xf32>
    %103 = arith.mulf %102, %101 : vector<16x96xf32>
    %104 = math.tanh %103 : vector<16x96xf32>
    %cst_35 = arith.constant 1.000000e+00 : f32
    %105 = vector.broadcast %cst_35 : f32 to vector<16x96xf32>
    %106 = arith.addf %105, %104 : vector<16x96xf32>
    %107 = arith.mulf %96, %106 : vector<16x96xf32>
    %c296 = arith.constant 296 : index
    %c0_36 = arith.constant 0 : index
    %108 = vector.load %arg2[%c296, %c0_36] : memref<1512x128xf32, #tpu.memory_space<vmem>>, vector<96x96xf32>
    %c392 = arith.constant 392 : index
    %c0_37 = arith.constant 0 : index
    %109 = vector.load %arg2[%c392, %c0_37] : memref<1512x128xf32, #tpu.memory_space<vmem>>, vector<1x96xf32>
    %cst_38 = arith.constant dense<0.000000e+00> : vector<16x96xf32>
    %110 = tpu.matmul %107, %108, %cst_38 {dimension_numbers = #tpu.dot_dimension_numbers<[1], [0], [0], [1], [0, 0, 1, 1], [], []>} : vector<16x96xf32>, vector<96x96xf32>, vector<16x96xf32> -> vector<16x96xf32>
    %111 = vector.broadcast %109 : vector<1x96xf32> to vector<16x96xf32>
    %112 = arith.addf %110, %111 : vector<16x96xf32>
    %cst_39 = arith.constant 5.000000e-01 : f32
    %113 = vector.broadcast %cst_39 : f32 to vector<16x96xf32>
    %114 = arith.mulf %113, %112 : vector<16x96xf32>
    %cst_40 = arith.constant 4.471500e-02 : f32
    %115 = vector.broadcast %cst_40 : f32 to vector<16x96xf32>
    %116 = arith.mulf %115, %112 : vector<16x96xf32>
    %117 = arith.mulf %116, %112 : vector<16x96xf32>
    %118 = arith.mulf %117, %112 : vector<16x96xf32>
    %119 = arith.addf %112, %118 : vector<16x96xf32>
    %cst_41 = arith.constant 0.797884583 : f32
    %120 = vector.broadcast %cst_41 : f32 to vector<16x96xf32>
    %121 = arith.mulf %120, %119 : vector<16x96xf32>
    %122 = math.tanh %121 : vector<16x96xf32>
    %cst_42 = arith.constant 1.000000e+00 : f32
    %123 = vector.broadcast %cst_42 : f32 to vector<16x96xf32>
    %124 = arith.addf %123, %122 : vector<16x96xf32>
    %125 = arith.mulf %114, %124 : vector<16x96xf32>
    %c400 = arith.constant 400 : index
    %c0_43 = arith.constant 0 : index
    %126 = vector.load %arg2[%c400, %c0_43] : memref<1512x128xf32, #tpu.memory_space<vmem>>, vector<96x96xf32>
    %c496 = arith.constant 496 : index
    %c0_44 = arith.constant 0 : index
    %127 = vector.load %arg2[%c496, %c0_44] : memref<1512x128xf32, #tpu.memory_space<vmem>>, vector<1x96xf32>
    %c504 = arith.constant 504 : index
    %c0_45 = arith.constant 0 : index
    %128 = vector.load %arg2[%c504, %c0_45] : memref<1512x128xf32, #tpu.memory_space<vmem>>, vector<96x96xf32>
    %cst_46 = arith.constant dense<0.000000e+00> : vector<16x96xf32>
    %129 = tpu.matmul %125, %126, %cst_46 {dimension_numbers = #tpu.dot_dimension_numbers<[1], [0], [0], [1], [0, 0, 1, 1], [], []>} : vector<16x96xf32>, vector<96x96xf32>, vector<16x96xf32> -> vector<16x96xf32>
    %cst_47 = arith.constant dense<0.000000e+00> : vector<1x96xf32>
    %130 = tpu.matmul %89, %128, %cst_47 {dimension_numbers = #tpu.dot_dimension_numbers<[1], [0], [0], [1], [0, 0, 1, 1], [], []>} : vector<1x96xf32>, vector<96x96xf32>, vector<1x96xf32> -> vector<1x96xf32>
    %131 = vector.broadcast %130 : vector<1x96xf32> to vector<16x96xf32>
    %132 = arith.addf %129, %131 : vector<16x96xf32>
    %133 = vector.broadcast %127 : vector<1x96xf32> to vector<16x96xf32>
    %134 = arith.addf %132, %133 : vector<16x96xf32>
    %cst_48 = arith.constant 5.000000e-01 : f32
    %135 = vector.broadcast %cst_48 : f32 to vector<16x96xf32>
    %136 = arith.mulf %135, %134 : vector<16x96xf32>
    %cst_49 = arith.constant 4.471500e-02 : f32
    %137 = vector.broadcast %cst_49 : f32 to vector<16x96xf32>
    %138 = arith.mulf %137, %134 : vector<16x96xf32>
    %139 = arith.mulf %138, %134 : vector<16x96xf32>
    %140 = arith.mulf %139, %134 : vector<16x96xf32>
    %141 = arith.addf %134, %140 : vector<16x96xf32>
    %cst_50 = arith.constant 0.797884583 : f32
    %142 = vector.broadcast %cst_50 : f32 to vector<16x96xf32>
    %143 = arith.mulf %142, %141 : vector<16x96xf32>
    %144 = math.tanh %143 : vector<16x96xf32>
    %cst_51 = arith.constant 1.000000e+00 : f32
    %145 = vector.broadcast %cst_51 : f32 to vector<16x96xf32>
    %146 = arith.addf %145, %144 : vector<16x96xf32>
    %147 = arith.mulf %136, %146 : vector<16x96xf32>
    %c600 = arith.constant 600 : index
    %c0_52 = arith.constant 0 : index
    %148 = vector.load %arg2[%c600, %c0_52] : memref<1512x128xf32, #tpu.memory_space<vmem>>, vector<96x96xf32>
    %c696 = arith.constant 696 : index
    %c0_53 = arith.constant 0 : index
    %149 = vector.load %arg2[%c696, %c0_53] : memref<1512x128xf32, #tpu.memory_space<vmem>>, vector<1x96xf32>
    %cst_54 = arith.constant dense<0.000000e+00> : vector<16x96xf32>
    %150 = tpu.matmul %147, %148, %cst_54 {dimension_numbers = #tpu.dot_dimension_numbers<[1], [0], [0], [1], [0, 0, 1, 1], [], []>} : vector<16x96xf32>, vector<96x96xf32>, vector<16x96xf32> -> vector<16x96xf32>
    %151 = vector.broadcast %149 : vector<1x96xf32> to vector<16x96xf32>
    %152 = arith.addf %150, %151 : vector<16x96xf32>
    %cst_55 = arith.constant 5.000000e-01 : f32
    %153 = vector.broadcast %cst_55 : f32 to vector<16x96xf32>
    %154 = arith.mulf %153, %152 : vector<16x96xf32>
    %cst_56 = arith.constant 4.471500e-02 : f32
    %155 = vector.broadcast %cst_56 : f32 to vector<16x96xf32>
    %156 = arith.mulf %155, %152 : vector<16x96xf32>
    %157 = arith.mulf %156, %152 : vector<16x96xf32>
    %158 = arith.mulf %157, %152 : vector<16x96xf32>
    %159 = arith.addf %152, %158 : vector<16x96xf32>
    %cst_57 = arith.constant 0.797884583 : f32
    %160 = vector.broadcast %cst_57 : f32 to vector<16x96xf32>
    %161 = arith.mulf %160, %159 : vector<16x96xf32>
    %162 = math.tanh %161 : vector<16x96xf32>
    %cst_58 = arith.constant 1.000000e+00 : f32
    %163 = vector.broadcast %cst_58 : f32 to vector<16x96xf32>
    %164 = arith.addf %163, %162 : vector<16x96xf32>
    %165 = arith.mulf %154, %164 : vector<16x96xf32>
    %c704 = arith.constant 704 : index
    %c0_59 = arith.constant 0 : index
    %166 = vector.load %arg2[%c704, %c0_59] : memref<1512x128xf32, #tpu.memory_space<vmem>>, vector<96x96xf32>
    %c800 = arith.constant 800 : index
    %c0_60 = arith.constant 0 : index
    %167 = vector.load %arg2[%c800, %c0_60] : memref<1512x128xf32, #tpu.memory_space<vmem>>, vector<1x96xf32>
    %cst_61 = arith.constant dense<0.000000e+00> : vector<16x96xf32>
    %168 = tpu.matmul %165, %166, %cst_61 {dimension_numbers = #tpu.dot_dimension_numbers<[1], [0], [0], [1], [0, 0, 1, 1], [], []>} : vector<16x96xf32>, vector<96x96xf32>, vector<16x96xf32> -> vector<16x96xf32>
    %169 = vector.broadcast %167 : vector<1x96xf32> to vector<16x96xf32>
    %170 = arith.addf %168, %169 : vector<16x96xf32>
    %cst_62 = arith.constant 5.000000e-01 : f32
    %171 = vector.broadcast %cst_62 : f32 to vector<16x96xf32>
    %172 = arith.mulf %171, %170 : vector<16x96xf32>
    %cst_63 = arith.constant 4.471500e-02 : f32
    %173 = vector.broadcast %cst_63 : f32 to vector<16x96xf32>
    %174 = arith.mulf %173, %170 : vector<16x96xf32>
    %175 = arith.mulf %174, %170 : vector<16x96xf32>
    %176 = arith.mulf %175, %170 : vector<16x96xf32>
    %177 = arith.addf %170, %176 : vector<16x96xf32>
    %cst_64 = arith.constant 0.797884583 : f32
    %178 = vector.broadcast %cst_64 : f32 to vector<16x96xf32>
    %179 = arith.mulf %178, %177 : vector<16x96xf32>
    %180 = math.tanh %179 : vector<16x96xf32>
    %cst_65 = arith.constant 1.000000e+00 : f32
    %181 = vector.broadcast %cst_65 : f32 to vector<16x96xf32>
    %182 = arith.addf %181, %180 : vector<16x96xf32>
    %183 = arith.mulf %172, %182 : vector<16x96xf32>
    %184 = arith.addf %165, %183 : vector<16x96xf32>
    %c808 = arith.constant 808 : index
    %c0_66 = arith.constant 0 : index
    %185 = vector.load %arg2[%c808, %c0_66] : memref<1512x128xf32, #tpu.memory_space<vmem>>, vector<96x64xf32>
    %c904 = arith.constant 904 : index
    %c0_67 = arith.constant 0 : index
    %186 = vector.load %arg2[%c904, %c0_67] : memref<1512x128xf32, #tpu.memory_space<vmem>>, vector<1x64xf32>
    %cst_68 = arith.constant dense<0.000000e+00> : vector<16x64xf32>
    %187 = tpu.matmul %184, %185, %cst_68 {dimension_numbers = #tpu.dot_dimension_numbers<[1], [0], [0], [1], [0, 0, 1, 1], [], []>} : vector<16x96xf32>, vector<96x64xf32>, vector<16x64xf32> -> vector<16x64xf32>
    %188 = vector.broadcast %186 : vector<1x64xf32> to vector<16x64xf32>
    %189 = arith.addf %187, %188 : vector<16x64xf32>
    %cst_69 = arith.constant 5.000000e-01 : f32
    %190 = vector.broadcast %cst_69 : f32 to vector<16x64xf32>
    %191 = arith.mulf %190, %189 : vector<16x64xf32>
    %cst_70 = arith.constant 4.471500e-02 : f32
    %192 = vector.broadcast %cst_70 : f32 to vector<16x64xf32>
    %193 = arith.mulf %192, %189 : vector<16x64xf32>
    %194 = arith.mulf %193, %189 : vector<16x64xf32>
    %195 = arith.mulf %194, %189 : vector<16x64xf32>
    %196 = arith.addf %189, %195 : vector<16x64xf32>
    %cst_71 = arith.constant 0.797884583 : f32
    %197 = vector.broadcast %cst_71 : f32 to vector<16x64xf32>
    %198 = arith.mulf %197, %196 : vector<16x64xf32>
    %199 = math.tanh %198 : vector<16x64xf32>
    %cst_72 = arith.constant 1.000000e+00 : f32
    %200 = vector.broadcast %cst_72 : f32 to vector<16x64xf32>
    %201 = arith.addf %200, %199 : vector<16x64xf32>
    %202 = arith.mulf %191, %201 : vector<16x64xf32>
    %c912 = arith.constant 912 : index
    %c0_73 = arith.constant 0 : index
    %203 = vector.load %arg2[%c912, %c0_73] : memref<1512x128xf32, #tpu.memory_space<vmem>>, vector<64x64xf32>
    %c976 = arith.constant 976 : index
    %c0_74 = arith.constant 0 : index
    %204 = vector.load %arg2[%c976, %c0_74] : memref<1512x128xf32, #tpu.memory_space<vmem>>, vector<1x64xf32>
    %cst_75 = arith.constant dense<0.000000e+00> : vector<16x64xf32>
    %205 = tpu.matmul %202, %203, %cst_75 {dimension_numbers = #tpu.dot_dimension_numbers<[1], [0], [0], [1], [0, 0, 1, 1], [], []>} : vector<16x64xf32>, vector<64x64xf32>, vector<16x64xf32> -> vector<16x64xf32>
    %206 = vector.broadcast %204 : vector<1x64xf32> to vector<16x64xf32>
    %207 = arith.addf %205, %206 : vector<16x64xf32>
    %cst_76 = arith.constant 5.000000e-01 : f32
    %208 = vector.broadcast %cst_76 : f32 to vector<16x64xf32>
    %209 = arith.mulf %208, %207 : vector<16x64xf32>
    %cst_77 = arith.constant 4.471500e-02 : f32
    %210 = vector.broadcast %cst_77 : f32 to vector<16x64xf32>
    %211 = arith.mulf %210, %207 : vector<16x64xf32>
    %212 = arith.mulf %211, %207 : vector<16x64xf32>
    %213 = arith.mulf %212, %207 : vector<16x64xf32>
    %214 = arith.addf %207, %213 : vector<16x64xf32>
    %cst_78 = arith.constant 0.797884583 : f32
    %215 = vector.broadcast %cst_78 : f32 to vector<16x64xf32>
    %216 = arith.mulf %215, %214 : vector<16x64xf32>
    %217 = math.tanh %216 : vector<16x64xf32>
    %cst_79 = arith.constant 1.000000e+00 : f32
    %218 = vector.broadcast %cst_79 : f32 to vector<16x64xf32>
    %219 = arith.addf %218, %217 : vector<16x64xf32>
    %220 = arith.mulf %209, %219 : vector<16x64xf32>
    %c984 = arith.constant 984 : index
    %c0_80 = arith.constant 0 : index
    %221 = vector.load %arg2[%c984, %c0_80] : memref<1512x128xf32, #tpu.memory_space<vmem>>, vector<64x64xf32>
    %c1048 = arith.constant 1048 : index
    %c0_81 = arith.constant 0 : index
    %222 = vector.load %arg2[%c1048, %c0_81] : memref<1512x128xf32, #tpu.memory_space<vmem>>, vector<1x64xf32>
    %cst_82 = arith.constant dense<0.000000e+00> : vector<16x64xf32>
    %223 = tpu.matmul %220, %221, %cst_82 {dimension_numbers = #tpu.dot_dimension_numbers<[1], [0], [0], [1], [0, 0, 1, 1], [], []>} : vector<16x64xf32>, vector<64x64xf32>, vector<16x64xf32> -> vector<16x64xf32>
    %224 = vector.broadcast %222 : vector<1x64xf32> to vector<16x64xf32>
    %225 = arith.addf %223, %224 : vector<16x64xf32>
    %cst_83 = arith.constant 5.000000e-01 : f32
    %226 = vector.broadcast %cst_83 : f32 to vector<16x64xf32>
    %227 = arith.mulf %226, %225 : vector<16x64xf32>
    %cst_84 = arith.constant 4.471500e-02 : f32
    %228 = vector.broadcast %cst_84 : f32 to vector<16x64xf32>
    %229 = arith.mulf %228, %225 : vector<16x64xf32>
    %230 = arith.mulf %229, %225 : vector<16x64xf32>
    %231 = arith.mulf %230, %225 : vector<16x64xf32>
    %232 = arith.addf %225, %231 : vector<16x64xf32>
    %cst_85 = arith.constant 0.797884583 : f32
    %233 = vector.broadcast %cst_85 : f32 to vector<16x64xf32>
    %234 = arith.mulf %233, %232 : vector<16x64xf32>
    %235 = math.tanh %234 : vector<16x64xf32>
    %cst_86 = arith.constant 1.000000e+00 : f32
    %236 = vector.broadcast %cst_86 : f32 to vector<16x64xf32>
    %237 = arith.addf %236, %235 : vector<16x64xf32>
    %238 = arith.mulf %227, %237 : vector<16x64xf32>
    %c1056 = arith.constant 1056 : index
    %c0_87 = arith.constant 0 : index
    %239 = vector.load %arg2[%c1056, %c0_87] : memref<1512x128xf32, #tpu.memory_space<vmem>>, vector<64x3xf32>
    %c1120 = arith.constant 1120 : index
    %c0_88 = arith.constant 0 : index
    %240 = vector.load %arg2[%c1120, %c0_88] : memref<1512x128xf32, #tpu.memory_space<vmem>>, vector<1x3xf32>
    %cst_89 = arith.constant dense<0.000000e+00> : vector<16x3xf32>
    %241 = tpu.matmul %238, %239, %cst_89 {dimension_numbers = #tpu.dot_dimension_numbers<[1], [0], [0], [1], [0, 0, 1, 1], [], []>} : vector<16x64xf32>, vector<64x3xf32>, vector<16x3xf32> -> vector<16x3xf32>
    %242 = vector.broadcast %240 : vector<1x3xf32> to vector<16x3xf32>
    %243 = arith.addf %241, %242 : vector<16x3xf32>
    %c0_90 = arith.constant 0 : index
    %c0_91 = arith.constant 0 : index
    %244 = vector.load %arg3[%c0_90, %c0_91] : memref<16x3xf32, #tpu.memory_space<vmem>>, vector<16x3xf32>
    tpu.vector_store %arg3[%c0_90, %c0_91], %243 {strides = array<i32>} : memref<16x3xf32, #tpu.memory_space<vmem>>, vector<16x3xf32>,
    %cst_92 = arith.constant dense<0xFF800000> : vector<32xf32>
    %245 = vector.multi_reduction <maximumf>, %34, %cst_92 [0] : vector<32x32xf32> to vector<32xf32>
    %246 = vector.shape_cast %245 : vector<32xf32> to vector<1x32xf32>
    %c1128 = arith.constant 1128 : index
    %c0_93 = arith.constant 0 : index
    %247 = vector.load %arg2[%c1128, %c0_93] : memref<1512x128xf32, #tpu.memory_space<vmem>>, vector<64x64xf32>
    %c1192 = arith.constant 1192 : index
    %c0_94 = arith.constant 0 : index
    %248 = vector.load %arg2[%c1192, %c0_94] : memref<1512x128xf32, #tpu.memory_space<vmem>>, vector<1x64xf32>
    %c1200 = arith.constant 1200 : index
    %c0_95 = arith.constant 0 : index
    %249 = vector.load %arg2[%c1200, %c0_95] : memref<1512x128xf32, #tpu.memory_space<vmem>>, vector<64x64xf32>
    %c1264 = arith.constant 1264 : index
    %c0_96 = arith.constant 0 : index
    %250 = vector.load %arg2[%c1264, %c0_96] : memref<1512x128xf32, #tpu.memory_space<vmem>>, vector<3x64xf32>
    %c1272 = arith.constant 1272 : index
    %c0_97 = arith.constant 0 : index
    %251 = vector.load %arg2[%c1272, %c0_97] : memref<1512x128xf32, #tpu.memory_space<vmem>>, vector<4x64xf32>
    %cst_98 = arith.constant dense<0.000000e+00> : vector<16x64xf32>
    %252 = tpu.matmul %202, %247, %cst_98 {dimension_numbers = #tpu.dot_dimension_numbers<[1], [0], [0], [1], [0, 0, 1, 1], [], []>} : vector<16x64xf32>, vector<64x64xf32>, vector<16x64xf32> -> vector<16x64xf32>
    %253 = vector.extract_strided_slice %243 {offsets = [0, 0], sizes = [16, 1], strides = [1, 1]} : vector<16x3xf32> to vector<16x1xf32>
    %254 = vector.extract_strided_slice %250 {offsets = [0, 0], sizes = [1, 64], strides = [1, 1]} : vector<3x64xf32> to vector<1x64xf32>
    %255 = vector.broadcast %253 : vector<16x1xf32> to vector<16x64xf32>
    %256 = vector.broadcast %254 : vector<1x64xf32> to vector<16x64xf32>
    %257 = arith.mulf %255, %256 : vector<16x64xf32>
    %258 = vector.extract_strided_slice %243 {offsets = [0, 1], sizes = [16, 1], strides = [1, 1]} : vector<16x3xf32> to vector<16x1xf32>
    %259 = vector.extract_strided_slice %250 {offsets = [1, 0], sizes = [1, 64], strides = [1, 1]} : vector<3x64xf32> to vector<1x64xf32>
    %260 = vector.broadcast %258 : vector<16x1xf32> to vector<16x64xf32>
    %261 = vector.broadcast %259 : vector<1x64xf32> to vector<16x64xf32>
    %262 = arith.mulf %260, %261 : vector<16x64xf32>
    %263 = arith.addf %257, %262 : vector<16x64xf32>
    %264 = vector.extract_strided_slice %243 {offsets = [0, 2], sizes = [16, 1], strides = [1, 1]} : vector<16x3xf32> to vector<16x1xf32>
    %265 = vector.extract_strided_slice %250 {offsets = [2, 0], sizes = [1, 64], strides = [1, 1]} : vector<3x64xf32> to vector<1x64xf32>
    %266 = vector.broadcast %264 : vector<16x1xf32> to vector<16x64xf32>
    %267 = vector.broadcast %265 : vector<1x64xf32> to vector<16x64xf32>
    %268 = arith.mulf %266, %267 : vector<16x64xf32>
    %269 = arith.addf %263, %268 : vector<16x64xf32>
    %270 = arith.addf %252, %269 : vector<16x64xf32>
    %cst_99 = arith.constant dense<0.000000e+00> : vector<1x64xf32>
    %271 = tpu.matmul %55, %249, %cst_99 {dimension_numbers = #tpu.dot_dimension_numbers<[1], [0], [0], [1], [0, 0, 1, 1], [], []>} : vector<1x64xf32>, vector<64x64xf32>, vector<1x64xf32> -> vector<1x64xf32>
    %272 = vector.broadcast %271 : vector<1x64xf32> to vector<16x64xf32>
    %273 = arith.addf %270, %272 : vector<16x64xf32>
    %274 = vector.broadcast %248 : vector<1x64xf32> to vector<16x64xf32>
    %275 = arith.addf %273, %274 : vector<16x64xf32>
    %276 = vector.extract_strided_slice %251 {offsets = [0, 0], sizes = [1, 64], strides = [1, 1]} : vector<4x64xf32> to vector<1x64xf32>
    %277 = vector.broadcast %276 : vector<1x64xf32> to vector<16x64xf32>
    %278 = arith.addf %275, %277 : vector<16x64xf32>
    %279 = vector.extract_strided_slice %251 {offsets = [1, 0], sizes = [1, 64], strides = [1, 1]} : vector<4x64xf32> to vector<1x64xf32>
    %280 = vector.broadcast %279 : vector<1x64xf32> to vector<16x64xf32>
    %281 = arith.addf %275, %280 : vector<16x64xf32>
    %282 = vector.extract_strided_slice %251 {offsets = [2, 0], sizes = [1, 64], strides = [1, 1]} : vector<4x64xf32> to vector<1x64xf32>
    %283 = vector.broadcast %282 : vector<1x64xf32> to vector<16x64xf32>
    %284 = arith.addf %275, %283 : vector<16x64xf32>
    %285 = vector.extract_strided_slice %251 {offsets = [3, 0], sizes = [1, 64], strides = [1, 1]} : vector<4x64xf32> to vector<1x64xf32>
    %286 = vector.broadcast %285 : vector<1x64xf32> to vector<16x64xf32>
    %287 = arith.addf %275, %286 : vector<16x64xf32>
    %288 = tpu.concatenate %278, %281, %284, %287 in 0 : vector<16x64xf32>, vector<16x64xf32>, vector<16x64xf32>, vector<16x64xf32> -> vector<64x64xf32>
    %cst_100 = arith.constant 5.000000e-01 : f32
    %289 = vector.broadcast %cst_100 : f32 to vector<64x64xf32>
    %290 = arith.mulf %289, %288 : vector<64x64xf32>
    %cst_101 = arith.constant 4.471500e-02 : f32
    %291 = vector.broadcast %cst_101 : f32 to vector<64x64xf32>
    %292 = arith.mulf %291, %288 : vector<64x64xf32>
    %293 = arith.mulf %292, %288 : vector<64x64xf32>
    %294 = arith.mulf %293, %288 : vector<64x64xf32>
    %295 = arith.addf %288, %294 : vector<64x64xf32>
    %cst_102 = arith.constant 0.797884583 : f32
    %296 = vector.broadcast %cst_102 : f32 to vector<64x64xf32>
    %297 = arith.mulf %296, %295 : vector<64x64xf32>
    %298 = math.tanh %297 : vector<64x64xf32>
    %cst_103 = arith.constant 1.000000e+00 : f32
    %299 = vector.broadcast %cst_103 : f32 to vector<64x64xf32>
    %300 = arith.addf %299, %298 : vector<64x64xf32>
    %301 = arith.mulf %290, %300 : vector<64x64xf32>
    %c1280 = arith.constant 1280 : index
    %c0_104 = arith.constant 0 : index
    %302 = vector.load %arg2[%c1280, %c0_104] : memref<1512x128xf32, #tpu.memory_space<vmem>>, vector<64x3xf32>
    %c1344 = arith.constant 1344 : index
    %c0_105 = arith.constant 0 : index
    %303 = vector.load %arg2[%c1344, %c0_105] : memref<1512x128xf32, #tpu.memory_space<vmem>>, vector<1x3xf32>
    %cst_106 = arith.constant dense<0.000000e+00> : vector<64x3xf32>
    %304 = tpu.matmul %301, %302, %cst_106 {dimension_numbers = #tpu.dot_dimension_numbers<[1], [0], [0], [1], [0, 0, 1, 1], [], []>} : vector<64x64xf32>, vector<64x3xf32>, vector<64x3xf32> -> vector<64x3xf32>
    %305 = vector.broadcast %303 : vector<1x3xf32> to vector<64x3xf32>
    %306 = arith.addf %304, %305 : vector<64x3xf32>
    %307 = tpu.concatenate %243, %243, %243, %243 in 0 : vector<16x3xf32>, vector<16x3xf32>, vector<16x3xf32>, vector<16x3xf32> -> vector<64x3xf32>
    %308 = arith.addf %307, %306 : vector<64x3xf32>
    %c0_107 = arith.constant 0 : index
    %c0_108 = arith.constant 0 : index
    %309 = vector.load %arg4[%c0_107, %c0_108] : memref<64x3xf32, #tpu.memory_space<vmem>>, vector<64x3xf32>
    tpu.vector_store %arg4[%c0_107, %c0_108], %308 {strides = array<i32>} : memref<64x3xf32, #tpu.memory_space<vmem>>, vector<64x3xf32>,
    %c1352 = arith.constant 1352 : index
    %c0_109 = arith.constant 0 : index
    %310 = vector.load %arg2[%c1352, %c0_109] : memref<1512x128xf32, #tpu.memory_space<vmem>>, vector<64x32xf32>
    %c1416 = arith.constant 1416 : index
    %c0_110 = arith.constant 0 : index
    %311 = vector.load %arg2[%c1416, %c0_110] : memref<1512x128xf32, #tpu.memory_space<vmem>>, vector<1x32xf32>
    %c1424 = arith.constant 1424 : index
    %c0_111 = arith.constant 0 : index
    %312 = vector.load %arg2[%c1424, %c0_111] : memref<1512x128xf32, #tpu.memory_space<vmem>>, vector<32x32xf32>
    %c1456 = arith.constant 1456 : index
    %c0_112 = arith.constant 0 : index
    %313 = vector.load %arg2[%c1456, %c0_112] : memref<1512x128xf32, #tpu.memory_space<vmem>>, vector<3x32xf32>
    %c1464 = arith.constant 1464 : index
    %c0_113 = arith.constant 0 : index
    %314 = vector.load %arg2[%c1464, %c0_113] : memref<1512x128xf32, #tpu.memory_space<vmem>>, vector<4x32xf32>
    %cst_114 = arith.constant dense<0.000000e+00> : vector<64x32xf32>
    %315 = tpu.matmul %301, %310, %cst_114 {dimension_numbers = #tpu.dot_dimension_numbers<[1], [0], [0], [1], [0, 0, 1, 1], [], []>} : vector<64x64xf32>, vector<64x32xf32>, vector<64x32xf32> -> vector<64x32xf32>
    %316 = vector.extract_strided_slice %308 {offsets = [0, 0], sizes = [64, 1], strides = [1, 1]} : vector<64x3xf32> to vector<64x1xf32>
    %317 = vector.extract_strided_slice %313 {offsets = [0, 0], sizes = [1, 32], strides = [1, 1]} : vector<3x32xf32> to vector<1x32xf32>
    %318 = vector.broadcast %316 : vector<64x1xf32> to vector<64x32xf32>
    %319 = vector.broadcast %317 : vector<1x32xf32> to vector<64x32xf32>
    %320 = arith.mulf %318, %319 : vector<64x32xf32>
    %321 = vector.extract_strided_slice %308 {offsets = [0, 1], sizes = [64, 1], strides = [1, 1]} : vector<64x3xf32> to vector<64x1xf32>
    %322 = vector.extract_strided_slice %313 {offsets = [1, 0], sizes = [1, 32], strides = [1, 1]} : vector<3x32xf32> to vector<1x32xf32>
    %323 = vector.broadcast %321 : vector<64x1xf32> to vector<64x32xf32>
    %324 = vector.broadcast %322 : vector<1x32xf32> to vector<64x32xf32>
    %325 = arith.mulf %323, %324 : vector<64x32xf32>
    %326 = arith.addf %320, %325 : vector<64x32xf32>
    %327 = vector.extract_strided_slice %308 {offsets = [0, 2], sizes = [64, 1], strides = [1, 1]} : vector<64x3xf32> to vector<64x1xf32>
    %328 = vector.extract_strided_slice %313 {offsets = [2, 0], sizes = [1, 32], strides = [1, 1]} : vector<3x32xf32> to vector<1x32xf32>
    %329 = vector.broadcast %327 : vector<64x1xf32> to vector<64x32xf32>
    %330 = vector.broadcast %328 : vector<1x32xf32> to vector<64x32xf32>
    %331 = arith.mulf %329, %330 : vector<64x32xf32>
    %332 = arith.addf %326, %331 : vector<64x32xf32>
    %333 = arith.addf %315, %332 : vector<64x32xf32>
    %cst_115 = arith.constant dense<0.000000e+00> : vector<1x32xf32>
    %334 = tpu.matmul %246, %312, %cst_115 {dimension_numbers = #tpu.dot_dimension_numbers<[1], [0], [0], [1], [0, 0, 1, 1], [], []>} : vector<1x32xf32>, vector<32x32xf32>, vector<1x32xf32> -> vector<1x32xf32>
    %335 = vector.broadcast %334 : vector<1x32xf32> to vector<64x32xf32>
    %336 = arith.addf %333, %335 : vector<64x32xf32>
    %337 = vector.broadcast %311 : vector<1x32xf32> to vector<64x32xf32>
    %338 = arith.addf %336, %337 : vector<64x32xf32>
    %339 = vector.extract_strided_slice %314 {offsets = [0, 0], sizes = [1, 32], strides = [1, 1]} : vector<4x32xf32> to vector<1x32xf32>
    %340 = vector.broadcast %339 : vector<1x32xf32> to vector<64x32xf32>
    %341 = arith.addf %338, %340 : vector<64x32xf32>
    %342 = vector.extract_strided_slice %314 {offsets = [1, 0], sizes = [1, 32], strides = [1, 1]} : vector<4x32xf32> to vector<1x32xf32>
    %343 = vector.broadcast %342 : vector<1x32xf32> to vector<64x32xf32>
    %344 = arith.addf %338, %343 : vector<64x32xf32>
    %345 = vector.extract_strided_slice %314 {offsets = [2, 0], sizes = [1, 32], strides = [1, 1]} : vector<4x32xf32> to vector<1x32xf32>
    %346 = vector.broadcast %345 : vector<1x32xf32> to vector<64x32xf32>
    %347 = arith.addf %338, %346 : vector<64x32xf32>
    %348 = vector.extract_strided_slice %314 {offsets = [3, 0], sizes = [1, 32], strides = [1, 1]} : vector<4x32xf32> to vector<1x32xf32>
    %349 = vector.broadcast %348 : vector<1x32xf32> to vector<64x32xf32>
    %350 = arith.addf %338, %349 : vector<64x32xf32>
    %351 = tpu.concatenate %341, %344, %347, %350 in 0 : vector<64x32xf32>, vector<64x32xf32>, vector<64x32xf32>, vector<64x32xf32> -> vector<256x32xf32>
    %cst_116 = arith.constant 5.000000e-01 : f32
    %352 = vector.broadcast %cst_116 : f32 to vector<256x32xf32>
    %353 = arith.mulf %352, %351 : vector<256x32xf32>
    %cst_117 = arith.constant 4.471500e-02 : f32
    %354 = vector.broadcast %cst_117 : f32 to vector<256x32xf32>
    %355 = arith.mulf %354, %351 : vector<256x32xf32>
    %356 = arith.mulf %355, %351 : vector<256x32xf32>
    %357 = arith.mulf %356, %351 : vector<256x32xf32>
    %358 = arith.addf %351, %357 : vector<256x32xf32>
    %cst_118 = arith.constant 0.797884583 : f32
    %359 = vector.broadcast %cst_118 : f32 to vector<256x32xf32>
    %360 = arith.mulf %359, %358 : vector<256x32xf32>
    %361 = math.tanh %360 : vector<256x32xf32>
    %cst_119 = arith.constant 1.000000e+00 : f32
    %362 = vector.broadcast %cst_119 : f32 to vector<256x32xf32>
    %363 = arith.addf %362, %361 : vector<256x32xf32>
    %364 = arith.mulf %353, %363 : vector<256x32xf32>
    %c1472 = arith.constant 1472 : index
    %c0_120 = arith.constant 0 : index
    %365 = vector.load %arg2[%c1472, %c0_120] : memref<1512x128xf32, #tpu.memory_space<vmem>>, vector<32x3xf32>
    %c1504 = arith.constant 1504 : index
    %c0_121 = arith.constant 0 : index
    %366 = vector.load %arg2[%c1504, %c0_121] : memref<1512x128xf32, #tpu.memory_space<vmem>>, vector<1x3xf32>
    %cst_122 = arith.constant dense<0.000000e+00> : vector<256x3xf32>
    %367 = tpu.matmul %364, %365, %cst_122 {dimension_numbers = #tpu.dot_dimension_numbers<[1], [0], [0], [1], [0, 0, 1, 1], [], []>} : vector<256x32xf32>, vector<32x3xf32>, vector<256x3xf32> -> vector<256x3xf32>
    %368 = vector.broadcast %366 : vector<1x3xf32> to vector<256x3xf32>
    %369 = arith.addf %367, %368 : vector<256x3xf32>
    %370 = tpu.concatenate %308, %308, %308, %308 in 0 : vector<64x3xf32>, vector<64x3xf32>, vector<64x3xf32>, vector<64x3xf32> -> vector<256x3xf32>
    %371 = arith.addf %370, %369 : vector<256x3xf32>
    %c0_123 = arith.constant 0 : index
    %c0_124 = arith.constant 0 : index
    %372 = vector.load %arg5[%c0_123, %c0_124] : memref<256x3xf32, #tpu.memory_space<vmem>>, vector<256x3xf32>
    tpu.vector_store %arg5[%c0_123, %c0_124], %371 {strides = array<i32>} : memref<256x3xf32, #tpu.memory_space<vmem>>, vector<256x3xf32>,
    return
  }
  func.func @transform_0(%arg0: i32) -> (i32, i32) {
    %c0_i32 = arith.constant 0 : i32
    %c0_i32_0 = arith.constant 0 : i32
    return %arg0, %c0_i32 : i32, i32
  }
  func.func @transform_1(%arg0: i32) -> (i32, i32) {
    %c0_i32 = arith.constant 0 : i32
    %c0_i32_0 = arith.constant 0 : i32
    %c0_i32_1 = arith.constant 0 : i32
    return %c0_i32, %c0_i32_0 : i32, i32
  }
  func.func @transform_2(%arg0: i32) -> (i32, i32) {
    %c0_i32 = arith.constant 0 : i32
    %c0_i32_0 = arith.constant 0 : i32
    return %arg0, %c0_i32 : i32, i32
  }
  func.func @transform_3(%arg0: i32) -> (i32, i32) {
    %c0_i32 = arith.constant 0 : i32
    %c0_i32_0 = arith.constant 0 : i32
    return %arg0, %c0_i32 : i32, i32
  }
  func.func @transform_4(%arg0: i32) -> (i32, i32) {
    %c0_i32 = arith.constant 0 : i32
    %c0_i32_0 = arith.constant 0 : i32
    return %arg0, %c0_i32 : i32, i32
  }
}

</mosaic_0001>

<bundles_post_ra>
// kernel: forward.1
= control target key start
LH: loop header
LB: loop body
LE: loop exit
PB: predicated region body
PF: predicated region fallthrough
CT: control target
= control target key end

     0   :  { %10 = vsyncpa [#allocation3], 0  ;;  %s4593_s15 = smov 0   ;;  %s5580_s0 = inlined_call_operand.vmem [shape: f32[64,3], index: 0, kind: input, shape index: {}]   ;;  %s5581_s1 = inlined_call_operand.hbm [shape: f32[1512,128], index: 1, kind: input, shape index: {}]   ;;  %s5582_s2 = inlined_call_operand.vmem [shape: f32[32,3], index: 2, kind: output, shape index: {0}]   ;;  %s5583_s3 = inlined_call_operand.vmem [shape: f32[128,3], index: 3, kind: output, shape index: {1}]   ;;  %s5584_s4 = inlined_call_operand.vmem [shape: f32[512,3], index: 4, kind: output, shape index: {2}]  }
   0x1 LB: > { %s4599_s16 = sadd.s32 4294967295, %s4558_s15   ;;  %p3521_p0 = scmp.ge.s32.totalorder %s4558_s15, 1  ;;  %s4558_s15 = sphi %s4593_s15, %s16_s15  }
   0x2   : > { %p146_p1 = scmp.lt.s32.totalorder %s4558_s15, 3  ;;  %s4560_s17 = smov [#allocation2]  }
   0x3   : > { %s158_s18 = sshll.u32 %s4560_s17, 4  ;;  %p4341_p3 = scmp.eq.s32.totalorder %s4599_s16, 0  ;;  %s159_s18 = int_to_ptr.vmem [resolvable:$true] %s158_s18 }
   0x4   : > { %p4603_p2 = pnand %p3521_p0, %p146_p1  ;;  %s4533_s20 = scalar_lea.vmem %s159_s18, 24192 }
   0x5   : > { %p4534_p7 = scmp.ne.s32.totalorder %s159_s18, %s4533_s20  ;;  %p4541_p10 = scmp.lt.s32.totalorder %s159_s18, %s159_s18 }
   0x6   : > { %p4337_p4 = pneg %p4603_p2  ;;  %p4542_p11 = scmp.lt.s32.totalorder %s4533_s20, %s4533_s20 }
   0x8   : > { %p4338_p5 = pnand %p4341_p3, %p4337_p4  ;;  %p4543_p12 = por %p4542_p11, %p4541_p10 }
   0xa   : > { %p4524_p6 = pneg %p4338_p5 }
   0xc   : > { %p4536_p8 = pnand %p4534_p7, %p4524_p6 }
   0xe   : > { %p4537_p9 = pneg %p4536_p8 }
  0x10   : > { %p4544_p13 = pnand %p4543_p12, %p4537_p9 }
  0x12   : > { %4547 = shalt.err (!%p4544_p13)
}
  0x13   : > { %s4561_s21 = smov 128   ;;  %s4562_s22 = smov 8  }
  0x14   : > { %4340 = dma.hbm_to_vmem [thread:$0]  (!%p4338_p5), %s5581_s1, 24192, %s159_s18, [#allocation3], %s4561_s21, %s4561_s21, %s4562_s22  }
  0x15   : > { %183 = sbr.rel (%p4603_p2) target bundleno = 3308 (0xcec), region = 28 }
  0x1a   : > { %4553 = dma.done.wait (%p4341_p3), [#allocation3], 24192  }
  0x1b   : > { %4555 = vsyncadd (%p4341_p3), [#allocation3], 4294943104  ;;  %s3526_s25 = sshll.u32 %s4599_s16, 2  ;;  %v4563_v0 = vmov 0   ;;  %v4564_v3 = vmov 1   ;;  %v4565_v4 = vmov 2   ;;  %v269_v9 = vlaneseq }
  0x1c   : > { %4361 = vset.pattern.permute.xlu1 %v4563_v0  ;;  %4359 = vset.pattern.permute.xlu0 %v4563_v0  ;;  %p220_p0 = scmp.lt.s32.totalorder %s3526_s25, 7  ;;  %v380_v5 = vld [vmem:[#allocation2 + $0x20] sm:$0xff]  ;;  %v379_v6 = vld [vmem:[#allocation2 + $0x18] sm:$0xff]  ;;  %v378_v7 = vld [vmem:[#allocation2 + $0x10] sm:$0xff]  ;;  %vm386_vm0 = vcmask 261120   ;;  %v4566_v59 = vmov 0.0  }
  0x1d   : > { %3869 = vmatprep.subr.mxu0 %v380_v5  ;;  %v377_v8 = vld [vmem:[#allocation2 + $0x8] sm:$0xff]  ;;  %v4637_v10 = vshrl.u32 %v269_v9, 7  ;;  %v247_v15 = vld [vmem:[#allocation2] sm:$0x7]  ;;  %v3534_v32 = vld [vmem:[#allocation2 + $0x3] ss:$0 sm:$0xff]  ;;  %3880 = vmatprep.subr.mxu1 %v4566_v59 }
  0x1e   : > { %s5587_s25 = smov (!%p220_p0, %s3526_s25), 7  ;;  %3870 = vmatpush3.msra.mxu0 %v380_v5  ;;  %v503_v58 = vld [vmem:[#allocation2 + $0x68] sm:$0xff]  ;;  %v502_v60 = vld [vmem:[#allocation2 + $0x60] sm:$0xff]  ;;  %vm4567_vm1 = vmmov 0   ;;  %v501_v61 = vld [vmem:[#allocation2 + $0x58] sm:$0xff]  ;;  %vm486_vm2 = vcmask 523264  }
  0x1f   : > { %s3527_s26 = sshll.u32 %s5587_s25, 3  ;;  %3871 = vmatprep.subr.mxu0 %v379_v6  ;;  %v4640_v11 = vsub.s32 1, %v4637_v10  ;;  %v4643_v14 = vsub.s32 0, %v4637_v10  ;;  %v4649_v17 = vsub.s32 2, %v4637_v10  ;;  %3896 = vmatprep.mubr.msk.f32.mxu1 %vm4567_vm1, %v4566_v59  ;;  %v500_v62 = vld [vmem:[#allocation2 + $0x50] sm:$0xff]  ;;  %v499_v63 = vld [vmem:[#allocation2 + $0x48] sm:$0xff] }
  0x20   : > { %s4627_s29 = scalar_lea.vmem %s5580_s0, %s3527_s26  ;;  %3872 = vmatpush3.msra.mxu0 %v379_v6  ;;  %3881 = vmatpush3.msra.mxu1 %v503_v58  ;;  %v496_v5 = vld [vmem:[#allocation2 + $0x30] sm:$0xff]  ;;  %v690_v6 = vld [vmem:[#allocation2 + $0x118] sm:$0xff]  ;;  %v596_v58 = vld [vmem:[#allocation2 + $0xc0] sm:$0xff]  ;;  %vm600_vm3 = vcmask 785408   ;;  %s3528_s30 = sshll.u32 %s4599_s16, 1  ;;  %vm1786_vm4 = vcmask 23552  }
  0x21   : > { %v244_v1 = vld [vmem:[%s4627_s29 + $0x8] sm:$0xff]  ;;  %v243_v2 = vld [vmem:[%s4627_s29] sm:$0xff]  ;;  %3873 = vmatprep.subr.mxu0 %v378_v7  ;;  %v4646_v16 = vrot.slane %v247_v15, %v4640_v11  ;;  %v4652_v18 = vrot.slane %v247_v15, %v4643_v14  ;;  %v4657_v23 = vrot.slane %v247_v15, %v4649_v17  ;;  %3882 = vmatprep.subr.mxu1 %v4566_v59  ;;  %p226_p1 = scmp.lt.s32.totalorder %s3528_s30, 3  ;;  %s3530_s9 = sshll.u32 %s4599_s16, 3 }
  0x22   : > { %256 = vperm.xlu1 %4361, %v244_v1   ;;  %251 = vperm.xlu0 %4359, %v243_v2   ;;  %p232_p2 = scmp.lt.s32.totalorder %s3530_s9, 15  ;;  %s3532_s14 = sshll.u32 %s4599_s16, 5 }
  0x23   : > { %3874 = vmatpush3.msra.mxu0 %v378_v7  ;;  %3883 = vmatpush3.msra.mxu1 %v502_v60  ;;  %v3535_v7 = vld [vmem:[#allocation2 + $0x28] ss:$0 sm:$0xff]  ;;  %v595_v60 = vld [vmem:[#allocation2 + $0xb8] sm:$0xff]  ;;  %s5589_s30 = smov (!%p226_p1, %s3528_s30), 3  ;;  %p238_p3 = scmp.lt.s32.totalorder %s3532_s14, 63 }
  0x24   : > { %3875 = vmatprep.subr.mxu0 %v377_v8  ;;  %3884 = vmatprep.subr.mxu1 %v4566_v59  ;;  %s3529_s5 = sshll.u32 %s5589_s30, 3  ;;  %s5591_s9 = smov (!%p232_p2, %s3530_s9), 15 }
  0x25   : > { %3876 = vmatpush3.msra.mxu0 %v377_v8  ;;  %3885 = vmatpush3.msra.mxu1 %v501_v61  ;;  %v594_v61 = vld [vmem:[#allocation2 + $0xb0] sm:$0xff]  ;;  %s229_s8 = scalar_lea.vmem %s5582_s2, %s3529_s5  ;;  %s3531_s10 = sshll.u32 %s5591_s9, 3 }
  0x26   : > { %4362 = vset.pattern.permute.xlu1 %v4564_v3  ;;  %4360 = vset.pattern.permute.xlu0 %v4564_v3  ;;  %s4909_s13 = scalar_lea.vmem %s5583_s3, %s3531_s10  ;;  %s5593_s14 = smov (!%p238_p3, %s3532_s14), 63 }
  0x27   : > { %282 = vperm.xlu1 %4362, %v244_v1   ;;  %278 = vperm.xlu0 %4360, %v243_v2   ;;  %s3533_s17 = sshll.u32 %s5593_s14, 3 }
  0x28   : > { %3899 = vmatprep.subr.mxu0 %v4566_v59  ;;  %3886 = vmatprep.subr.mxu1 %v4566_v59  ;;  %s5448_s20 = scalar_lea.vmem %s5584_s4, %s3533_s17 }
  0x29   : > { %3887 = vmatpush3.msra.mxu1 %v500_v62  ;;  %v593_v62 = vld [vmem:[#allocation2 + $0xa8] sm:$0xff] }
  0x2a   : > { %3888 = vmatprep.subr.mxu1 %v4566_v59 }
  0x2b   : > { %4363 = vset.pattern.permute.xlu1 %v4565_v4  ;;  %4364 = vset.pattern.permute.xlu0 %v4565_v4 }
  0x2c   : > { %306 = vperm.xlu1 %4363, %v243_v2   ;;  %310 = vperm.xlu0 %4364, %v244_v1   ;;  %v498_v1 = vld [vmem:[#allocation2 + $0x40] sm:$0xff]  ;;  %v497_v2 = vld [vmem:[#allocation2 + $0x38] sm:$0xff] }
  0x2d   : > { %3889 = vmatpush3.msra.mxu1 %v499_v63  ;;  %v592_v63 = vld [vmem:[#allocation2 + $0xa0] sm:$0xff] }
  0x2e   : > { %3890 = vmatprep.subr.mxu1 %v4566_v59 }
  0x2f   : > { %3891 = vmatpush3.msra.mxu1 %v498_v1  ;;  %v591_v1 = vld [vmem:[#allocation2 + $0x98] sm:$0xff] }
  0x30   : > { %4366 = vset.pattern.permute.xlu1 %v4564_v3  ;;  %4365 = vset.pattern.permute.xlu0 %v4563_v0 }
  0x31   : > { %3892 = vmatprep.subr.mxu1 %v4566_v59 }
  0x32   : > { %3893 = vmatpush3.msra.mxu1 %v497_v2  ;;  %v590_v2 = vld [vmem:[#allocation2 + $0x90] sm:$0xff] }
  0x33   : > { %3894 = vmatprep.subr.mxu1 %v4566_v59 }
  0x34   : > { %3895 = vmatpush3.msra.mxu1 %v496_v5  ;;  %v589_v5 = vld [vmem:[#allocation2 + $0x88] sm:$0xff] }
  0x35   : > { %3926 = vmatprep.subr.mxu1 %v690_v6 }
  0x9d   : > { %v257_v12 = vpop.permute.xlu1 %256  ;;  %v252_v13 = vpop.permute.xlu0 %251 }
  0x9e   : > { %v274_v24 = vmul.f32 %v4652_v18, %v257_v12  ;;  %v273_v25 = vmul.f32 %v4652_v18, %v252_v13 }
  0xa2   : > { %v283_v19 = vpop.permute.xlu1 %282  ;;  %v279_v20 = vpop.permute.xlu0 %278 }
  0xa3   : > { %v298_v21 = vmul.f32 %v4646_v16, %v283_v19  ;;  %v297_v22 = vmul.f32 %v4646_v16, %v279_v20 }
  0xa5   : > { %v302_v28 = vadd.f32 %v298_v21, %v274_v24  ;;  %v301_v29 = vadd.f32 %v297_v22, %v273_v25 }
  0xa7   : > { %v307_v26 = vpop.permute.xlu1 %306  ;;  %v311_v27 = vpop.permute.xlu0 %310 }
  0xa8   : > { %v325_v30 = vmul.f32 %v4657_v23, %v307_v26  ;;  %v326_v31 = vmul.f32 %v4657_v23, %v311_v27 }
  0xaa   : > { %v329_v33 = vadd.f32 %v325_v30, %v301_v29  ;;  %v330_v34 = vadd.f32 %v326_v31, %v302_v28 }
  0xac   : > { %v337_v35 = vadd.f32 %v3534_v32, %v329_v33  ;;  %v338_v36 = vadd.f32 %v3534_v32, %v330_v34 }
  0xae   : > { %v346_v37 = vmul.f32 0.044715, %v338_v36  ;;  %v345_v38 = vmul.f32 0.044715, %v337_v35  ;;  %v341_v49 = vmul.f32 0.5, %v337_v35  ;;  %v342_v51 = vmul.f32 0.5, %v338_v36 }
  0xb0   : > { %v350_v39 = vmul.f32 %v346_v37, %v338_v36  ;;  %v349_v40 = vmul.f32 %v345_v38, %v337_v35 }
  0xb2   : > { %v353_v41 = vmul.f32 %v349_v40, %v337_v35  ;;  %v354_v42 = vmul.f32 %v350_v39, %v338_v36 }
  0xb4   : > { %v357_v43 = vadd.f32 %v353_v41, %v337_v35  ;;  %v358_v44 = vadd.f32 %v354_v42, %v338_v36 }
  0xb6   : > { %v361_v45 = vmul.f32 0.7978846, %v357_v43  ;;  %v362_v46 = vmul.f32 0.7978846, %v358_v44 }
  0xb8   : > { %4393 = vtanh.f32 %v361_v45 }
  0xb9   : > { %4395 = vtanh.f32 %v362_v46  ;;  %v689_v46 = vld [vmem:[#allocation2 + $0x110] sm:$0xff] }
  0xc5   : > { %v4394_v47 = vpop.eup %4393 }
  0xc6   : > { %v4396_v48 = vpop.eup %4395  ;;  %v369_v50 = vadd.f32 1.0, %v4394_v47  ;;  %v688_v47 = vld [vmem:[#allocation2 + $0x108] sm:$0xff] }
  0xc7   : > { %v370_v52 = vadd.f32 1.0, %v4396_v48  ;;  %v687_v48 = vld [vmem:[#allocation2 + $0x100] sm:$0xff] }
  0xc8   : > { %v373_v53 = vmul.f32 %v369_v50, %v341_v49  ;;  %v686_v49 = vld [vmem:[#allocation2 + $0xf8] sm:$0xff]  ;;  %v685_v50 = vld [vmem:[#allocation2 + $0xf0] sm:$0xff] }
  0xc9   : > { %v374_v54 = vmul.f32 %v370_v52, %v342_v51  ;;  %v684_v51 = vld [vmem:[#allocation2 + $0xe8] sm:$0xff]  ;;  %v683_v52 = vld [vmem:[#allocation2 + $0xe0] sm:$0xff] }
  0xca   : > { %3877 = vmatprep.mubr.msk.f32.mxu0 %vm386_vm0, %v373_v53  ;;  %v4665_v55 = vsel %vm386_vm0, %v373_v53, -inf  ;;  %v598_v53 = vld [vmem:[#allocation2 + $0xd0] sm:$0xff] }
  0xcb   : > { %v4668_v56 = vsel %vm386_vm0, %v374_v54, -inf  ;;  %3878 = vmatmul.mubr.msk.f32.vlgmr.msra.gmra.mxu0 %vm386_vm0, %v374_v54  ;;  %v597_v54 = vld [vmem:[#allocation2 + $0xc8] sm:$0xff] }
  0xcc   : > { %v1793_v57 = vmax.f32 %v4665_v55, %v4668_v56  ;;  %3923 = vmatprep.mubr.msk.f32.mxu0 %vm4567_vm1, %v4566_v59  ;;  %3900 = vmatpush3.msra.mxu0 %v598_v53  ;;  %v798_v53 = vld [vmem:[#allocation2 + $0x140] sm:$0xff] }
  0xcd   : > { %3901 = vmatprep.subr.mxu0 %v4566_v59 }
  0xce   : > { %3902 = vmatpush3.msra.mxu0 %v597_v54 }
  0xcf   : > { %3903 = vmatprep.subr.mxu0 %v4566_v59 }
  0xd0   : > { %3904 = vmatpush3.msra.mxu0 %v596_v58 }
  0xd1   : > { %3905 = vmatprep.subr.mxu0 %v4566_v59 }
  0xd2   : > { %3906 = vmatpush3.msra.mxu0 %v595_v60 }
  0xd3   : > { %3907 = vmatprep.subr.mxu0 %v4566_v59 }
  0xd4   : > { %3908 = vmatpush3.msra.mxu0 %v594_v61  ;;  %v797_v61 = vld [vmem:[#allocation2 + $0x138] sm:$0xff] }
  0xd5   : > { %3909 = vmatprep.subr.mxu0 %v4566_v59 }
  0xd6   : > { %3910 = vmatpush3.msra.mxu0 %v593_v62 }
  0xd7   : > { %3911 = vmatprep.subr.mxu0 %v4566_v59 }
  0xd8   : > { %3912 = vmatpush3.msra.mxu0 %v592_v63  ;;  %v796_v63 = vld [vmem:[#allocation2 + $0x130] sm:$0xff] }
  0xd9   : > { %3913 = vmatprep.subr.mxu0 %v4566_v59 }
  0xda   : > { %3914 = vmatpush3.msra.mxu0 %v591_v1 }
  0xdb   : > { %3915 = vmatprep.subr.mxu0 %v4566_v59 }
  0xdc   : > { %3916 = vmatpush3.msra.mxu0 %v590_v2  ;;  %v795_v2 = vld [vmem:[#allocation2 + $0x128] sm:$0xff] }
  0xdd   : > { %3917 = vmatprep.subr.mxu0 %v4566_v59 }
  0xde   : > { %3918 = vmatpush3.msra.mxu0 %v589_v5 }
  0xdf   : > { %3919 = vmatprep.subr.mxu0 %v4566_v59 }
 0x18b   : > { %v3879_v8 = vpop.f32.mrf.mxu0 }
 0x18c   : > { %v465_v9 = vadd.f32 %v3879_v8, %v3535_v7  ;;  %v806_v8 = vld [vmem:[#allocation2 + $0x180] sm:$0xff] }
 0x18d   : > { %v459_v12 = vpop.f32.mrf.mxu0 }
 0x18e   : > { %v471_v13 = vmul.f32 0.044715, %v465_v9  ;;  %v460_v15 = vadd.f32 %v3535_v7, %v459_v12  ;;  %v469_v30 = vmul.f32 0.5, %v465_v9  ;;  %v587_v7 = vld [vmem:[#allocation2 + $0x78] sm:$0xff] }
 0x190   : > { %v473_v19 = vmul.f32 %v471_v13, %v465_v9  ;;  %v470_v20 = vmul.f32 0.044715, %v460_v15  ;;  %v468_v34 = vmul.f32 0.5, %v460_v15 }
 0x192   : > { %v475_v21 = vmul.f32 %v473_v19, %v465_v9  ;;  %v472_v22 = vmul.f32 %v470_v20, %v460_v15 }
 0x194   : > { %v477_v24 = vadd.f32 %v475_v21, %v465_v9  ;;  %v474_v25 = vmul.f32 %v472_v22, %v460_v15  ;;  %v504_v9 = vld [vmem:[#allocation2 + $0x70] sm:$0x1] }
 0x196   : > { %v479_v26 = vmul.f32 0.7978846, %v477_v24  ;;  %v476_v27 = vadd.f32 %v474_v25, %v460_v15  ;;  %v3540_v25 = vld [vmem:[#allocation2 + $0x120] ss:$0 sm:$0xff] }
 0x198   : > { %4397 = vtanh.f32 %v479_v26  ;;  %v478_v28 = vmul.f32 0.7978846, %v476_v27 }
 0x19a   : > { %4399 = vtanh.f32 %v478_v28 }
 0x1a5   : > { %v4398_v29 = vpop.eup %4397 }
 0x1a6   : > { %v483_v31 = vadd.f32 1.0, %v4398_v29 }
 0x1a7   : > { %v4400_v32 = vpop.eup %4399 }
 0x1a8   : > { %v485_v33 = vmul.f32 %v483_v31, %v469_v30  ;;  %v482_v35 = vadd.f32 1.0, %v4400_v32 }
 0x1aa   : > { %v484_v36 = vmul.f32 %v482_v35, %v468_v34  ;;  %v488_v38 = vsel %vm486_vm2, %v485_v33, -inf }
 0x1ac   : > { %v487_v37 = vsel %vm486_vm2, %v484_v36, -inf }
 0x1ad   : > { %v489_v39 = vmax.f32 %v487_v37, %v488_v38 }
 0x1af   : > { %v490_v40 = vrot.slane %v489_v39, 4 }
 0x1b1   : > { %v491_v41 = vmax.f32 %v489_v39, %v490_v40 }
 0x1b3   : > { %v492_v42 = vrot.slane %v491_v41, 2 }
 0x1b5   : > { %v493_v43 = vmax.f32 %v491_v41, %v492_v42 }
 0x1b7   : > { %v494_v44 = vrot.slane %v493_v43, 1 }
 0x1b9   : > { %v4688_v45 = vmax.f32 %v493_v43, %v494_v44  ;;  %v805_v44 = vld [vmem:[#allocation2 + $0x178] sm:$0xff] }
 0x1bb   : > { %3897 = vmatmul.mubr.msk.f32.vlgmr.msra.gmra.mxu1 %vm486_vm2, %v4688_v45 }
 0x1bc   : > { %3927 = vmatpush3.msra.mxu1 %v690_v6  ;;  %3942 = vmatprep.mubr.msk.f32.mxu1 %vm486_vm2, %v484_v36  ;;  %v588_v6 = vld [vmem:[#allocation2 + $0x80] sm:$0xff] }
 0x1bd   : > { %3928 = vmatprep.subr.mxu1 %v689_v46  ;;  %3920 = vmatpush3.msra.mxu0 %v588_v6 }
 0x1be   : > { %3929 = vmatpush3.msra.mxu1 %v689_v46  ;;  %3921 = vmatprep.subr.mxu0 %v4566_v59  ;;  %v804_v46 = vld [vmem:[#allocation2 + $0x170] sm:$0xff] }
 0x1bf   : > { %3930 = vmatprep.subr.mxu1 %v688_v47  ;;  %3922 = vmatpush3.msra.mxu0 %v587_v7  ;;  %v935_v7 = vld [vmem:[#allocation2 + $0x250] sm:$0xff] }
 0x1c0   : > { %3931 = vmatpush3.msra.mxu1 %v688_v47  ;;  %3945 = vmatprep.subr.mxu0 %v806_v8  ;;  %v803_v47 = vld [vmem:[#allocation2 + $0x168] sm:$0xff] }
 0x1c1   : > { %3932 = vmatprep.subr.mxu1 %v687_v48 }
 0x1c2   : > { %3933 = vmatpush3.msra.mxu1 %v687_v48  ;;  %v802_v48 = vld [vmem:[#allocation2 + $0x160] sm:$0xff] }
 0x1c3   : > { %3934 = vmatprep.subr.mxu1 %v686_v49 }
 0x1c4   : > { %3935 = vmatpush3.msra.mxu1 %v686_v49  ;;  %v801_v49 = vld [vmem:[#allocation2 + $0x158] sm:$0xff] }
 0x1c5   : > { %3936 = vmatprep.subr.mxu1 %v685_v50 }
 0x1c6   : > { %3937 = vmatpush3.msra.mxu1 %v685_v50  ;;  %v800_v50 = vld [vmem:[#allocation2 + $0x150] sm:$0xff] }
 0x1c7   : > { %3938 = vmatprep.subr.mxu1 %v684_v51 }
 0x1c8   : > { %3939 = vmatpush3.msra.mxu1 %v684_v51  ;;  %v799_v51 = vld [vmem:[#allocation2 + $0x148] sm:$0xff] }
 0x1c9   : > { %3940 = vmatprep.subr.mxu1 %v683_v52 }
 0x1ca   : > { %3941 = vmatpush3.msra.mxu1 %v683_v52 }
 0x1cb   : > { %3943 = vmatmul.mubr.msk.f32.vlgmr.msra.gmra.mxu1 %vm486_vm2, %v485_v33  ;;  %3972 = vmatprep.subr.mxu1 %v4566_v59 }
 0x1cc   : > { %3996 = vmatprep.mubr.msk.f32.mxu1 %vm4567_vm1, %v4566_v59  ;;  %3973 = vmatpush3.msra.mxu1 %v935_v7 }
 0x1cd   : > { %3974 = vmatprep.subr.mxu1 %v4566_v59 }
 0x27b   : > { %v574_v12 = vpop.f32.mrf.mxu1 }
 0x27c   : > { %v575_v13 = vadd.f32 %v574_v12, %v504_v9  ;;  %v933_v9 = vld [vmem:[#allocation2 + $0x240] sm:$0xff]  ;;  %v932_v12 = vld [vmem:[#allocation2 + $0x238] sm:$0xff] }
 0x27d   : > { %v3898_v15 = vpop.f32.mrf.mxu1 }
 0x27e   : > { %v579_v19 = vmul.f32 0.044715, %v575_v13  ;;  %v578_v38 = vmul.f32 0.5, %v575_v13  ;;  %v930_v15 = vld [vmem:[#allocation2 + $0x228] sm:$0xff] }
 0x280   : > { %v580_v20 = vmul.f32 %v579_v19, %v575_v13  ;;  %v929_v19 = vld [vmem:[#allocation2 + $0x220] sm:$0xff] }
 0x282   : > { %v581_v21 = vmul.f32 %v580_v20, %v575_v13  ;;  %v928_v20 = vld [vmem:[#allocation2 + $0x218] sm:$0xff] }
 0x284   : > { %v582_v22 = vadd.f32 %v581_v21, %v575_v13  ;;  %v931_v13 = vld [vmem:[#allocation2 + $0x230] sm:$0xff] }
 0x285   : > { %v927_v21 = vld [vmem:[#allocation2 + $0x210] sm:$0xff] }
 0x286   : > { %v583_v24 = vmul.f32 0.7978846, %v582_v22  ;;  %v926_v22 = vld [vmem:[#allocation2 + $0x208] sm:$0xff] }
 0x288   : > { %4401 = vtanh.f32 %v583_v24  ;;  %v925_v24 = vld [vmem:[#allocation2 + $0x200] sm:$0xff] }
 0x28b   : > { %v3944_v26 = vpop.f32.mrf.mxu1 }
 0x28c   : > { %v774_v27 = vadd.f32 %v3944_v26, %v3540_v25  ;;  %v922_v26 = vld [vmem:[#allocation2 + $0x1e8] sm:$0xff] }
 0x28d   : > { %v768_v28 = vpop.f32.mrf.mxu1 }
 0x28e   : > { %v780_v29 = vmul.f32 0.044715, %v774_v27  ;;  %v769_v30 = vadd.f32 %v3540_v25, %v768_v28  ;;  %v778_v5 = vmul.f32 0.5, %v774_v27  ;;  %v924_v25 = vld [vmem:[#allocation2 + $0x1f8] sm:$0xff] }
 0x28f   : > { %v920_v28 = vld [vmem:[#allocation2 + $0x1d8] sm:$0xff] }
 0x290   : > { %v782_v31 = vmul.f32 %v780_v29, %v774_v27  ;;  %v779_v32 = vmul.f32 0.044715, %v769_v30  ;;  %v777_v54 = vmul.f32 0.5, %v769_v30  ;;  %v919_v29 = vld [vmem:[#allocation2 + $0x1d0] sm:$0xff] }
 0x292   : > { %v784_v33 = vmul.f32 %v782_v31, %v774_v27  ;;  %v781_v34 = vmul.f32 %v779_v32, %v769_v30  ;;  %v917_v31 = vld [vmem:[#allocation2 + $0x1c0] sm:$0xff]  ;;  %v916_v32 = vld [vmem:[#allocation2 + $0x1b8] sm:$0xff] }
 0x294   : > { %v786_v35 = vadd.f32 %v784_v33, %v774_v27  ;;  %v783_v36 = vmul.f32 %v781_v34, %v769_v30  ;;  %v921_v27 = vld [vmem:[#allocation2 + $0x1e0] sm:$0xff]  ;;  %v915_v33 = vld [vmem:[#allocation2 + $0x1b0] sm:$0xff]  ;;  %v914_v34 = vld [vmem:[#allocation2 + $0x1a8] sm:$0xff] }
 0x295   : > { %v4402_v37 = vpop.eup %4401 }
 0x296   : > { %v785_v39 = vadd.f32 %v783_v36, %v769_v30  ;;  %v585_v40 = vadd.f32 1.0, %v4402_v37  ;;  %v788_v41 = vmul.f32 0.7978846, %v786_v35  ;;  %v918_v30 = vld [vmem:[#allocation2 + $0x1c8] sm:$0xff]  ;;  %v913_v35 = vld [vmem:[#allocation2 + $0x1a0] sm:$0xff]  ;;  %v912_v36 = vld [vmem:[#allocation2 + $0x198] sm:$0xff] }
 0x297   : > { %v911_v37 = vld [vmem:[#allocation2 + $0x190] sm:$0xff] }
 0x298   : > { %v586_v42 = vmul.f32 %v585_v40, %v578_v38  ;;  %v787_v43 = vmul.f32 0.7978846, %v785_v39  ;;  %v599_v38 = vld [vmem:[#allocation2 + $0xd8] sm:$0x1] }
 0x29a   : > { %3924 = vmatmul.mubr.msk.f32.vlgmr.msra.gmra.mxu0 %vm600_vm3, %v586_v42  ;;  %4403 = vtanh.f32 %v787_v43 }
 0x29b   : > { %3946 = vmatpush3.msra.mxu0 %v806_v8  ;;  %4405 = vtanh.f32 %v788_v41  ;;  %v934_v8 = vld [vmem:[#allocation2 + $0x248] sm:$0xff] }
 0x29c   : > { %3947 = vmatprep.subr.mxu0 %v805_v44  ;;  %3975 = vmatpush3.msra.mxu1 %v934_v8 }
 0x29d   : > { %3948 = vmatpush3.msra.mxu0 %v805_v44  ;;  %3976 = vmatprep.subr.mxu1 %v4566_v59 }
 0x29e   : > { %3949 = vmatprep.subr.mxu0 %v804_v46  ;;  %3977 = vmatpush3.msra.mxu1 %v933_v9 }
 0x29f   : > { %3950 = vmatpush3.msra.mxu0 %v804_v46  ;;  %3978 = vmatprep.subr.mxu1 %v4566_v59 }
 0x2a0   : > { %3951 = vmatprep.subr.mxu0 %v803_v47  ;;  %3979 = vmatpush3.msra.mxu1 %v932_v12 }
 0x2a1   : > { %3952 = vmatpush3.msra.mxu0 %v803_v47  ;;  %3980 = vmatprep.subr.mxu1 %v4566_v59 }
 0x2a2   : > { %3953 = vmatprep.subr.mxu0 %v802_v48  ;;  %3981 = vmatpush3.msra.mxu1 %v931_v13 }
 0x2a3   : > { %3954 = vmatpush3.msra.mxu0 %v802_v48  ;;  %3982 = vmatprep.subr.mxu1 %v4566_v59  ;;  %v3543_v48 = vld [vmem:[#allocation2 + $0x188] ss:$0 sm:$0xff] }
 0x2a4   : > { %3955 = vmatprep.subr.mxu0 %v801_v49  ;;  %3983 = vmatpush3.msra.mxu1 %v930_v15 }
 0x2a5   : > { %3956 = vmatpush3.msra.mxu0 %v801_v49  ;;  %3984 = vmatprep.subr.mxu1 %v4566_v59 }
 0x2a6   : > { %3957 = vmatprep.subr.mxu0 %v800_v50  ;;  %3985 = vmatpush3.msra.mxu1 %v929_v19 }
 0x2a7   : > { %v4404_v52 = vpop.eup %4403  ;;  %3958 = vmatpush3.msra.mxu0 %v800_v50  ;;  %3986 = vmatprep.subr.mxu1 %v4566_v59 }
 0x2a8   : > { %3959 = vmatprep.subr.mxu0 %v799_v51  ;;  %v791_v58 = vadd.f32 1.0, %v4404_v52  ;;  %v4406_v60 = vpop.eup %4405  ;;  %3987 = vmatpush3.msra.mxu1 %v928_v20 }
 0x2a9   : > { %3960 = vmatpush3.msra.mxu0 %v799_v51  ;;  %v792_v1 = vadd.f32 1.0, %v4406_v60  ;;  %3988 = vmatprep.subr.mxu1 %v4566_v59 }
 0x2aa   : > { %3961 = vmatprep.subr.mxu0 %v798_v53  ;;  %v793_v62 = vmul.f32 %v791_v58, %v777_v54  ;;  %3989 = vmatpush3.msra.mxu1 %v927_v21 }
 0x2ab   : > { %3962 = vmatpush3.msra.mxu0 %v798_v53  ;;  %v794_v6 = vmul.f32 %v792_v1, %v778_v5  ;;  %3990 = vmatprep.subr.mxu1 %v4566_v59 }
 0x2ac   : > { %3963 = vmatprep.subr.mxu0 %v797_v61  ;;  %3969 = vmatprep.mubr.msk.f32.mxu0 %vm600_vm3, %v793_v62 }
 0x2ad   : > { %3964 = vmatpush3.msra.mxu0 %v797_v61  ;;  %3991 = vmatpush3.msra.mxu1 %v926_v22 }
 0x2ae   : > { %3965 = vmatprep.subr.mxu0 %v796_v63  ;;  %3992 = vmatprep.subr.mxu1 %v4566_v59 }
 0x2af   : > { %3966 = vmatpush3.msra.mxu0 %v796_v63  ;;  %3993 = vmatpush3.msra.mxu1 %v925_v24 }
 0x2b0   : > { %3967 = vmatprep.subr.mxu0 %v795_v2  ;;  %3994 = vmatprep.subr.mxu1 %v4566_v59 }
 0x2b1   : > { %3968 = vmatpush3.msra.mxu0 %v795_v2  ;;  %3995 = vmatpush3.msra.mxu1 %v924_v25  ;;  %v1129_v25 = vld [vmem:[#allocation2 + $0x2b0] sm:$0xff] }
 0x2b2   : > { %3970 = vmatmul.mubr.msk.f32.vlgmr.msra.gmra.mxu0 %vm600_vm3, %v794_v6  ;;  %3999 = vmatprep.subr.mxu0 %v922_v26 }
 0x2b3   : > { %4000 = vmatpush3.msra.mxu0 %v922_v26  ;;  %4026 = vmatprep.subr.mxu1 %v1129_v25  ;;  %v1128_v26 = vld [vmem:[#allocation2 + $0x2a8] sm:$0xff] }
 0x2b4   : > { %4001 = vmatprep.subr.mxu0 %v921_v27 }
 0x2b5   : > { %4002 = vmatpush3.msra.mxu0 %v921_v27  ;;  %v1127_v27 = vld [vmem:[#allocation2 + $0x2a0] sm:$0xff] }
 0x2b6   : > { %4003 = vmatprep.subr.mxu0 %v920_v28 }
 0x2b7   : > { %4004 = vmatpush3.msra.mxu0 %v920_v28  ;;  %v1126_v28 = vld [vmem:[#allocation2 + $0x298] sm:$0xff] }
 0x2b8   : > { %4005 = vmatprep.subr.mxu0 %v919_v29 }
 0x2b9   : > { %4006 = vmatpush3.msra.mxu0 %v919_v29  ;;  %v1125_v29 = vld [vmem:[#allocation2 + $0x290] sm:$0xff] }
 0x2ba   : > { %4007 = vmatprep.subr.mxu0 %v918_v30 }
 0x2bb   : > { %4008 = vmatpush3.msra.mxu0 %v918_v30  ;;  %v1124_v30 = vld [vmem:[#allocation2 + $0x288] sm:$0xff] }
 0x2bc   : > { %4009 = vmatprep.subr.mxu0 %v917_v31 }
 0x2bd   : > { %4010 = vmatpush3.msra.mxu0 %v917_v31  ;;  %v1123_v31 = vld [vmem:[#allocation2 + $0x280] sm:$0xff] }
 0x2be   : > { %4011 = vmatprep.subr.mxu0 %v916_v32 }
 0x2bf   : > { %4012 = vmatpush3.msra.mxu0 %v916_v32  ;;  %v1122_v32 = vld [vmem:[#allocation2 + $0x278] sm:$0xff] }
 0x2c0   : > { %4013 = vmatprep.subr.mxu0 %v915_v33 }
 0x2c1   : > { %4014 = vmatpush3.msra.mxu0 %v915_v33  ;;  %v1121_v33 = vld [vmem:[#allocation2 + $0x270] sm:$0xff] }
 0x2c2   : > { %4015 = vmatprep.subr.mxu0 %v914_v34 }
 0x2c3   : > { %4016 = vmatpush3.msra.mxu0 %v914_v34  ;;  %v1120_v34 = vld [vmem:[#allocation2 + $0x268] sm:$0xff] }
 0x2c4   : > { %4017 = vmatprep.subr.mxu0 %v913_v35 }
 0x2c5   : > { %4018 = vmatpush3.msra.mxu0 %v913_v35  ;;  %v1119_v35 = vld [vmem:[#allocation2 + $0x260] sm:$0xff] }
 0x2c6   : > { %4019 = vmatprep.subr.mxu0 %v912_v36 }
 0x2c7   : > { %4020 = vmatpush3.msra.mxu0 %v912_v36  ;;  %v1118_v36 = vld [vmem:[#allocation2 + $0x258] sm:$0xff] }
 0x2c8   : > { %4021 = vmatprep.subr.mxu0 %v911_v37 }
 0x2c9   : > { %4022 = vmatpush3.msra.mxu0 %v911_v37 }
 0x35a   : > { %v670_v39 = vpop.f32.mrf.mxu0 }
 0x35b   : > { %v671_v40 = vadd.f32 %v670_v39, %v599_v38 }
 0x35c   : > { %v3925_v41 = vpop.f32.mrf.mxu0 }
 0x35d   : > { %v675_v42 = vmul.f32 0.044715, %v671_v40  ;;  %v674_v53 = vmul.f32 0.5, %v671_v40 }
 0x35f   : > { %v676_v43 = vmul.f32 %v675_v42, %v671_v40 }
 0x361   : > { %v677_v44 = vmul.f32 %v676_v43, %v671_v40 }
 0x363   : > { %v678_v46 = vadd.f32 %v677_v44, %v671_v40  ;;  %v3549_v40 = vld [vmem:[#allocation2 + $0x1f0] ss:$0 sm:$0xff] }
 0x365   : > { %v679_v47 = vmul.f32 0.7978846, %v678_v46 }
 0x367   : > { %4407 = vtanh.f32 %v679_v47 }
 0x372   : > { %v3971_v49 = vpop.f32.mrf.mxu0 }
 0x373   : > { %v890_v50 = vadd.f32 %v3971_v49, %v3543_v48 }
 0x374   : > { %v4408_v51 = vpop.eup %4407  ;;  %v884_v52 = vpop.f32.mrf.mxu0 }
 0x375   : > { %v896_v54 = vmul.f32 0.044715, %v890_v50  ;;  %v885_v58 = vadd.f32 %v3543_v48, %v884_v52  ;;  %v681_v60 = vadd.f32 1.0, %v4408_v51  ;;  %v894_v21 = vmul.f32 0.5, %v890_v50 }
 0x377   : > { %v898_v61 = vmul.f32 %v896_v54, %v890_v50  ;;  %v895_v62 = vmul.f32 0.044715, %v885_v58  ;;  %v682_v63 = vmul.f32 %v681_v60, %v674_v53  ;;  %v893_v19 = vmul.f32 0.5, %v885_v58 }
 0x379   : > { %v900_v1 = vmul.f32 %v898_v61, %v890_v50  ;;  %v897_v2 = vmul.f32 %v895_v62, %v885_v58  ;;  %3997 = vmatmul.mubr.msk.f32.vlgmr.msra.gmra.mxu1 %vm600_vm3, %v682_v63 }
 0x37a   : > { %4027 = vmatpush3.msra.mxu1 %v1129_v25  ;;  %v1236_v25 = vld [vmem:[#allocation2 + $0x2d0] sm:$0xff] }
 0x37b   : > { %v902_v5 = vadd.f32 %v900_v1, %v890_v50  ;;  %v899_v6 = vmul.f32 %v897_v2, %v885_v58  ;;  %4028 = vmatprep.subr.mxu1 %v1128_v26 }
 0x37c   : > { %4029 = vmatpush3.msra.mxu1 %v1128_v26  ;;  %v1235_v26 = vld [vmem:[#allocation2 + $0x2c8] sm:$0xff] }
 0x37d   : > { %v904_v7 = vmul.f32 0.7978846, %v902_v5  ;;  %v901_v8 = vadd.f32 %v899_v6, %v885_v58  ;;  %4030 = vmatprep.subr.mxu1 %v1127_v27 }
 0x37e   : > { %4031 = vmatpush3.msra.mxu1 %v1127_v27  ;;  %v1234_v27 = vld [vmem:[#allocation2 + $0x2c0] sm:$0xff] }
 0x37f   : > { %4409 = vtanh.f32 %v904_v7  ;;  %v903_v9 = vmul.f32 0.7978846, %v901_v8  ;;  %4032 = vmatprep.subr.mxu1 %v1126_v28 }
 0x380   : > { %4033 = vmatpush3.msra.mxu1 %v1126_v28  ;;  %v3550_v28 = vld [vmem:[#allocation2 + $0x2b8] ss:$0 sm:$0xff] }
 0x381   : > { %4411 = vtanh.f32 %v903_v9  ;;  %4034 = vmatprep.subr.mxu1 %v1125_v29  ;;  %v1245_v9 = vld [vmem:[#allocation2 + $0x318] sm:$0xff] }
 0x382   : > { %4035 = vmatpush3.msra.mxu1 %v1125_v29  ;;  %4053 = vmatprep.subr.mxu0 %v1245_v9 }
 0x383   : > { %4036 = vmatprep.subr.mxu1 %v1124_v30 }
 0x384   : > { %4037 = vmatpush3.msra.mxu1 %v1124_v30 }
 0x385   : > { %4038 = vmatprep.subr.mxu1 %v1123_v31 }
 0x386   : > { %4039 = vmatpush3.msra.mxu1 %v1123_v31 }
 0x387   : > { %4040 = vmatprep.subr.mxu1 %v1122_v32 }
 0x388   : > { %4041 = vmatpush3.msra.mxu1 %v1122_v32 }
 0x389   : > { %4042 = vmatprep.subr.mxu1 %v1121_v33 }
 0x38a   : > { %4043 = vmatpush3.msra.mxu1 %v1121_v33 }
 0x38b   : > { %4044 = vmatprep.subr.mxu1 %v1120_v34 }
 0x38c   : > { %v4410_v12 = vpop.eup %4409  ;;  %4045 = vmatpush3.msra.mxu1 %v1120_v34 }
 0x38d   : > { %v908_v15 = vadd.f32 1.0, %v4410_v12  ;;  %4046 = vmatprep.subr.mxu1 %v1119_v35  ;;  %v1244_v12 = vld [vmem:[#allocation2 + $0x310] sm:$0xff] }
 0x38e   : > { %v4412_v13 = vpop.eup %4411  ;;  %4047 = vmatpush3.msra.mxu1 %v1119_v35 }
 0x38f   : > { %v907_v20 = vadd.f32 1.0, %v4412_v13  ;;  %v910_v24 = vmul.f32 %v908_v15, %v894_v21  ;;  %4048 = vmatprep.subr.mxu1 %v1118_v36  ;;  %v1243_v13 = vld [vmem:[#allocation2 + $0x308] sm:$0xff]  ;;  %v1242_v15 = vld [vmem:[#allocation2 + $0x300] sm:$0xff] }
 0x390   : > { %4049 = vmatpush3.msra.mxu1 %v1118_v36  ;;  %v1239_v21 = vld [vmem:[#allocation2 + $0x2e8] sm:$0xff] }
 0x391   : > { %v909_v22 = vmul.f32 %v907_v20, %v893_v19  ;;  %v1241_v19 = vld [vmem:[#allocation2 + $0x2f8] sm:$0xff]  ;;  %v1240_v20 = vld [vmem:[#allocation2 + $0x2f0] sm:$0xff] }
 0x393   : > { %4023 = vmatprep.mubr.msk.f32.mxu0 %vm600_vm3, %v909_v22  ;;  %v1238_v22 = vld [vmem:[#allocation2 + $0x2e0] sm:$0xff] }
 0x394   : > { %4024 = vmatmul.mubr.msk.f32.vlgmr.msra.gmra.mxu0 %vm600_vm3, %v910_v24  ;;  %v1237_v24 = vld [vmem:[#allocation2 + $0x2d8] sm:$0xff] }
 0x395   : > { %4054 = vmatpush3.msra.mxu0 %v1245_v9 }
 0x396   : > { %4055 = vmatprep.subr.mxu0 %v1244_v12 }
 0x397   : > { %4056 = vmatpush3.msra.mxu0 %v1244_v12 }
 0x398   : > { %4057 = vmatprep.subr.mxu0 %v1243_v13 }
 0x399   : > { %4058 = vmatpush3.msra.mxu0 %v1243_v13 }
 0x39a   : > { %4059 = vmatprep.subr.mxu0 %v1242_v15 }
 0x39b   : > { %4060 = vmatpush3.msra.mxu0 %v1242_v15 }
 0x39c   : > { %4061 = vmatprep.subr.mxu0 %v1241_v19 }
 0x39d   : > { %4062 = vmatpush3.msra.mxu0 %v1241_v19 }
 0x39e   : > { %4063 = vmatprep.subr.mxu0 %v1240_v20 }
 0x39f   : > { %4064 = vmatpush3.msra.mxu0 %v1240_v20 }
 0x3a0   : > { %4065 = vmatprep.subr.mxu0 %v1239_v21 }
 0x3a1   : > { %4066 = vmatpush3.msra.mxu0 %v1239_v21 }
 0x3a2   : > { %4067 = vmatprep.subr.mxu0 %v1238_v22 }
 0x3a3   : > { %4068 = vmatpush3.msra.mxu0 %v1238_v22 }
 0x3a4   : > { %4069 = vmatprep.subr.mxu0 %v1237_v24 }
 0x3a5   : > { %4070 = vmatpush3.msra.mxu0 %v1237_v24 }
 0x3a6   : > { %4071 = vmatprep.subr.mxu0 %v1236_v25 }
 0x3a7   : > { %4072 = vmatpush3.msra.mxu0 %v1236_v25 }
 0x3a8   : > { %4073 = vmatprep.subr.mxu0 %v1235_v26 }
 0x3a9   : > { %4074 = vmatpush3.msra.mxu0 %v1235_v26 }
 0x3aa   : > { %4075 = vmatprep.subr.mxu0 %v1234_v27 }
 0x3ab   : > { %4076 = vmatpush3.msra.mxu0 %v1234_v27 }
 0x439   : > { %v1005_v37 = vpop.f32.mrf.mxu1 }
 0x43a   : > { %v1012_v39 = vrot.slane %v1005_v37, %v4643_v14 }
 0x43b   : > { %v3998_v38 = vpop.f32.mrf.mxu1 }
 0x454   : > { %v4025_v41 = vpop.f32.mrf.mxu0 }
 0x455   : > { %v1091_v42 = vadd.f32 %v4025_v41, %v1012_v39 }
 0x456   : > { %v1085_v43 = vpop.f32.mrf.mxu0 }
 0x457   : > { %v1099_v44 = vadd.f32 %v3549_v40, %v1091_v42  ;;  %v1086_v46 = vadd.f32 %v1085_v43, %v1012_v39 }
 0x459   : > { %v1103_v47 = vmul.f32 0.044715, %v1099_v44  ;;  %v1098_v48 = vadd.f32 %v3549_v40, %v1086_v46  ;;  %v1101_v6 = vmul.f32 0.5, %v1099_v44 }
 0x45b   : > { %v1105_v49 = vmul.f32 %v1103_v47, %v1099_v44  ;;  %v1102_v50 = vmul.f32 0.044715, %v1098_v48  ;;  %v1100_v2 = vmul.f32 0.5, %v1098_v48 }
 0x45d   : > { %v1107_v51 = vmul.f32 %v1105_v49, %v1099_v44  ;;  %v1104_v52 = vmul.f32 %v1102_v50, %v1098_v48 }
 0x45f   : > { %v1109_v53 = vadd.f32 %v1107_v51, %v1099_v44  ;;  %v1106_v54 = vmul.f32 %v1104_v52, %v1098_v48  ;;  %v1363_v52 = vld [vmem:[#allocation2 + $0x380] sm:$0xff] }
 0x460   : > { %4080 = vmatprep.subr.mxu1 %v1363_v52 }
 0x461   : > { %v1111_v58 = vmul.f32 0.7978846, %v1109_v53  ;;  %v1108_v60 = vadd.f32 %v1106_v54, %v1098_v48  ;;  %v1362_v53 = vld [vmem:[#allocation2 + $0x378] sm:$0xff]  ;;  %v1361_v54 = vld [vmem:[#allocation2 + $0x370] sm:$0xff] }
 0x463   : > { %4413 = vtanh.f32 %v1111_v58  ;;  %v1110_v61 = vmul.f32 0.7978846, %v1108_v60  ;;  %v1360_v58 = vld [vmem:[#allocation2 + $0x368] sm:$0xff]  ;;  %v1359_v60 = vld [vmem:[#allocation2 + $0x360] sm:$0xff] }
 0x465   : > { %4415 = vtanh.f32 %v1110_v61  ;;  %v1358_v61 = vld [vmem:[#allocation2 + $0x358] sm:$0xff] }
 0x470   : > { %v4414_v62 = vpop.eup %4413 }
 0x471   : > { %v1115_v1 = vadd.f32 1.0, %v4414_v62  ;;  %v1357_v62 = vld [vmem:[#allocation2 + $0x350] sm:$0xff] }
 0x472   : > { %v4416_v63 = vpop.eup %4415 }
 0x473   : > { %v1114_v5 = vadd.f32 1.0, %v4416_v63  ;;  %v1117_v8 = vmul.f32 %v1115_v1, %v1101_v6  ;;  %v1356_v63 = vld [vmem:[#allocation2 + $0x348] sm:$0xff]  ;;  %v1355_v1 = vld [vmem:[#allocation2 + $0x340] sm:$0xff] }
 0x474   : > { %v1352_v6 = vld [vmem:[#allocation2 + $0x328] sm:$0xff] }
 0x475   : > { %v1116_v7 = vmul.f32 %v1114_v5, %v1100_v2  ;;  %v1354_v2 = vld [vmem:[#allocation2 + $0x338] sm:$0xff]  ;;  %v1353_v5 = vld [vmem:[#allocation2 + $0x330] sm:$0xff] }
 0x477   : > { %4050 = vmatprep.mubr.msk.f32.mxu1 %vm600_vm3, %v1116_v7  ;;  %v3553_v7 = vld [vmem:[#allocation2 + $0x320] ss:$0 sm:$0xff] }
 0x478   : > { %4051 = vmatmul.mubr.msk.f32.vlgmr.msra.gmra.mxu1 %vm600_vm3, %v1117_v8 }
 0x479   : > { %4081 = vmatpush3.msra.mxu1 %v1363_v52 }
 0x47a   : > { %4082 = vmatprep.subr.mxu1 %v1362_v53 }
 0x47b   : > { %4083 = vmatpush3.msra.mxu1 %v1362_v53 }
 0x47c   : > { %4084 = vmatprep.subr.mxu1 %v1361_v54 }
 0x47d   : > { %4085 = vmatpush3.msra.mxu1 %v1361_v54 }
 0x47e   : > { %4086 = vmatprep.subr.mxu1 %v1360_v58 }
 0x47f   : > { %4087 = vmatpush3.msra.mxu1 %v1360_v58 }
 0x480   : > { %4088 = vmatprep.subr.mxu1 %v1359_v60 }
 0x481   : > { %4089 = vmatpush3.msra.mxu1 %v1359_v60 }
 0x482   : > { %4090 = vmatprep.subr.mxu1 %v1358_v61 }
 0x483   : > { %4091 = vmatpush3.msra.mxu1 %v1358_v61 }
 0x484   : > { %4092 = vmatprep.subr.mxu1 %v1357_v62 }
 0x485   : > { %4093 = vmatpush3.msra.mxu1 %v1357_v62 }
 0x486   : > { %4094 = vmatprep.subr.mxu1 %v1356_v63 }
 0x487   : > { %4095 = vmatpush3.msra.mxu1 %v1356_v63 }
 0x488   : > { %4096 = vmatprep.subr.mxu1 %v1355_v1 }
 0x489   : > { %4097 = vmatpush3.msra.mxu1 %v1355_v1 }
 0x48a   : > { %4098 = vmatprep.subr.mxu1 %v1354_v2 }
 0x48b   : > { %4099 = vmatpush3.msra.mxu1 %v1354_v2 }
 0x48c   : > { %4100 = vmatprep.subr.mxu1 %v1353_v5 }
 0x48d   : > { %4101 = vmatpush3.msra.mxu1 %v1353_v5 }
 0x48e   : > { %4102 = vmatprep.subr.mxu1 %v1352_v6 }
 0x48f   : > { %4103 = vmatpush3.msra.mxu1 %v1352_v6 }
 0x538   : > { %v4052_v29 = vpop.f32.mrf.mxu1 }
 0x539   : > { %v1213_v30 = vadd.f32 %v4052_v29, %v3550_v28 }
 0x53a   : > { %v1207_v31 = vpop.f32.mrf.mxu1 }
 0x53b   : > { %v1219_v32 = vmul.f32 0.044715, %v1213_v30  ;;  %v1208_v33 = vadd.f32 %v3550_v28, %v1207_v31  ;;  %v1217_v49 = vmul.f32 0.5, %v1213_v30 }
 0x53d   : > { %v1221_v34 = vmul.f32 %v1219_v32, %v1213_v30  ;;  %v1218_v35 = vmul.f32 0.044715, %v1208_v33  ;;  %v1216_v47 = vmul.f32 0.5, %v1208_v33 }
 0x53f   : > { %v1223_v36 = vmul.f32 %v1221_v34, %v1213_v30  ;;  %v1220_v37 = vmul.f32 %v1218_v35, %v1208_v33 }
 0x541   : > { %v1225_v38 = vadd.f32 %v1223_v36, %v1213_v30  ;;  %v1222_v39 = vmul.f32 %v1220_v37, %v1208_v33 }
 0x543   : > { %v1227_v40 = vmul.f32 0.7978846, %v1225_v38  ;;  %v1224_v41 = vadd.f32 %v1222_v39, %v1208_v33  ;;  %v1475_v39 = vld [vmem:[#allocation2 + $0x3c8] sm:$0xff] }
 0x544   : > { %4107 = vmatprep.subr.mxu0 %v1475_v39 }
 0x545   : > { %4417 = vtanh.f32 %v1227_v40  ;;  %v1226_v42 = vmul.f32 0.7978846, %v1224_v41  ;;  %v1474_v40 = vld [vmem:[#allocation2 + $0x3c0] sm:$0xff]  ;;  %v1473_v41 = vld [vmem:[#allocation2 + $0x3b8] sm:$0xff] }
 0x547   : > { %4419 = vtanh.f32 %v1226_v42  ;;  %v1472_v42 = vld [vmem:[#allocation2 + $0x3b0] sm:$0xff] }
 0x552   : > { %v4418_v43 = vpop.eup %4417 }
 0x553   : > { %v1231_v46 = vadd.f32 1.0, %v4418_v43  ;;  %v1471_v43 = vld [vmem:[#allocation2 + $0x3a8] sm:$0xff] }
 0x554   : > { %v4420_v44 = vpop.eup %4419 }
 0x555   : > { %v1230_v48 = vadd.f32 1.0, %v4420_v44  ;;  %v4730_v51 = vmul.f32 %v1231_v46, %v1217_v49  ;;  %v1470_v44 = vld [vmem:[#allocation2 + $0x3a0] sm:$0xff]  ;;  %v1469_v46 = vld [vmem:[#allocation2 + $0x398] sm:$0xff] }
 0x557   : > { %v4728_v50 = vmul.f32 %v1230_v48, %v1216_v47  ;;  %v1468_v47 = vld [vmem:[#allocation2 + $0x390] sm:$0xff]  ;;  %v3556_v48 = vld [vmem:[#allocation2 + $0x388] ss:$0 sm:$0xff] }
 0x559   : > { %4077 = vmatprep.mubr.msk.f32.mxu0 %vm600_vm3, %v4728_v50 }
 0x55a   : > { %4078 = vmatmul.mubr.msk.f32.vlgmr.msra.gmra.mxu0 %vm600_vm3, %v4730_v51 }
 0x55b   : > { %4108 = vmatpush3.msra.mxu0 %v1475_v39 }
 0x55c   : > { %4109 = vmatprep.subr.mxu0 %v1474_v40 }
 0x55d   : > { %4110 = vmatpush3.msra.mxu0 %v1474_v40 }
 0x55e   : > { %4111 = vmatprep.subr.mxu0 %v1473_v41 }
 0x55f   : > { %4112 = vmatpush3.msra.mxu0 %v1473_v41 }
 0x560   : > { %4113 = vmatprep.subr.mxu0 %v1472_v42 }
 0x561   : > { %4114 = vmatpush3.msra.mxu0 %v1472_v42 }
 0x562   : > { %4115 = vmatprep.subr.mxu0 %v1471_v43 }
 0x563   : > { %4116 = vmatpush3.msra.mxu0 %v1471_v43 }
 0x564   : > { %4117 = vmatprep.subr.mxu0 %v1470_v44 }
 0x565   : > { %4118 = vmatpush3.msra.mxu0 %v1470_v44 }
 0x566   : > { %4119 = vmatprep.subr.mxu0 %v1469_v46 }
 0x567   : > { %4120 = vmatpush3.msra.mxu0 %v1469_v46 }
 0x568   : > { %4121 = vmatprep.subr.mxu0 %v1468_v47 }
 0x569   : > { %4122 = vmatpush3.msra.mxu0 %v1468_v47 }
 0x61a   : > { %v4079_v8 = vpop.f32.mrf.mxu0 }
 0x61b   : > { %v1329_v9 = vadd.f32 %v4079_v8, %v3553_v7 }
 0x61c   : > { %v1323_v12 = vpop.f32.mrf.mxu0 }
 0x61d   : > { %v1335_v13 = vmul.f32 0.044715, %v1329_v9  ;;  %v1324_v15 = vadd.f32 %v3553_v7, %v1323_v12  ;;  %v1333_v32 = vmul.f32 0.5, %v1329_v9 }
 0x61f   : > { %v1337_v19 = vmul.f32 %v1335_v13, %v1329_v9  ;;  %v1334_v20 = vmul.f32 0.044715, %v1324_v15  ;;  %v1332_v33 = vmul.f32 0.5, %v1324_v15 }
 0x621   : > { %v1339_v21 = vmul.f32 %v1337_v19, %v1329_v9  ;;  %v1336_v22 = vmul.f32 %v1334_v20, %v1324_v15  ;;  %v1587_v20 = vld [vmem:[#allocation2 + $0x410] sm:$0xff] }
 0x622   : > { %4126 = vmatprep.subr.mxu1 %v1587_v20 }
 0x623   : > { %v1341_v24 = vadd.f32 %v1339_v21, %v1329_v9  ;;  %v1338_v25 = vmul.f32 %v1336_v22, %v1324_v15  ;;  %v1586_v21 = vld [vmem:[#allocation2 + $0x408] sm:$0xff]  ;;  %v1585_v22 = vld [vmem:[#allocation2 + $0x400] sm:$0xff] }
 0x625   : > { %v1343_v26 = vmul.f32 0.7978846, %v1341_v24  ;;  %v1340_v27 = vadd.f32 %v1338_v25, %v1324_v15  ;;  %v1584_v24 = vld [vmem:[#allocation2 + $0x3f8] sm:$0xff]  ;;  %v1583_v25 = vld [vmem:[#allocation2 + $0x3f0] sm:$0xff] }
 0x627   : > { %4421 = vtanh.f32 %v1343_v26  ;;  %v1342_v28 = vmul.f32 0.7978846, %v1340_v27  ;;  %v1582_v26 = vld [vmem:[#allocation2 + $0x3e8] sm:$0xff]  ;;  %v1581_v27 = vld [vmem:[#allocation2 + $0x3e0] sm:$0xff] }
 0x629   : > { %4423 = vtanh.f32 %v1342_v28  ;;  %v1580_v28 = vld [vmem:[#allocation2 + $0x3d8] sm:$0xff] }
 0x634   : > { %v4422_v29 = vpop.eup %4421 }
 0x635   : > { %v1347_v30 = vadd.f32 1.0, %v4422_v29  ;;  %v1809_v29 = vld [vmem:[#allocation2 + $0x4a0] sm:$0xff] }
 0x636   : > { %v4424_v31 = vpop.eup %4423 }
 0x637   : > { %v1346_v34 = vadd.f32 1.0, %v4424_v31  ;;  %v1349_v35 = vmul.f32 %v1347_v30, %v1333_v32  ;;  %v3559_v30 = vld [vmem:[#allocation2 + $0x3d0] ss:$0 sm:$0xff] }
 0x639   : > { %v1348_v36 = vmul.f32 %v1346_v34, %v1332_v33  ;;  %v1351_v38 = vadd.f32 %v1349_v35, %v4730_v51 }
 0x63b   : > { %v1350_v37 = vadd.f32 %v1348_v36, %v4728_v50 }
 0x63d   : > { %4104 = vmatprep.mubr.msk.f32.mxu1 %vm600_vm3, %v1350_v37 }
 0x63e   : > { %4105 = vmatmul.mubr.msk.f32.vlgmr.msra.gmra.mxu1 %vm600_vm3, %v1351_v38 }
 0x63f   : > { %4127 = vmatpush3.msra.mxu1 %v1587_v20 }
 0x640   : > { %4128 = vmatprep.subr.mxu1 %v1586_v21 }
 0x641   : > { %4129 = vmatpush3.msra.mxu1 %v1586_v21 }
 0x642   : > { %4130 = vmatprep.subr.mxu1 %v1585_v22 }
 0x643   : > { %4131 = vmatpush3.msra.mxu1 %v1585_v22 }
 0x644   : > { %4132 = vmatprep.subr.mxu1 %v1584_v24 }
 0x645   : > { %4133 = vmatpush3.msra.mxu1 %v1584_v24 }
 0x646   : > { %4134 = vmatprep.subr.mxu1 %v1583_v25 }
 0x647   : > { %4135 = vmatpush3.msra.mxu1 %v1583_v25 }
 0x648   : > { %4136 = vmatprep.subr.mxu1 %v1582_v26 }
 0x649   : > { %4137 = vmatpush3.msra.mxu1 %v1582_v26 }
 0x64a   : > { %4138 = vmatprep.subr.mxu1 %v1581_v27 }
 0x64b   : > { %4139 = vmatpush3.msra.mxu1 %v1581_v27 }
 0x64c   : > { %4140 = vmatprep.subr.mxu1 %v1580_v28 }
 0x64d   : > { %4141 = vmatpush3.msra.mxu1 %v1580_v28 }
 0x64e   : > { %4164 = vmatprep.subr.mxu1 %v1809_v29 }
 0x6fe   : > { %v4106_v49 = vpop.f32.mrf.mxu1 }
 0x6ff   : > { %v1447_v50 = vadd.f32 %v4106_v49, %v3556_v48 }
 0x700   : > { %v1441_v51 = vpop.f32.mrf.mxu1 }
 0x701   : > { %v1453_v52 = vmul.f32 0.044715, %v1447_v50  ;;  %v1442_v53 = vadd.f32 %v3556_v48, %v1441_v51  ;;  %v1451_v13 = vmul.f32 0.5, %v1447_v50 }
 0x703   : > { %v1455_v54 = vmul.f32 %v1453_v52, %v1447_v50  ;;  %v1452_v58 = vmul.f32 0.044715, %v1442_v53  ;;  %v1450_v9 = vmul.f32 0.5, %v1442_v53 }
 0x705   : > { %v1457_v60 = vmul.f32 %v1455_v54, %v1447_v50  ;;  %v1454_v61 = vmul.f32 %v1452_v58, %v1442_v53  ;;  %v1808_v54 = vld [vmem:[#allocation2 + $0x498] sm:$0xff]  ;;  %v1807_v58 = vld [vmem:[#allocation2 + $0x490] sm:$0xff] }
 0x707   : > { %v1459_v62 = vadd.f32 %v1457_v60, %v1447_v50  ;;  %v1456_v63 = vmul.f32 %v1454_v61, %v1442_v53  ;;  %v1806_v60 = vld [vmem:[#allocation2 + $0x488] sm:$0xff]  ;;  %v1805_v61 = vld [vmem:[#allocation2 + $0x480] sm:$0xff] }
 0x709   : > { %v1461_v1 = vmul.f32 0.7978846, %v1459_v62  ;;  %v1458_v2 = vadd.f32 %v1456_v63, %v1442_v53  ;;  %v1804_v62 = vld [vmem:[#allocation2 + $0x478] sm:$0xff]  ;;  %v1803_v63 = vld [vmem:[#allocation2 + $0x470] sm:$0xff] }
 0x70b   : > { %4425 = vtanh.f32 %v1461_v1  ;;  %v1460_v5 = vmul.f32 0.7978846, %v1458_v2  ;;  %v1802_v1 = vld [vmem:[#allocation2 + $0x468] sm:$0xff]  ;;  %v1699_v2 = vld [vmem:[#allocation2 + $0x458] sm:$0xff] }
 0x70c   : > { %4145 = vmatprep.subr.mxu0 %v1699_v2 }
 0x70d   : > { %4427 = vtanh.f32 %v1460_v5  ;;  %v1698_v5 = vld [vmem:[#allocation2 + $0x450] sm:$0xff] }
 0x718   : > { %v4426_v6 = vpop.eup %4425 }
 0x719   : > { %v1465_v8 = vadd.f32 1.0, %v4426_v6  ;;  %v1697_v6 = vld [vmem:[#allocation2 + $0x448] sm:$0xff] }
 0x71a   : > { %v4428_v7 = vpop.eup %4427 }
 0x71b   : > { %v1464_v12 = vadd.f32 1.0, %v4428_v7  ;;  %v4740_v19 = vmul.f32 %v1465_v8, %v1451_v13  ;;  %v1696_v7 = vld [vmem:[#allocation2 + $0x440] sm:$0xff]  ;;  %v1695_v8 = vld [vmem:[#allocation2 + $0x438] sm:$0xff] }
 0x71c   : > { %v1692_v13 = vld [vmem:[#allocation2 + $0x420] sm:$0xff] }
 0x71d   : > { %v1466_v15 = vmul.f32 %v1464_v12, %v1450_v9  ;;  %v1694_v9 = vld [vmem:[#allocation2 + $0x430] sm:$0xff]  ;;  %v1693_v12 = vld [vmem:[#allocation2 + $0x428] sm:$0xff] }
 0x71f   : > { %4123 = vmatprep.mubr.msk.f32.mxu0 %vm486_vm2, %v1466_v15 }
 0x720   : > { %4124 = vmatmul.mubr.msk.f32.vlgmr.msra.gmra.mxu0 %vm486_vm2, %v4740_v19 }
 0x721   : > { %4146 = vmatpush3.msra.mxu0 %v1699_v2 }
 0x722   : > { %4147 = vmatprep.subr.mxu0 %v1698_v5 }
 0x723   : > { %4148 = vmatpush3.msra.mxu0 %v1698_v5  ;;  %v2129_v5 = vld [vmem:[#allocation2 + $0x538] sm:$0xff] }
 0x724   : > { %4149 = vmatprep.subr.mxu0 %v1697_v6 }
 0x725   : > { %4150 = vmatpush3.msra.mxu0 %v1697_v6  ;;  %v2287_v6 = vld [vmem:[#allocation2 + $0x580] sm:$0xff] }
 0x726   : > { %4151 = vmatprep.subr.mxu0 %v1696_v7 }
 0x727   : > { %4152 = vmatpush3.msra.mxu0 %v1696_v7  ;;  %v2128_v7 = vld [vmem:[#allocation2 + $0x530] sm:$0xff] }
 0x728   : > { %4153 = vmatprep.subr.mxu0 %v1695_v8 }
 0x729   : > { %4154 = vmatpush3.msra.mxu0 %v1695_v8  ;;  %v2286_v8 = vld [vmem:[#allocation2 + $0x578] sm:$0xff] }
 0x72a   : > { %4155 = vmatprep.subr.mxu0 %v1694_v9 }
 0x72b   : > { %4156 = vmatpush3.msra.mxu0 %v1694_v9  ;;  %v2127_v9 = vld [vmem:[#allocation2 + $0x528] sm:$0xff] }
 0x72c   : > { %4157 = vmatprep.subr.mxu0 %v1693_v12 }
 0x72d   : > { %4158 = vmatpush3.msra.mxu0 %v1693_v12  ;;  %v2285_v12 = vld [vmem:[#allocation2 + $0x570] sm:$0xff] }
 0x72e   : > { %4159 = vmatprep.subr.mxu0 %v1692_v13 }
 0x72f   : > { %4160 = vmatpush3.msra.mxu0 %v1692_v13  ;;  %v2126_v13 = vld [vmem:[#allocation2 + $0x520] sm:$0xff] }
 0x730   : > { %4183 = vmatprep.subr.mxu0 %v4566_v59 }
 0x7e0   : > { %v4125_v31 = vpop.f32.mrf.mxu0 }
 0x7e1   : > { %v1559_v32 = vadd.f32 %v4125_v31, %v3559_v30 }
 0x7e2   : > { %v1553_v33 = vpop.f32.mrf.mxu0 }
 0x7e3   : > { %v1565_v34 = vmul.f32 0.044715, %v1559_v32  ;;  %v1554_v35 = vadd.f32 %v3559_v30, %v1553_v33  ;;  %v1563_v51 = vmul.f32 0.5, %v1559_v32 }
 0x7e5   : > { %v1567_v36 = vmul.f32 %v1565_v34, %v1559_v32  ;;  %v1564_v37 = vmul.f32 0.044715, %v1554_v35  ;;  %v1562_v49 = vmul.f32 0.5, %v1554_v35 }
 0x7e7   : > { %v1569_v38 = vmul.f32 %v1567_v36, %v1559_v32  ;;  %v1566_v39 = vmul.f32 %v1564_v37, %v1554_v35 }
 0x7e9   : > { %v1571_v40 = vadd.f32 %v1569_v38, %v1559_v32  ;;  %v1568_v41 = vmul.f32 %v1566_v39, %v1554_v35 }
 0x7eb   : > { %v1573_v42 = vmul.f32 0.7978846, %v1571_v40  ;;  %v1570_v43 = vadd.f32 %v1568_v41, %v1554_v35 }
 0x7ed   : > { %4429 = vtanh.f32 %v1573_v42  ;;  %v1572_v44 = vmul.f32 0.7978846, %v1570_v43  ;;  %v1818_v42 = vld [vmem:[#allocation2 + $0x4e8] sm:$0xff]  ;;  %v1817_v43 = vld [vmem:[#allocation2 + $0x4e0] sm:$0xff] }
 0x7ef   : > { %4431 = vtanh.f32 %v1572_v44  ;;  %v1816_v44 = vld [vmem:[#allocation2 + $0x4d8] sm:$0xff] }
 0x7fa   : > { %v4430_v46 = vpop.eup %4429 }
 0x7fb   : > { %v1577_v48 = vadd.f32 1.0, %v4430_v46  ;;  %v1815_v46 = vld [vmem:[#allocation2 + $0x4d0] sm:$0xff] }
 0x7fc   : > { %v4432_v47 = vpop.eup %4431 }
 0x7fd   : > { %v1576_v50 = vadd.f32 1.0, %v4432_v47  ;;  %v1579_v53 = vmul.f32 %v1577_v48, %v1563_v51  ;;  %v1814_v47 = vld [vmem:[#allocation2 + $0x4c8] sm:$0xff]  ;;  %v1813_v48 = vld [vmem:[#allocation2 + $0x4c0] sm:$0xff] }
 0x7fe   : > { %v3565_v51 = vld [vmem:[#allocation2 + $0x460] ss:$0 sm:$0xff] }
 0x7ff   : > { %v1578_v52 = vmul.f32 %v1576_v50, %v1562_v49  ;;  %v1812_v49 = vld [vmem:[#allocation2 + $0x4b8] sm:$0xff]  ;;  %v1811_v50 = vld [vmem:[#allocation2 + $0x4b0] sm:$0xff] }
 0x801   : > { %4142 = vmatprep.mubr.msk.f32.mxu1 %vm486_vm2, %v1578_v52 }
 0x802   : > { %4143 = vmatmul.mubr.msk.f32.vlgmr.msra.gmra.mxu1 %vm486_vm2, %v1579_v53 }
 0x803   : > { %4165 = vmatpush3.msra.mxu1 %v1809_v29  ;;  %4180 = vmatprep.mubr.msk.f32.mxu1 %vm486_vm2, %v1466_v15  ;;  %v3562_v15 = vld [vmem:[#allocation2 + $0x418] ss:$0 sm:$0xff] }
 0x804   : > { %4166 = vmatprep.subr.mxu1 %v1808_v54 }
 0x805   : > { %4167 = vmatpush3.msra.mxu1 %v1808_v54 }
 0x806   : > { %4168 = vmatprep.subr.mxu1 %v1807_v58 }
 0x807   : > { %4169 = vmatpush3.msra.mxu1 %v1807_v58  ;;  %v2046_v58 = vsub.s32 3, %v4637_v10 }
 0x808   : > { %4170 = vmatprep.subr.mxu1 %v1806_v60 }
 0x809   : > { %4171 = vmatpush3.msra.mxu1 %v1806_v60  ;;  %v4771_v60 = vld [vmem:[#allocation2 + $0x5b8] sm:$0xf] }
 0x80a   : > { %4172 = vmatprep.subr.mxu1 %v1805_v61 }
 0x80b   : > { %4173 = vmatpush3.msra.mxu1 %v1805_v61  ;;  %v4780_v61 = vrot.slane %v4771_v60, %v2046_v58 }
 0x80c   : > { %4174 = vmatprep.subr.mxu1 %v1804_v62 }
 0x80d   : > { %4175 = vmatpush3.msra.mxu1 %v1804_v62  ;;  %v245_v62 = vld [vmem:[%s4627_s29 + $0x10] sm:$0xff] }
 0x80e   : > { %4176 = vmatprep.subr.mxu1 %v1803_v63 }
 0x80f   : > { %4177 = vmatpush3.msra.mxu1 %v1803_v63 }
 0x810   : > { %4178 = vmatprep.subr.mxu1 %v1802_v1 }
 0x811   : > { %4179 = vmatpush3.msra.mxu1 %v1802_v1  ;;  %v246_v1 = vld [vmem:[%s4627_s29 + $0x18] sm:$0xff] }
 0x812   : > { %4181 = vmatmul.mubr.msk.f32.vlgmr.msra.gmra.mxu1 %vm486_vm2, %v4740_v19  ;;  %4202 = vmatprep.subr.mxu1 %v2129_v5 }
 0x813   : > { %4203 = vmatpush3.msra.mxu1 %v2129_v5 }
 0x814   : > { %4204 = vmatprep.subr.mxu1 %v2128_v7 }
 0x815   : > { %4205 = vmatpush3.msra.mxu1 %v2128_v7 }
 0x816   : > { %4206 = vmatprep.subr.mxu1 %v2127_v9 }
 0x817   : > { %4207 = vmatpush3.msra.mxu1 %v2127_v9 }
 0x818   : > { %4208 = vmatprep.subr.mxu1 %v2126_v13 }
 0x819   : > { %4209 = vmatpush3.msra.mxu1 %v2126_v13 }
 0x8c2   : > { %v4144_v19 = vpop.f32.mrf.mxu1 }
 0x8c3   : > { %v1671_v20 = vadd.f32 %v4144_v19, %v3562_v15  ;;  %v2125_v19 = vld [vmem:[#allocation2 + $0x518] sm:$0xff] }
 0x8c4   : > { %v1665_v21 = vpop.f32.mrf.mxu1  ;;  %4210 = vmatprep.subr.mxu1 %v2125_v19 }
 0x8c5   : > { %v1677_v22 = vmul.f32 0.044715, %v1671_v20  ;;  %v1666_v24 = vadd.f32 %v3562_v15, %v1665_v21  ;;  %v1675_v39 = vmul.f32 0.5, %v1671_v20  ;;  %v2284_v15 = vld [vmem:[#allocation2 + $0x568] sm:$0xff]  ;;  %4211 = vmatpush3.msra.mxu1 %v2125_v19  ;;  %v2124_v21 = vld [vmem:[#allocation2 + $0x510] sm:$0xff] }
 0x8c6   : > { %4212 = vmatprep.subr.mxu1 %v2124_v21 }
 0x8c7   : > { %v1679_v25 = vmul.f32 %v1677_v22, %v1671_v20  ;;  %v1676_v26 = vmul.f32 0.044715, %v1666_v24  ;;  %v1674_v37 = vmul.f32 0.5, %v1666_v24  ;;  %v2282_v22 = vld [vmem:[#allocation2 + $0x558] sm:$0xff]  ;;  %4213 = vmatpush3.msra.mxu1 %v2124_v21 }
 0x8c9   : > { %v1681_v27 = vmul.f32 %v1679_v25, %v1671_v20  ;;  %v1678_v28 = vmul.f32 %v1676_v26, %v1666_v24  ;;  %v2281_v25 = vld [vmem:[#allocation2 + $0x550] sm:$0xff]  ;;  %v2122_v26 = vld [vmem:[#allocation2 + $0x500] sm:$0xff] }
 0x8cb   : > { %v1683_v29 = vadd.f32 %v1681_v27, %v1671_v20  ;;  %v1680_v30 = vmul.f32 %v1678_v28, %v1666_v24  ;;  %v2283_v20 = vld [vmem:[#allocation2 + $0x560] sm:$0xff]  ;;  %v2280_v27 = vld [vmem:[#allocation2 + $0x548] sm:$0xff]  ;;  %v1819_v28 = vld [vmem:[#allocation2 + $0x4f0] sm:$0x7] }
 0x8cd   : > { %v1685_v31 = vmul.f32 0.7978846, %v1683_v29  ;;  %v1682_v32 = vadd.f32 %v1680_v30, %v1666_v24  ;;  %v2123_v24 = vld [vmem:[#allocation2 + $0x508] sm:$0xff]  ;;  %v1848_v29 = vrot.slane %v1819_v28, %v4640_v11  ;;  %v1834_v30 = vrot.slane %v1819_v28, %v4643_v14 }
 0x8ce   : > { %4214 = vmatprep.subr.mxu1 %v2123_v24 }
 0x8cf   : > { %4433 = vtanh.f32 %v1685_v31  ;;  %v1684_v33 = vmul.f32 0.7978846, %v1682_v32  ;;  %4215 = vmatpush3.msra.mxu1 %v2123_v24 }
 0x8d0   : > { %4216 = vmatprep.subr.mxu1 %v2122_v26 }
 0x8d1   : > { %4435 = vtanh.f32 %v1684_v33  ;;  %4217 = vmatpush3.msra.mxu1 %v2122_v26 }
 0x8d2   : > { %4258 = vmatprep.subr.mxu1 %v4566_v59 }
 0x8dc   : > { %v4434_v34 = vpop.eup %4433 }
 0x8dd   : > { %v1689_v36 = vadd.f32 1.0, %v4434_v34 }
 0x8de   : > { %v4436_v35 = vpop.eup %4435 }
 0x8df   : > { %v1688_v38 = vadd.f32 1.0, %v4436_v35  ;;  %v1691_v41 = vmul.f32 %v1689_v36, %v1675_v39  ;;  %v1864_v35 = vrot.slane %v1819_v28, %v4649_v17 }
 0x8e1   : > { %v1690_v40 = vmul.f32 %v1688_v38, %v1674_v37 }
 0x8e3   : > { %4161 = vmatprep.mubr.msk.f32.mxu0 %vm486_vm2, %v1690_v40 }
 0x8e4   : > { %4162 = vmatmul.mubr.msk.f32.vlgmr.msra.gmra.mxu0 %vm486_vm2, %v1691_v41  ;;  %v4182_v41 = vpop.f32.mrf.mxu1 }
 0x8e5   : > { %4184 = vmatpush3.msra.mxu0 %v1818_v42  ;;  %4199 = vmatprep.mubr.msk.f32.mxu0 %vm4567_vm1, %v4566_v59  ;;  %v1820_v42 = vld [vmem:[#allocation2 + $0x4f8] sm:$0xf] }
 0x8e6   : > { %4185 = vmatprep.subr.mxu0 %v4566_v59 }
 0x8e7   : > { %4186 = vmatpush3.msra.mxu0 %v1817_v43 }
 0x8e8   : > { %4187 = vmatprep.subr.mxu0 %v4566_v59 }
 0x8e9   : > { %4188 = vmatpush3.msra.mxu0 %v1816_v44 }
 0x8ea   : > { %4189 = vmatprep.subr.mxu0 %v4566_v59 }
 0x8eb   : > { %4190 = vmatpush3.msra.mxu0 %v1815_v46 }
 0x8ec   : > { %4191 = vmatprep.subr.mxu0 %v4566_v59 }
 0x8ed   : > { %4192 = vmatpush3.msra.mxu0 %v1814_v47  ;;  %v3571_v47 = vld [vmem:[#allocation2 + $0x4a8] ss:$0 sm:$0xff] }
 0x8ee   : > { %4193 = vmatprep.subr.mxu0 %v4566_v59 }
 0x8ef   : > { %4194 = vmatpush3.msra.mxu0 %v1813_v48  ;;  %v2029_v48 = vrot.slane %v1820_v42, %v4643_v14 }
 0x8f0   : > { %4195 = vmatprep.subr.mxu0 %v4566_v59 }
 0x8f1   : > { %4196 = vmatpush3.msra.mxu0 %v1812_v49  ;;  %v2035_v49 = vrot.slane %v1820_v42, %v4640_v11 }
 0x8f2   : > { %4197 = vmatprep.subr.mxu0 %v4566_v59 }
 0x8f3   : > { %4198 = vmatpush3.msra.mxu0 %v1811_v50 }
 0x8f4   : > { %4200 = vmatmul.mubr.msk.f32.vlgmr.msra.gmra.mxu0 %vm486_vm2, %v4688_v45  ;;  %4230 = vmatprep.subr.mxu0 %v2287_v6 }
 0x8f5   : > { %4231 = vmatpush3.msra.mxu0 %v2287_v6 }
 0x8f6   : > { %4232 = vmatprep.subr.mxu0 %v2286_v8 }
 0x8f7   : > { %4233 = vmatpush3.msra.mxu0 %v2286_v8 }
 0x8f8   : > { %4234 = vmatprep.subr.mxu0 %v2285_v12 }
 0x8f9   : > { %4235 = vmatpush3.msra.mxu0 %v2285_v12 }
 0x8fa   : > { %4236 = vmatprep.subr.mxu0 %v2284_v15 }
 0x8fb   : > { %4237 = vmatpush3.msra.mxu0 %v2284_v15  ;;  %v1935_v15 = vpop.f32.mrf.mxu1 }
 0x8fc   : > { %4238 = vmatprep.subr.mxu0 %v2283_v20 }
 0x8fd   : > { %4239 = vmatpush3.msra.mxu0 %v2283_v20 }
 0x8fe   : > { %4240 = vmatprep.subr.mxu0 %v2282_v22 }
 0x8ff   : > { %4241 = vmatpush3.msra.mxu0 %v2282_v22 }
 0x900   : > { %4242 = vmatprep.subr.mxu0 %v2281_v25 }
 0x901   : > { %4243 = vmatpush3.msra.mxu0 %v2281_v25 }
 0x902   : > { %4244 = vmatprep.subr.mxu0 %v2280_v27 }
 0x903   : > { %4245 = vmatpush3.msra.mxu0 %v2280_v27 }
 0x9a4   : > { %v4163_v52 = vpop.f32.mrf.mxu0 }
 0x9a5   : > { %v4765_v53 = vadd.f32 %v4163_v52, %v3565_v51 }
 0x9a6   : > { %v1777_v54 = vpop.f32.mrf.mxu0 }
 0x9a7   : > { %v4773_v45 = vadd.f32 %v3565_v51, %v1777_v54  ;;  %1842 = vperm.xlu1 %4366, %v4765_v53   ;;  %1828 = vperm.xlu0 %4365, %v4765_v53   ;;  %1788 = vst.msk [vmem:[%s229_s8 + $0x8] sm:$0xff] %vm1786_vm4, %v4765_v53  ;;  %v2041_v54 = vrot.slane %v1820_v42, %v4649_v17 }
 0x9a9   : > { %1787 = vst.msk [vmem:[%s229_s8] sm:$0xff] %vm1786_vm4, %v4773_v45 }
 0x9ab   : > { %4367 = vset.pattern.permute.xlu1 %v4563_v0  ;;  %4370 = vset.pattern.permute.xlu0 %v4565_v4 }
 0x9ac   : > { %1858 = vperm.xlu0 %4370, %v4765_v53   ;;  %1823 = vperm.xlu1 %4367, %v4773_v45  }
 0x9b0   : > { %4368 = vset.pattern.permute.xlu1 %v4564_v3  ;;  %4372 = vset.pattern.permute.xlu0 %v4564_v3 }
 0x9b1   : > { %1838 = vperm.xlu1 %4368, %v4773_v45   ;;  %286 = vperm.xlu0 %4372, %v245_v62  }
 0x9b4   : > { %v4794_v63 = vpop.f32.mrf.mxu0 }
 0x9b5   : > { %4369 = vset.pattern.permute.xlu1 %v4565_v4  ;;  %4375 = vset.pattern.permute.xlu0 %v4565_v4  ;;  %v2017_v43 = vrot.slane %v4794_v63, %v4643_v14  ;;  %v2047_v63 = vrot.slane %v1820_v42, %v2046_v58 }
 0x9b6   : > { %v4201_v2 = vpop.f32.mrf.mxu0  ;;  %1854 = vperm.xlu1 %4369, %v4773_v45   ;;  %318 = vperm.xlu0 %4375, %v246_v1  }
 0x9ba   : > { %4371 = vset.pattern.permute.xlu1 %v4563_v0  ;;  %4376 = vset.pattern.permute.xlu0 %v4563_v0 }
 0x9bb   : > { %261 = vperm.xlu1 %4371, %v245_v62  }
 0x9bf   : > { %266 = vperm.xlu1 %4371, %v246_v1  }
 0x9c3   : > { %4373 = vset.pattern.permute.xlu1 %v4564_v3 }
 0x9c4   : > { %290 = vperm.xlu1 %4373, %v246_v1  }
 0x9c8   : > { %4374 = vset.pattern.permute.xlu1 %v4565_v4 }
 0x9c9   : > { %314 = vperm.xlu1 %4374, %v245_v62  }
 0x9cd   : > { %4377 = vset.pattern.permute.xlu1 %v4564_v3 }
 0xa22   : > { %v1843_v31 = vpop.permute.xlu1 %1842  ;;  %v1829_v32 = vpop.permute.xlu0 %1828 }
 0xa23   : > { %v1850_v33 = vmul.f32 %v1848_v29, %v1843_v31  ;;  %v1836_v34 = vmul.f32 %v1834_v30, %v1829_v32 }
 0xa25   : > { %v1852_v38 = vadd.f32 %v1850_v33, %v1836_v34 }
 0xa27   : > { %v1859_v36 = vpop.permute.xlu0 %1858  ;;  %v1824_v37 = vpop.permute.xlu1 %1823 }
 0xa28   : > { %v1866_v39 = vmul.f32 %v1864_v35, %v1859_v36  ;;  %v1835_v62 = vmul.f32 %v1834_v30, %v1824_v37 }
 0xa2a   : > { %v1868_v40 = vadd.f32 %v1866_v39, %v1852_v38 }
 0xa2c   : > { %v1941_v44 = vadd.f32 %v4182_v41, %v1868_v40  ;;  %v1839_v46 = vpop.permute.xlu1 %1838  ;;  %v287_v24 = vpop.permute.xlu0 %286 }
 0xa2d   : > { %v1849_v51 = vmul.f32 %v1848_v29, %v1839_v46  ;;  %v299_v38 = vmul.f32 %v4646_v16, %v287_v24 }
 0xa2e   : > { %v2019_v50 = vadd.f32 %v2017_v43, %v1941_v44 }
 0xa2f   : > { %v1851_v6 = vadd.f32 %v1849_v51, %v1835_v62 }
 0xa30   : > { %v2025_v52 = vadd.f32 %v3571_v47, %v2019_v50 }
 0xa31   : > { %v1855_v1 = vpop.permute.xlu1 %1854  ;;  %v319_v34 = vpop.permute.xlu0 %318 }
 0xa32   : > { %v4814_v2 = vadd.f32 %v2029_v48, %v2025_v52  ;;  %v4816_v5 = vadd.f32 %v2035_v49, %v2025_v52  ;;  %v1865_v7 = vmul.f32 %v1864_v35, %v1855_v1  ;;  %v4822_v12 = vadd.f32 %v2041_v54, %v2025_v52 }
 0xa33   : > { %v4825_v21 = vadd.f32 %v2047_v63, %v2025_v52 }
 0xa34   : > { %v2059_v8 = vmul.f32 0.044715, %v4814_v2  ;;  %v2061_v9 = vmul.f32 0.044715, %v4816_v5  ;;  %v1867_v13 = vadd.f32 %v1865_v7, %v1851_v6  ;;  %v2063_v25 = vmul.f32 0.044715, %v4822_v12 }
 0xa35   : > { %v2065_v29 = vmul.f32 0.044715, %v4825_v21 }
 0xa36   : > { %v262_v19 = vpop.permute.xlu1 %261  ;;  %v2067_v20 = vmul.f32 %v2059_v8, %v4814_v2  ;;  %v1936_v22 = vadd.f32 %v1935_v15, %v1867_v13  ;;  %v2069_v10 = vmul.f32 %v2061_v9, %v4816_v5  ;;  %v2071_v35 = vmul.f32 %v2063_v25, %v4822_v12 }
 0xa37   : > { %v275_v40 = vmul.f32 %v4652_v18, %v262_v19  ;;  %v2073_v44 = vmul.f32 %v2065_v29, %v4825_v21 }
 0xa38   : > { %v2018_v58 = vadd.f32 %v2017_v43, %v1936_v22  ;;  %v2075_v27 = vmul.f32 %v2067_v20, %v4814_v2  ;;  %v2077_v30 = vmul.f32 %v2069_v10, %v4816_v5 }
 0xa39   : > { %v2081_v7 = vmul.f32 %v2073_v44, %v4825_v21 }
 0xa3a   : > { %v267_v26 = vpop.permute.xlu1 %266  ;;  %v2024_v28 = vadd.f32 %v3571_v47, %v2018_v58  ;;  %v2083_v39 = vadd.f32 %v2075_v27, %v4814_v2  ;;  %v328_v47 = vmul.f32 %v4657_v23, %v319_v34  ;;  %v4521_v58 = vld [vmem:[#allocation2 + $0x3] ss:$0 sm:$0xff] }
 0xa3b   : > { %v276_v37 = vmul.f32 %v4652_v18, %v267_v26  ;;  %v2079_v18 = vmul.f32 %v2071_v35, %v4822_v12 }
 0xa3c   : > { %v4832_v31 = vadd.f32 %v2029_v48, %v2024_v28  ;;  %v4834_v32 = vadd.f32 %v2035_v49, %v2024_v28  ;;  %v4836_v33 = vadd.f32 %v2041_v54, %v2024_v28  ;;  %v4839_v36 = vadd.f32 %v2047_v63, %v2024_v28 }
 0xa3d   : > { %v2085_v48 = vadd.f32 %v2077_v30, %v4816_v5  ;;  %v2091_v54 = vmul.f32 0.7978846, %v2083_v39  ;;  %v303_v63 = vadd.f32 %v299_v38, %v275_v40  ;;  %v2087_v10 = vadd.f32 %v2079_v18, %v4822_v12 }
 0xa3e   : > { %v2058_v42 = vmul.f32 0.044715, %v4832_v31  ;;  %v2060_v43 = vmul.f32 0.044715, %v4834_v32  ;;  %v2062_v49 = vmul.f32 0.044715, %v4836_v33  ;;  %v2089_v38 = vadd.f32 %v2081_v7, %v4825_v21 }
 0xa3f   : > { %v291_v41 = vpop.permute.xlu1 %290  ;;  %v2064_v1 = vmul.f32 0.044715, %v4839_v36  ;;  %v2093_v13 = vmul.f32 0.7978846, %v2085_v48  ;;  %4437 = vtanh.f32 %v2091_v54  ;;  %v2095_v40 = vmul.f32 0.7978846, %v2087_v10 }
 0xa40   : > { %v300_v46 = vmul.f32 %v4646_v16, %v291_v41  ;;  %v2066_v50 = vmul.f32 %v2058_v42, %v4832_v31  ;;  %v2068_v51 = vmul.f32 %v2060_v43, %v4834_v32  ;;  %v2070_v62 = vmul.f32 %v2062_v49, %v4836_v33  ;;  %v2292_v10 = vld [vmem:[#allocation2 + $0x5a8] sm:$0xff] }
 0xa41   : > { %v2072_v19 = vmul.f32 %v2064_v1, %v4839_v36  ;;  %4439 = vtanh.f32 %v2093_v13  ;;  %v2051_v7 = vmul.f32 0.5, %v4814_v2  ;;  %v2052_v13 = vmul.f32 0.5, %v4834_v32 }
 0xa42   : > { %v304_v52 = vadd.f32 %v300_v46, %v276_v37  ;;  %v2074_v16 = vmul.f32 %v2066_v50, %v4832_v31  ;;  %v2076_v6 = vmul.f32 %v2068_v51, %v4834_v32  ;;  %v2078_v15 = vmul.f32 %v2070_v62, %v4836_v33 }
 0xa43   : > { %v2080_v27 = vmul.f32 %v2072_v19, %v4839_v36  ;;  %v2097_v46 = vmul.f32 0.7978846, %v2089_v38  ;;  %v2053_v2 = vmul.f32 0.5, %v4816_v5  ;;  %v2055_v5 = vmul.f32 0.5, %v4822_v12 }
 0xa44   : > { %v332_v8 = vadd.f32 %v328_v47, %v304_v52  ;;  %v315_v9 = vpop.permute.xlu1 %314  ;;  %v2082_v22 = vadd.f32 %v2074_v16, %v4832_v31  ;;  %v2084_v24 = vadd.f32 %v2076_v6, %v4834_v32  ;;  %v2086_v26 = vadd.f32 %v2078_v15, %v4836_v33 }
 0xa45   : > { %v327_v20 = vmul.f32 %v4657_v23, %v315_v9  ;;  %v2088_v23 = vadd.f32 %v2080_v27, %v4839_v36  ;;  %v2057_v12 = vmul.f32 0.5, %v4825_v21 }
 0xa46   : > { %v340_v25 = vadd.f32 %v4521_v58, %v332_v8  ;;  %v2090_v29 = vmul.f32 0.7978846, %v2082_v22  ;;  %v2092_v30 = vmul.f32 0.7978846, %v2084_v24  ;;  %v2094_v35 = vmul.f32 0.7978846, %v2086_v26 }
 0xa47   : > { %v331_v28 = vadd.f32 %v327_v20, %v303_v63  ;;  %v2096_v42 = vmul.f32 0.7978846, %v2088_v23  ;;  %v2050_v63 = vmul.f32 0.5, %v4832_v31  ;;  %v2054_v31 = vmul.f32 0.5, %v4836_v33 }
 0xa48   : > { %v348_v34 = vmul.f32 0.044715, %v340_v25  ;;  %4441 = vtanh.f32 %v2090_v29  ;;  %v344_v26 = vmul.f32 0.5, %v340_v25  ;;  %v2056_v33 = vmul.f32 0.5, %v4839_v36 }
 0xa49   : > { %v339_v37 = vadd.f32 %v4521_v58, %v331_v28  ;;  %4443 = vtanh.f32 %v2092_v30 }
 0xa4a   : > { %v352_v39 = vmul.f32 %v348_v34, %v340_v25  ;;  %4445 = vtanh.f32 %v2094_v35  ;;  %v2291_v35 = vld [vmem:[#allocation2 + $0x5a0] sm:$0xff] }
 0xa4b   : > { %v347_v41 = vmul.f32 0.044715, %v339_v37  ;;  %4447 = vtanh.f32 %v2095_v40  ;;  %v343_v38 = vmul.f32 0.5, %v339_v37 }
 0xa4c   : > { %v356_v43 = vmul.f32 %v352_v39, %v340_v25  ;;  %4449 = vtanh.f32 %v2096_v42  ;;  %v4438_v51 = vpop.eup %4437 }
 0xa4d   : > { %v351_v44 = vmul.f32 %v347_v41, %v339_v37  ;;  %4451 = vtanh.f32 %v2097_v46  ;;  %v2107_v62 = vadd.f32 1.0, %v4438_v51 }
 0xa4e   : > { %v360_v47 = vadd.f32 %v356_v43, %v340_v25  ;;  %v4440_v52 = vpop.eup %4439 }
 0xa4f   : > { %v355_v48 = vmul.f32 %v351_v44, %v339_v37  ;;  %v2115_v15 = vmul.f32 %v2107_v62, %v2051_v7  ;;  %v2109_v19 = vadd.f32 1.0, %v4440_v52  ;;  %v2290_v44 = vld [vmem:[#allocation2 + $0x598] sm:$0xff] }
 0xa50   : > { %v364_v49 = vmul.f32 0.7978846, %v360_v47  ;;  %v2289_v47 = vld [vmem:[#allocation2 + $0x590] sm:$0xff] }
 0xa51   : > { %v359_v50 = vadd.f32 %v355_v48, %v339_v37  ;;  %v2117_v27 = vmul.f32 %v2109_v19, %v2053_v2 }
 0xa52   : > { %4453 = vtanh.f32 %v364_v49 }
 0xa53   : > { %v363_v18 = vmul.f32 0.7978846, %v359_v50 }
 0xa55   : > { %4455 = vtanh.f32 %v363_v18  ;;  %v4442_v54 = vpop.eup %4441 }
 0xa56   : > { %v4444_v1 = vpop.eup %4443  ;;  %v2106_v16 = vadd.f32 1.0, %v4442_v54 }
 0xa57   : > { %v4446_v6 = vpop.eup %4445  ;;  %v2108_v8 = vadd.f32 1.0, %v4444_v1  ;;  %v3572_v1 = vld [vmem:[#allocation2 + $0x540] ss:$0 sm:$0xff] }
 0xa58   : > { %v2114_v9 = vmul.f32 %v2106_v16, %v2050_v63  ;;  %v4448_v20 = vpop.eup %4447  ;;  %v2110_v24 = vadd.f32 1.0, %v4446_v6 }
 0xa59   : > { %v2116_v22 = vmul.f32 %v2108_v8, %v2052_v13  ;;  %v4450_v58 = vpop.eup %4449  ;;  %v2111_v28 = vadd.f32 1.0, %v4448_v20 }
 0xa5a   : > { %4218 = vmatprep.mubr.msk.f32.mxu1 %vm486_vm2, %v2114_v9  ;;  %4246 = vmatprep.mubr.msk.f32.mxu0 %vm486_vm2, %v2114_v9  ;;  %v4452_v32 = vpop.eup %4451  ;;  %v2118_v30 = vmul.f32 %v2110_v24, %v2054_v31  ;;  %v2112_v34 = vadd.f32 1.0, %v4450_v58 }
 0xa5b   : > { %4219 = vmatmul.mubr.msk.f32.vlgmr.msra.gmra.mxu1 %vm486_vm2, %v2115_v15  ;;  %4247 = vmatmul.mubr.msk.f32.vlgmr.msra.gmra.mxu0 %vm486_vm2, %v2115_v15  ;;  %v2119_v40 = vmul.f32 %v2111_v28, %v2055_v5  ;;  %v2113_v41 = vadd.f32 1.0, %v4452_v32 }
 0xa5c   : > { %4221 = vmatprep.mubr.msk.f32.mxu1 %vm486_vm2, %v2116_v22  ;;  %4249 = vmatprep.mubr.msk.f32.mxu0 %vm486_vm2, %v2116_v22  ;;  %v2120_v43 = vmul.f32 %v2112_v34, %v2056_v33  ;;  %v2990_v34 = vld [vmem:[#allocation2 + $0x5c8] sm:$0xff] }
 0xa5d   : > { %4259 = vmatpush3.msra.mxu1 %v2292_v10  ;;  %v2121_v36 = vmul.f32 %v2113_v41, %v2057_v12 }
 0xa5e   : > { %4260 = vmatprep.subr.mxu1 %v4566_v59 }
 0xa5f   : > { %v4454_v29 = vpop.eup %4453  ;;  %4222 = vmatmul.mubr.msk.f32.gmra.mxu1 %vm486_vm2, %v2117_v27  ;;  %4250 = vmatmul.mubr.msk.f32.gmra.mxu0 %vm486_vm2, %v2117_v27 }
 0xa60   : > { %v372_v23 = vadd.f32 1.0, %v4454_v29  ;;  %4224 = vmatprep.mubr.msk.f32.mxu1 %vm486_vm2, %v2118_v30  ;;  %4252 = vmatprep.mubr.msk.f32.mxu0 %vm486_vm2, %v2118_v30  ;;  %v2992_v29 = vld [vmem:[#allocation2 + $0x5d8] sm:$0xff]  ;;  %v2991_v30 = vld [vmem:[#allocation2 + $0x5d0] sm:$0xff] }
 0xa61   : > { %4261 = vmatpush3.msra.mxu1 %v2291_v35  ;;  %4269 = vmatprep.subr.mxu0 %v2992_v29 }
 0xa62   : > { %v4456_v25 = vpop.eup %4455  ;;  %v376_v39 = vmul.f32 %v372_v23, %v344_v26  ;;  %4262 = vmatprep.subr.mxu1 %v4566_v59  ;;  %4270 = vmatpush3.msra.mxu0 %v2992_v29 }
 0xa63   : > { %v371_v42 = vadd.f32 1.0, %v4456_v25  ;;  %4225 = vmatmul.mubr.msk.f32.gmra.mxu1 %vm486_vm2, %v2119_v40  ;;  %4253 = vmatmul.mubr.msk.f32.gmra.mxu0 %vm486_vm2, %v2119_v40 }
 0xa64   : > { %v1792_v37 = vsel %vm386_vm0, %v376_v39, -inf  ;;  %4227 = vmatprep.mubr.msk.f32.mxu1 %vm486_vm2, %v2120_v43  ;;  %4255 = vmatprep.mubr.msk.f32.mxu0 %vm486_vm2, %v2120_v43 }
 0xa65   : > { %v375_v46 = vmul.f32 %v371_v42, %v343_v38  ;;  %4263 = vmatpush3.msra.mxu1 %v2290_v44  ;;  %4271 = vmatprep.subr.mxu0 %v2991_v30  ;;  %v2293_v38 = vld [vmem:[#allocation2 + $0x5b0] sm:$0x7] }
 0xa66   : > { %4264 = vmatprep.subr.mxu1 %v4566_v59  ;;  %4272 = vmatpush3.msra.mxu0 %v2991_v30  ;;  %v5001_v25 = vrot.slane %v2293_v38, %v4640_v11 }
 0xa67   : > { %v1791_v48 = vsel %vm386_vm0, %v375_v46, -inf  ;;  %4228 = vmatmul.mubr.msk.f32.gmra.mxu1 %vm486_vm2, %v2121_v36  ;;  %4256 = vmatmul.mubr.msk.f32.gmra.mxu0 %vm486_vm2, %v2121_v36 }
 0xa68   : > { %v1794_v49 = vmax.f32 %v1791_v48, %v1792_v37  ;;  %4265 = vmatpush3.msra.mxu1 %v2289_v47  ;;  %4266 = vmatprep.mubr.msk.f32.mxu1 %vm4567_vm1, %v4566_v59 }
 0xa69   : > { %4325 = vmatprep.subr.mxu1 %v2992_v29  ;;  %4273 = vmatprep.subr.mxu0 %v2990_v34 }
 0xa6a   : > { %v1795_v21 = vmax.f32 %v1793_v57, %v1794_v49  ;;  %4274 = vmatpush3.msra.mxu0 %v2990_v34 }
 0xa6c   : > { %v1796_v50 = vrot.slane %v1795_v21, 4 }
 0xa6e   : > { %v1797_v51 = vmax.f32 %v1795_v21, %v1796_v50  ;;  %v5020_v50 = vld [vmem:[#allocation2 + $0x588] ss:$0 sm:$0xff] }
 0xa70   : > { %v1798_v18 = vrot.slane %v1797_v51, 2 }
 0xa72   : > { %v1799_v52 = vmax.f32 %v1797_v51, %v1798_v18  ;;  %v5026_v18 = vrot.slane %v4771_v60, %v4643_v14 }
 0xa74   : > { %v1800_v54 = vrot.slane %v1799_v52, 1 }
 0xa76   : > { %v1801_v62 = vmax.f32 %v1799_v52, %v1800_v54  ;;  %v5030_v52 = vrot.slane %v4771_v60, %v4649_v17 }
 0xa78   : > { %4267 = vmatmul.mubr.msk.f32.vlgmr.msra.gmra.mxu1 %vm386_vm0, %v1801_v62 }
 0xa79   : > { %4329 = vmatpush3.msra.mxu1 %v2992_v29 }
 0xa7a   : > { %4326 = vmatprep.subr.mxu1 %v2991_v30 }
 0xa7b   : > { %4330 = vmatpush3.msra.mxu1 %v2991_v30 }
 0xa7c   : > { %4327 = vmatprep.subr.mxu1 %v2990_v34 }
 0xa7d   : > { %4331 = vmatpush3.msra.mxu1 %v2990_v34 }
 0xb1b   : > { %v4220_v63 = vpop.f32.mrf.mxu1  ;;  %v4248_v43 = vpop.f32.mrf.mxu0 }
 0xb1c   : > { %v2231_v16 = vadd.f32 %v4220_v63, %v3572_v1 }
 0xb1d   : > { %v2225_v55 = vpop.f32.mrf.mxu1  ;;  %v2517_v47 = vpop.f32.mrf.mxu0 }
 0xb1e   : > { %v4912_v56 = vadd.f32 %v2231_v16, %v4765_v53  ;;  %v2226_v57 = vadd.f32 %v3572_v1, %v2225_v55 }
 0xb1f   : > { %v4223_v59 = vpop.f32.mrf.mxu1  ;;  %v4251_v34 = vpop.f32.mrf.mxu0 }
 0xb20   : > { %2273 = vst.msk [vmem:[%s4909_s13 + $0x8] sm:$0xff] %vm1786_vm4, %v4912_v56  ;;  %v4918_v6 = vadd.f32 %v2226_v57, %v4773_v45  ;;  %v2241_v7 = vadd.f32 %v4223_v59, %v3572_v1  ;;  %2352 = vperm.xlu1 %4377, %v4912_v56   ;;  %2302 = vperm.xlu0 %4376, %v4912_v56  }
 0xb21   : > { %v2235_v8 = vpop.f32.mrf.mxu1 }
 0xb22   : > { %2272 = vst.msk [vmem:[%s4909_s13] sm:$0xff] %vm1786_vm4, %v4918_v6  ;;  %v4926_v9 = vadd.f32 %v2241_v7, %v4765_v53  ;;  %v2236_v13 = vadd.f32 %v3572_v1, %v2235_v8 }
 0xb23   : > { %v4226_v15 = vpop.f32.mrf.mxu1 }
 0xb24   : > { %2275 = vst.msk [vmem:[%s4909_s13 + $0x18] sm:$0xff] %vm1786_vm4, %v4926_v9  ;;  %v4932_v19 = vadd.f32 %v2236_v13, %v4773_v45  ;;  %v2251_v20 = vadd.f32 %v4226_v15, %v3572_v1  ;;  %4378 = vset.pattern.permute.xlu1 %v4563_v0  ;;  %2312 = vperm.xlu0 %4376, %v4926_v9  }
 0xb25   : > { %v2245_v22 = vpop.f32.mrf.mxu1  ;;  %2297 = vperm.xlu1 %4378, %v4918_v6  }
 0xb26   : > { %2274 = vst.msk [vmem:[%s4909_s13 + $0x10] sm:$0xff] %vm1786_vm4, %v4932_v19  ;;  %v4941_v24 = vadd.f32 %v2251_v20, %v4765_v53  ;;  %v2246_v10 = vadd.f32 %v3572_v1, %v2245_v22 }
 0xb27   : > { %v4229_v58 = vpop.f32.mrf.mxu1 }
 0xb28   : > { %2277 = vst.msk [vmem:[%s4909_s13 + $0x28] sm:$0xff] %vm1786_vm4, %v4941_v24  ;;  %v4947_v2 = vadd.f32 %v2246_v10, %v4773_v45  ;;  %v2261_v31 = vadd.f32 %v4229_v58, %v3572_v1 }
 0xb29   : > { %v2255_v32 = vpop.f32.mrf.mxu1  ;;  %4379 = vset.pattern.permute.xlu1 %v4564_v3 }
 0xb2a   : > { %2276 = vst.msk [vmem:[%s4909_s13 + $0x20] sm:$0xff] %vm1786_vm4, %v4947_v2  ;;  %v4954_v26 = vadd.f32 %v2261_v31, %v4765_v53  ;;  %v2256_v27 = vadd.f32 %v3572_v1, %v2255_v32  ;;  %2348 = vperm.xlu1 %4379, %v4918_v6  }
 0xb2c   : > { %2279 = vst.msk [vmem:[%s4909_s13 + $0x38] sm:$0xff] %vm1786_vm4, %v4954_v26  ;;  %v4961_v28 = vadd.f32 %v2256_v27, %v4773_v45  ;;  %2332 = vperm.xlu0 %4376, %v4954_v26  }
 0xb2e   : > { %2278 = vst.msk [vmem:[%s4909_s13 + $0x30] sm:$0xff] %vm1786_vm4, %v4961_v28  ;;  %4380 = vset.pattern.permute.xlu1 %v4565_v4 }
 0xb2f   : > { %2400 = vperm.xlu1 %4380, %v4918_v6  }
 0xb30   : > { %2322 = vperm.xlu0 %4376, %v4941_v24  }
 0xb33   : > { %4381 = vset.pattern.permute.xlu1 %v4564_v3 }
 0xb34   : > { %4391 = vset.pattern.permute.xlu0 %v4565_v4  ;;  %2360 = vperm.xlu1 %4381, %v4926_v9  }
 0xb35   : > { %2428 = vperm.xlu0 %4391, %v4954_v26  }
 0xb38   : > { %v4974_v53 = vpop.f32.mrf.mxu1  ;;  %4382 = vset.pattern.permute.xlu1 %v4563_v0 }
 0xb39   : > { %2404 = vperm.xlu0 %4391, %v4912_v56   ;;  %2307 = vperm.xlu1 %4382, %v4932_v19   ;;  %v5018_v48 = vrot.slane %v4974_v53, %v4643_v14 }
 0xb3a   : > { %v4268_v45 = vpop.f32.mrf.mxu1 }
 0xb3d   : > { %2412 = vperm.xlu0 %4391, %v4926_v9   ;;  %4383 = vset.pattern.permute.xlu1 %v4564_v3 }
 0xb3e   : > { %2356 = vperm.xlu1 %4383, %v4932_v19  }
 0xb41   : > { %2420 = vperm.xlu0 %4391, %v4941_v24  }
 0xb42   : > { %4384 = vset.pattern.permute.xlu1 %v4565_v4 }
 0xb43   : > { %2408 = vperm.xlu1 %4384, %v4932_v19  }
 0xb47   : > { %4385 = vset.pattern.permute.xlu1 %v4563_v0 }
 0xb48   : > { %2317 = vperm.xlu1 %4385, %v4947_v2  }
 0xb4c   : > { %4386 = vset.pattern.permute.xlu1 %v4564_v3 }
 0xb4d   : > { %2376 = vperm.xlu1 %4386, %v4954_v26  }
 0xb51   : > { %4387 = vset.pattern.permute.xlu1 %v4563_v0  ;;  %v2989_v0 = vld [vmem:[#allocation2 + $0x5c0] sm:$0xff] }
 0xb52   : > { %2327 = vperm.xlu1 %4387, %v4961_v28   ;;  %4275 = vmatprep.subr.mxu0 %v2989_v0 }
 0xb53   : > { %4276 = vmatpush3.msra.mxu0 %v2989_v0  ;;  %4328 = vmatprep.subr.mxu1 %v2989_v0 }
 0xb54   : > { %4332 = vmatpush3.msra.mxu1 %v2989_v0 }
 0xb56   : > { %4388 = vset.pattern.permute.xlu1 %v4564_v3 }
 0xb57   : > { %2372 = vperm.xlu1 %4388, %v4961_v28  }
 0xb5b   : > { %4389 = vset.pattern.permute.xlu1 %v4565_v4 }
 0xb5c   : > { %2424 = vperm.xlu1 %4389, %v4961_v28  }
 0xb60   : > { %4390 = vset.pattern.permute.xlu1 %v4564_v3  ;;  %v5004_v3 = vrot.slane %v2293_v38, %v4643_v14 }
 0xb61   : > { %2364 = vperm.xlu1 %4390, %v4947_v2  }
 0xb65   : > { %2368 = vperm.xlu1 %4390, %v4941_v24  }
 0xb69   : > { %4392 = vset.pattern.permute.xlu1 %v4565_v4  ;;  %v5010_v4 = vrot.slane %v2293_v38, %v4649_v17 }
 0xb6a   : > { %2416 = vperm.xlu1 %4392, %v4947_v2  }
 0xb9b   : > { %v2353_v35 = vpop.permute.xlu1 %2352  ;;  %v2303_v23 = vpop.permute.xlu0 %2302 }
 0xb9c   : > { %v2340_v62 = vmul.f32 %v5004_v3, %v2303_v23  ;;  %v2384_v1 = vmul.f32 %v5001_v25, %v2353_v35 }
 0xb9e   : > { %v2392_v7 = vadd.f32 %v2384_v1, %v2340_v62 }
 0xb9f   : > { %v2313_v33 = vpop.permute.xlu0 %2312 }
 0xba0   : > { %v2298_v5 = vpop.permute.xlu1 %2297  ;;  %v2342_v13 = vmul.f32 %v5004_v3, %v2313_v33  ;;  %v5060_v33 = vrot.slane %v4771_v60, %v4640_v11 }
 0xba1   : > { %v2339_v42 = vmul.f32 %v5004_v3, %v2298_v5 }
 0xba5   : > { %v2349_v39 = vpop.permute.xlu1 %2348 }
 0xba6   : > { %v2383_v40 = vmul.f32 %v5001_v25, %v2349_v39 }
 0xba7   : > { %v5007_v41 = vpop.permute.xlu0 %2332 }
 0xba8   : > { %v2391_v12 = vadd.f32 %v2383_v40, %v2339_v42 }
 0xbaa   : > { %v2401_v44 = vpop.permute.xlu1 %2400 }
 0xbab   : > { %v2435_v37 = vmul.f32 %v5010_v4, %v2401_v44  ;;  %v5014_v46 = vpop.permute.xlu0 %2322 }
 0xbad   : > { %v2443_v36 = vadd.f32 %v2435_v37, %v2391_v12 }
 0xbaf   : > { %v2518_v49 = vadd.f32 %v2517_v47, %v2443_v36  ;;  %v2361_v21 = vpop.permute.xlu1 %2360 }
 0xbb0   : > { %v5022_v51 = vpop.permute.xlu0 %2428  ;;  %v2386_v17 = vmul.f32 %v5001_v25, %v2361_v21 }
 0xbb1   : > { %v2633_v54 = vadd.f32 %v5018_v48, %v2518_v49  ;;  %v2527_v49 = vpop.f32.mrf.mxu0 }
 0xbb2   : > { %v2394_v58 = vadd.f32 %v2386_v17, %v2342_v13 }
 0xbb3   : > { %v2645_v63 = vadd.f32 %v5020_v50, %v2633_v54 }
 0xbb4   : > { %v2405_v16 = vpop.permute.xlu0 %2404  ;;  %v2308_v55 = vpop.permute.xlu1 %2307 }
 0xbb5   : > { %v5037_v57 = vadd.f32 %v5026_v18, %v2645_v63  ;;  %v5040_v14 = vadd.f32 %v5030_v52, %v2645_v63  ;;  %v5043_v59 = vadd.f32 %v4780_v61, %v2645_v63  ;;  %v2436_v8 = vmul.f32 %v5010_v4, %v2405_v16 }
 0xbb6   : > { %v2341_v23 = vmul.f32 %v5004_v3, %v2308_v55  ;;  %v2669_v21 = vadd.f32 %v5060_v33, %v2645_v63  ;;  %v5094_v63 = vpop.f32.mrf.mxu0 }
 0xbb7   : > { %v2733_v15 = vmul.f32 0.044715, %v5037_v57  ;;  %v2444_v20 = vadd.f32 %v2436_v8, %v2392_v7  ;;  %v2749_v10 = vmul.f32 0.044715, %v5040_v14 }
 0xbb8   : > { %v2413_v22 = vpop.permute.xlu0 %2412 }
 0xbb9   : > { %v2438_v31 = vmul.f32 %v5010_v4, %v2413_v22  ;;  %v2357_v32 = vpop.permute.xlu1 %2356  ;;  %v2765_v27 = vmul.f32 %v2733_v15, %v5037_v57  ;;  %v2523_v53 = vadd.f32 %v4248_v43, %v2444_v20  ;;  %v2781_v35 = vmul.f32 %v2749_v10, %v5040_v14 }
 0xbba   : > { %v2385_v29 = vmul.f32 %v5001_v25, %v2357_v32  ;;  %v2741_v22 = vmul.f32 0.044715, %v2669_v21 }
 0xbbb   : > { %v2446_v45 = vadd.f32 %v2438_v31, %v2394_v58  ;;  %v2797_v30 = vmul.f32 %v2765_v27, %v5037_v57  ;;  %v2634_v0 = vadd.f32 %v5018_v48, %v2523_v53  ;;  %v2813_v11 = vmul.f32 %v2781_v35, %v5040_v14 }
 0xbbc   : > { %v2393_v43 = vadd.f32 %v2385_v29, %v2341_v23 }
 0xbbd   : > { %v2533_v5 = vadd.f32 %v4251_v34, %v2446_v45  ;;  %v2829_v38 = vadd.f32 %v2797_v30, %v5037_v57  ;;  %v5063_v39 = vadd.f32 %v5020_v50, %v2634_v0  ;;  %v2845_v7 = vadd.f32 %v2813_v11, %v5040_v14  ;;  %v5116_v0 = vpop.f32.mrf.mxu0 }
 0xbbe   : > { %v2409_v40 = vpop.permute.xlu1 %2408  ;;  %v2346_v45 = vmul.f32 %v5004_v3, %v5007_v41  ;;  %v2757_v34 = vmul.f32 0.044715, %v5043_v59  ;;  %v2442_v41 = vmul.f32 %v5010_v4, %v5022_v51 }
 0xbbf   : > { %v2636_v42 = vadd.f32 %v5018_v48, %v2533_v5  ;;  %v2437_v44 = vmul.f32 %v5010_v4, %v2409_v40  ;;  %v2861_v12 = vmul.f32 0.7978846, %v2829_v38  ;;  %v5069_v37 = vadd.f32 %v5026_v18, %v5063_v39 }
 0xbc0   : > { %v5073_v36 = vadd.f32 %v4780_v61, %v5063_v39  ;;  %v5098_v13 = vadd.f32 %v5030_v52, %v5063_v39  ;;  %v2877_v53 = vmul.f32 0.7978846, %v2845_v7  ;;  %v2773_v38 = vmul.f32 %v2741_v22, %v2669_v21 }
 0xbc1   : > { %v5077_v60 = vadd.f32 %v5020_v50, %v2636_v42  ;;  %v2445_v47 = vadd.f32 %v2437_v44, %v2393_v43  ;;  %4457 = vtanh.f32 %v2861_v12  ;;  %v2734_v54 = vmul.f32 0.044715, %v5069_v37 }
 0xbc2   : > { %v2750_v5 = vmul.f32 0.044715, %v5098_v13  ;;  %4459 = vtanh.f32 %v2877_v53  ;;  %v2805_v7 = vmul.f32 %v2773_v38, %v2669_v21 }
 0xbc3   : > { %v5083_v62 = vadd.f32 %v5026_v18, %v5077_v60  ;;  %v5087_v1 = vadd.f32 %v4780_v61, %v5077_v60  ;;  %v5089_v16 = vpop.permute.xlu1 %2317  ;;  %v2528_v55 = vadd.f32 %v2527_v49, %v2445_v47  ;;  %v2766_v17 = vmul.f32 %v2734_v54, %v5069_v37 }
 0xbc4   : > { %v5105_v58 = vadd.f32 %v5030_v52, %v5077_v60  ;;  %v2701_v49 = vmul.f32 0.5, %v5037_v57  ;;  %v2782_v51 = vmul.f32 %v2750_v5, %v5098_v13 }
 0xbc5   : > { %v2736_v8 = vmul.f32 0.044715, %v5083_v62  ;;  %v2635_v15 = vadd.f32 %v5018_v48, %v2528_v55  ;;  %v2798_v20 = vmul.f32 %v2766_v17, %v5069_v37  ;;  %v4257_v55 = vpop.f32.mrf.mxu0 }
 0xbc6   : > { %v2752_v12 = vmul.f32 0.044715, %v5105_v58  ;;  %v2814_v38 = vmul.f32 %v2782_v51, %v5098_v13 }
 0xbc7   : > { %v2768_v10 = vmul.f32 %v2736_v8, %v5083_v62  ;;  %v5108_v31 = vadd.f32 %v5020_v50, %v2635_v15  ;;  %v2830_v27 = vadd.f32 %v2798_v20, %v5069_v37  ;;  %v2789_v8 = vmul.f32 %v2757_v34, %v5043_v59 }
 0xbc8   : > { %v2377_v32 = vpop.permute.xlu1 %2376  ;;  %v2784_v57 = vmul.f32 %v2752_v12, %v5105_v58 }
 0xbc9   : > { %v2390_v29 = vmul.f32 %v5001_v25, %v2377_v32  ;;  %v2800_v30 = vmul.f32 %v2768_v10, %v5083_v62  ;;  %v5120_v35 = vadd.f32 %v5026_v18, %v5108_v31  ;;  %v5124_v23 = vadd.f32 %v4780_v61, %v5108_v31 }
 0xbca   : > { %v2862_v42 = vmul.f32 0.7978846, %v2830_v27  ;;  %v5138_v15 = vadd.f32 %v5030_v52, %v5108_v31  ;;  %v5144_v27 = vmul.f32 %v5004_v3, %v5014_v46 }
 0xbcb   : > { %v2398_v40 = vadd.f32 %v2390_v29, %v2346_v45  ;;  %v2832_v43 = vadd.f32 %v2800_v30, %v5083_v62  ;;  %v2735_v44 = vmul.f32 0.044715, %v5120_v35  ;;  %v5148_v29 = vmul.f32 0.5, %v5040_v14  ;;  %v2421_v30 = vpop.permute.xlu0 %2420 }
 0xbcc   : > { %4461 = vtanh.f32 %v2862_v42  ;;  %v2751_v46 = vmul.f32 0.044715, %v5138_v15  ;;  %v5160_v14 = vadd.f32 %v5060_v33, %v5063_v39 }
 0xbcd   : > { %v2450_v11 = vadd.f32 %v2442_v41, %v2398_v40  ;;  %v2328_v47 = vpop.permute.xlu1 %2327  ;;  %v2767_v17 = vmul.f32 %v2735_v44, %v5120_v35  ;;  %v2864_v10 = vmul.f32 0.7978846, %v2832_v43  ;;  %v5152_v41 = vmul.f32 0.5, %v2669_v21 }
 0xbce   : > { %v4458_v54 = vpop.eup %4457  ;;  %v2837_v40 = vadd.f32 %v2805_v7, %v2669_v21  ;;  %v2821_v43 = vmul.f32 %v2789_v8, %v5043_v59  ;;  %v5165_v21 = vmul.f32 %v5010_v4, %v2421_v30  ;;  %v2345_v39 = vmul.f32 %v5004_v3, %v2328_v47 }
 0xbcf   : > { %v2553_v20 = vadd.f32 %v4257_v55, %v2450_v11  ;;  %v2925_v22 = vadd.f32 1.0, %v4458_v54  ;;  %v2799_v32 = vmul.f32 %v2767_v17, %v5120_v35  ;;  %4463 = vtanh.f32 %v2864_v10 }
 0xbd0   : > { %v2816_v11 = vmul.f32 %v2784_v57, %v5105_v58  ;;  %v2846_v17 = vadd.f32 %v2814_v38, %v5098_v13  ;;  %v2869_v51 = vmul.f32 0.7978846, %v2837_v40  ;;  %v2702_v8 = vmul.f32 0.5, %v5069_v37 }
 0xbd1   : > { %v2640_v53 = vadd.f32 %v5018_v48, %v2553_v20  ;;  %v2957_v45 = vmul.f32 %v2925_v22, %v2701_v49  ;;  %v2831_v5 = vadd.f32 %v2799_v32, %v5120_v35  ;;  %v2783_v22 = vmul.f32 %v2751_v46, %v5138_v15 }
 0xbd2   : > { %v2373_v34 = vpop.permute.xlu1 %2372  ;;  %v2853_v10 = vadd.f32 %v2821_v43, %v5043_v59  ;;  %v2742_v47 = vmul.f32 0.044715, %v5160_v14  ;;  %v5187_v30 = vadd.f32 %v5060_v33, %v5077_v60  ;;  %v2343_v37 = vmul.f32 %v5004_v3, %v5089_v16 }
 0xbd3   : > { %v2652_v42 = vadd.f32 %v5020_v50, %v2640_v53  ;;  %4277 = vmatprep.mubr.msk.f32.mxu0 %vm386_vm0, %v2957_v45  ;;  %v2389_v44 = vmul.f32 %v5001_v25, %v2373_v34  ;;  %v2863_v12 = vmul.f32 0.7978846, %v2831_v5  ;;  %v2848_v53 = vadd.f32 %v2816_v11, %v5105_v58  ;;  %v4460_v45 = vpop.eup %4459 }
 0xbd4   : > { %v5193_v5 = vmul.f32 0.5, %v5098_v13  ;;  %v2704_v46 = vmul.f32 0.5, %v5083_v62  ;;  %v2878_v43 = vmul.f32 0.7978846, %v2846_v17  ;;  %v2815_v3 = vmul.f32 %v2783_v22, %v5138_v15 }
 0xbd5   : > { %v5168_v49 = vadd.f32 %v5026_v18, %v2652_v42  ;;  %v5171_v54 = vadd.f32 %v5060_v33, %v2652_v42  ;;  %v5174_v55 = vadd.f32 %v4780_v61, %v2652_v42  ;;  %4465 = vtanh.f32 %v2863_v12  ;;  %v2547_v12 = vpop.f32.mrf.mxu0 }
 0xbd6   : > { %v2397_v32 = vadd.f32 %v2389_v44, %v2345_v39  ;;  %v5197_v44 = vmul.f32 0.5, %v5105_v58  ;;  %v5200_v60 = vadd.f32 %v5030_v52, %v2652_v42  ;;  %v2885_v16 = vmul.f32 0.7978846, %v2853_v10 }
 0xbd7   : > { %v2425_v7 = vpop.permute.xlu1 %2424  ;;  %v2748_v20 = vmul.f32 0.044715, %v5171_v54  ;;  %v2880_v13 = vmul.f32 0.7978846, %v2848_v53  ;;  %v2941_v58 = vadd.f32 1.0, %v4460_v45  ;;  %4467 = vtanh.f32 %v2869_v51 }
 0xbd8   : > { %v2441_v57 = vmul.f32 %v5010_v4, %v2425_v7  ;;  %v5208_v42 = vadd.f32 %v5060_v33, %v5108_v31  ;;  %v2703_v22 = vmul.f32 0.5, %v5120_v35  ;;  %4469 = vtanh.f32 %v2878_v43 }
 0xbd9   : > { %v2780_v34 = vmul.f32 %v2748_v20, %v5171_v54  ;;  %v4462_v38 = vpop.eup %4461  ;;  %v2740_v20 = vmul.f32 0.044715, %v5168_v49  ;;  %v5214_v10 = vmul.f32 0.5, %v5138_v15  ;;  %v2756_v53 = vmul.f32 0.044715, %v5200_v60 }
 0xbda   : > { %v2449_v40 = vadd.f32 %v2441_v57, %v2397_v32  ;;  %v2926_v11 = vadd.f32 1.0, %v4462_v38  ;;  %v2774_v32 = vmul.f32 %v2742_v47, %v5160_v14  ;;  %4471 = vtanh.f32 %v2885_v16 }
 0xbdb   : > { %v2812_v17 = vmul.f32 %v2780_v34, %v5171_v54  ;;  %4473 = vtanh.f32 %v2880_v13  ;;  %v2772_v45 = vmul.f32 %v2740_v20, %v5168_v49 }
 0xbdc   : > { %v2548_v39 = vadd.f32 %v2547_v12, %v2449_v40  ;;  %v2365_v7 = vpop.permute.xlu1 %2364  ;;  %v2958_v62 = vmul.f32 %v2926_v11, %v2702_v8  ;;  %v2847_v8 = vadd.f32 %v2815_v3, %v5138_v15  ;;  %v4464_v51 = vpop.eup %4463  ;;  %v2806_v35 = vmul.f32 %v2774_v32, %v5160_v14 }
 0xbdd   : > { %v2387_v34 = vmul.f32 %v5001_v25, %v2365_v7  ;;  %v2844_v40 = vadd.f32 %v2812_v17, %v5171_v54  ;;  %v5225_v15 = vmul.f32 %v2941_v58, %v5148_v29  ;;  %v2788_v29 = vmul.f32 %v2756_v53, %v5200_v60 }
 0xbde   : > { %v2639_v57 = vadd.f32 %v5018_v48, %v2548_v39  ;;  %4278 = vmatmul.mubr.msk.f32.vlgmr.msra.gmra.mxu0 %vm386_vm0, %v2958_v62  ;;  %v2928_v39 = vadd.f32 1.0, %v4464_v51  ;;  %v2879_v7 = vmul.f32 0.7978846, %v2847_v8  ;;  %v2804_v32 = vmul.f32 %v2772_v45, %v5168_v49 }
 0xbdf   : > { %v2838_v62 = vadd.f32 %v2806_v35, %v5160_v14  ;;  %v2395_v17 = vadd.f32 %v2387_v34, %v2343_v37  ;;  %v2820_v37 = vmul.f32 %v2788_v29, %v5200_v60 }
 0xbe0   : > { %v2651_v47 = vadd.f32 %v5020_v50, %v2639_v57  ;;  %v2369_v31 = vpop.permute.xlu1 %2368 }
 0xbe1   : > { %v2388_v38 = vmul.f32 %v5001_v25, %v2369_v31  ;;  %v2870_v34 = vmul.f32 0.7978846, %v2838_v62 }
 0xbe2   : > { %v5228_v43 = vadd.f32 %v5026_v18, %v2651_v47  ;;  %v5231_v12 = vadd.f32 %v5060_v33, %v2651_v47  ;;  %v5234_v11 = vadd.f32 %v5030_v52, %v2651_v47  ;;  %v5237_v3 = vadd.f32 %v4780_v61, %v2651_v47  ;;  %v4466_v16 = vpop.eup %4465 }
 0xbe3   : > { %v2396_v25 = vadd.f32 %v2388_v38, %v5144_v27  ;;  %v2927_v13 = vadd.f32 1.0, %v4466_v16  ;;  %v2876_v47 = vmul.f32 0.7978846, %v2844_v40  ;;  %v2960_v16 = vmul.f32 %v2928_v39, %v2704_v46 }
 0xbe4   : > { %v2747_v20 = vmul.f32 0.044715, %v5231_v12  ;;  %v2739_v31 = vmul.f32 0.044715, %v5228_v43  ;;  %v2755_v53 = vmul.f32 0.044715, %v5234_v11  ;;  %v5261_v46 = vpop.eup %4467 }
 0xbe5   : > { %v2448_v58 = vadd.f32 %v5165_v21, %v2396_v25  ;;  %v2417_v57 = vpop.permute.xlu1 %2416  ;;  %v2959_v51 = vmul.f32 %v2927_v13, %v2703_v22  ;;  %v5258_v40 = vmul.f32 0.5, %v5171_v54  ;;  %4475 = vtanh.f32 %v2876_v47  ;;  %v4470_v13 = vpop.eup %4469 }
 0xbe6   : > { %v2439_v27 = vmul.f32 %v5010_v4, %v2417_v57  ;;  %v2779_v8 = vmul.f32 %v2747_v20, %v5231_v12  ;;  %v2771_v45 = vmul.f32 %v2739_v31, %v5228_v43  ;;  %v2758_v4 = vmul.f32 0.044715, %v5073_v36 }
 0xbe7   : > { %v2543_v38 = vadd.f32 %v5094_v63, %v2448_v58  ;;  %4280 = vmatprep.mubr.msk.f32.mxu0 %vm386_vm0, %v2959_v51  ;;  %v2743_v63 = vmul.f32 0.044715, %v5208_v42  ;;  %4477 = vtanh.f32 %v2879_v7  ;;  %v2787_v29 = vmul.f32 %v2755_v53, %v5234_v11  ;;  %v5272_v58 = vpop.eup %4471 }
 0xbe8   : > { %v2447_v35 = vadd.f32 %v2439_v27, %v2395_v17  ;;  %v2811_v21 = vmul.f32 %v2779_v8, %v5231_v12  ;;  %4281 = vmatmul.mubr.msk.f32.gmra.mxu0 %vm386_vm0, %v2960_v16  ;;  %v2803_v62 = vmul.f32 %v2771_v45, %v5228_v43  ;;  %v2836_v54 = vadd.f32 %v2804_v32, %v5168_v49  ;;  %v4474_v47 = vpop.eup %4473 }
 0xbe9   : > { %v2638_v22 = vadd.f32 %v5018_v48, %v2543_v38  ;;  %v2852_v17 = vadd.f32 %v2820_v37, %v5200_v60  ;;  %4479 = vtanh.f32 %v2870_v34  ;;  %v2790_v7 = vmul.f32 %v2758_v4, %v5073_v36 }
 0xbea   : > { %v2538_v25 = vadd.f32 %v5116_v0, %v2447_v35  ;;  %v2843_v39 = vadd.f32 %v2811_v21, %v5231_v12  ;;  %v2775_v51 = vmul.f32 %v2743_v63, %v5208_v42  ;;  %v5290_v8 = vadd.f32 1.0, %v4470_v13 }
 0xbeb   : > { %v5267_v20 = vadd.f32 %v5020_v50, %v2638_v22  ;;  %v2819_v53 = vmul.f32 %v2787_v29, %v5234_v11  ;;  %v2835_v16 = vadd.f32 %v2803_v62, %v5228_v43  ;;  %v2868_v45 = vmul.f32 0.7978846, %v2836_v54 }
 0xbec   : > { %v2637_v57 = vadd.f32 %v5018_v48, %v2538_v25  ;;  %v2875_v0 = vmul.f32 0.7978846, %v2843_v39  ;;  %v2884_v37 = vmul.f32 0.7978846, %v2852_v17  ;;  %v2822_v63 = vmul.f32 %v2790_v7, %v5073_v36 }
 0xbed   : > { %v5278_v31 = vadd.f32 %v5026_v18, %v5267_v20  ;;  %v5282_v27 = vadd.f32 %v5030_v52, %v5267_v20  ;;  %v5286_v32 = vadd.f32 %v4780_v61, %v5267_v20  ;;  %v2807_v25 = vmul.f32 %v2775_v51, %v5208_v42 }
 0xbee   : > { %v2649_v48 = vadd.f32 %v5020_v50, %v2637_v57  ;;  %4481 = vtanh.f32 %v2875_v0  ;;  %v5304_v50 = vadd.f32 1.0, %v4474_v47  ;;  %v2759_v29 = vmul.f32 0.044715, %v5124_v23 }
 0xbef   : > { %v2738_v38 = vmul.f32 0.044715, %v5278_v31  ;;  %v2754_v22 = vmul.f32 0.044715, %v5282_v27  ;;  %v2867_v62 = vmul.f32 0.7978846, %v2835_v16  ;;  %4483 = vtanh.f32 %v2868_v45 }
 0xbf0   : > { %v5296_v35 = vadd.f32 %v5026_v18, %v2649_v48  ;;  %v5299_v21 = vadd.f32 %v5030_v52, %v2649_v48  ;;  %v5302_v34 = vadd.f32 %v4780_v61, %v2649_v48  ;;  %v2851_v52 = vadd.f32 %v2819_v53, %v5234_v11 }
 0xbf1   : > { %v2770_v4 = vmul.f32 %v2738_v38, %v5278_v31  ;;  %v2786_v13 = vmul.f32 %v2754_v22, %v5282_v27  ;;  %v2715_v54 = vmul.f32 0.5, %v5231_v12  ;;  %4485 = vtanh.f32 %v2884_v37 }
 0xbf2   : > { %v2737_v39 = vmul.f32 0.044715, %v5296_v35  ;;  %v2753_v18 = vmul.f32 0.044715, %v5299_v21  ;;  %v2854_v47 = vadd.f32 %v2822_v63, %v5073_v36  ;;  %v2839_v51 = vadd.f32 %v2807_v25, %v5208_v42  ;;  %v4476_v53 = vpop.eup %4475 }
 0xbf3   : > { %v2802_v61 = vmul.f32 %v2770_v4, %v5278_v31  ;;  %v2818_v7 = vmul.f32 %v2786_v13, %v5282_v27  ;;  %v2883_v45 = vmul.f32 0.7978846, %v2851_v52  ;;  %v2791_v12 = vmul.f32 %v2759_v29, %v5124_v23 }
 0xbf4   : > { %v2769_v17 = vmul.f32 %v2737_v39, %v5296_v35  ;;  %v2785_v57 = vmul.f32 %v2753_v18, %v5299_v21  ;;  %v4478_v4 = vpop.eup %4477  ;;  %v5327_v22 = vadd.f32 %v5060_v33, %v2649_v48  ;;  %4487 = vtanh.f32 %v2867_v62 }
 0xbf5   : > { %v2834_v0 = vadd.f32 %v2802_v61, %v5278_v31  ;;  %v2850_v39 = vadd.f32 %v2818_v7, %v5282_v27  ;;  %v2823_v18 = vmul.f32 %v2791_v12, %v5124_v23  ;;  %v2744_v61 = vmul.f32 0.044715, %v5187_v30 }
 0xbf6   : > { %v2801_v38 = vmul.f32 %v2769_v17, %v5296_v35  ;;  %v2817_v16 = vmul.f32 %v2785_v57, %v5299_v21  ;;  %v5334_v13 = vpop.eup %4479  ;;  %v2940_v52 = vadd.f32 1.0, %v4476_v53  ;;  %v2760_v48 = vmul.f32 0.044715, %v5087_v1 }
 0xbf7   : > { %v2866_v37 = vmul.f32 0.7978846, %v2834_v0  ;;  %v2882_v29 = vmul.f32 0.7978846, %v2850_v39  ;;  %v2776_v62 = vmul.f32 %v2744_v61, %v5187_v30  ;;  %v2855_v7 = vadd.f32 %v2823_v18, %v5124_v23 }
 0xbf8   : > { %v2833_v63 = vadd.f32 %v2801_v38, %v5296_v35  ;;  %v2849_v25 = vadd.f32 %v2817_v16, %v5299_v21  ;;  %v2792_v38 = vmul.f32 %v2760_v48, %v5087_v1  ;;  %v2745_v16 = vmul.f32 0.044715, %v5327_v22 }
 0xbf9   : > { %4489 = vtanh.f32 %v2866_v37  ;;  %v5343_v53 = vadd.f32 %v5060_v33, %v5267_v20  ;;  %v2808_v37 = vmul.f32 %v2776_v62, %v5187_v30  ;;  %v2871_v18 = vmul.f32 0.7978846, %v2839_v51 }
 0xbfa   : > { %v2865_v17 = vmul.f32 0.7978846, %v2833_v63  ;;  %v2881_v57 = vmul.f32 0.7978846, %v2849_v25  ;;  %4491 = vtanh.f32 %v2883_v45  ;;  %v2886_v45 = vmul.f32 0.7978846, %v2854_v47 }
 0xbfb   : > { %v4482_v0 = vpop.eup %4481  ;;  %4493 = vtanh.f32 %v2882_v29  ;;  %v2824_v39 = vmul.f32 %v2792_v38, %v5087_v1  ;;  %v2777_v63 = vmul.f32 %v2745_v16, %v5327_v22  ;;  %v2840_v61 = vadd.f32 %v2808_v37, %v5187_v30 }
 0xbfc   : > { %v2939_v12 = vadd.f32 1.0, %v4482_v0  ;;  %4495 = vtanh.f32 %v2865_v17  ;;  %v2761_v29 = vmul.f32 0.044715, %v5302_v34  ;;  %v2972_v48 = vmul.f32 %v2940_v52, %v5258_v40  ;;  %v5353_v62 = vpop.eup %4483 }
 0xbfd   : > { %4497 = vtanh.f32 %v2881_v57  ;;  %v2887_v33 = vmul.f32 0.7978846, %v2855_v7  ;;  %v2856_v20 = vadd.f32 %v2824_v39, %v5087_v1  ;;  %v2809_v17 = vmul.f32 %v2777_v63, %v5327_v22 }
 0xbfe   : > { %v2971_v25 = vmul.f32 %v2939_v12, %v2715_v54  ;;  %v2943_v47 = vadd.f32 1.0, %v4478_v4  ;;  %v2872_v57 = vmul.f32 0.7978846, %v2840_v61  ;;  %v2793_v54 = vmul.f32 %v2761_v29, %v5302_v34  ;;  %v5358_v0 = vpop.eup %4485 }
 0xbff   : > { %v2746_v51 = vmul.f32 0.044715, %v5343_v53  ;;  %v5362_v40 = vadd.f32 1.0, %v5261_v46  ;;  %4499 = vtanh.f32 %v2886_v45  ;;  %v2888_v52 = vmul.f32 0.7978846, %v2856_v20 }
 0xc00   : > { %4298 = vmatprep.mubr.msk.f32.mxu1 %vm386_vm0, %v2971_v25  ;;  %v2841_v7 = vadd.f32 %v2809_v17, %v5327_v22  ;;  %v2974_v4 = vmul.f32 %v5290_v8, %v5193_v5  ;;  %4501 = vtanh.f32 %v2871_v18  ;;  %v2825_v38 = vmul.f32 %v2793_v54, %v5302_v34 }
 0xc01   : > { %4299 = vmatmul.mubr.msk.f32.vlgmr.msra.gmra.mxu1 %vm386_vm0, %v2972_v48  ;;  %v2778_v16 = vmul.f32 %v2746_v51, %v5343_v53  ;;  %v2976_v12 = vmul.f32 %v5304_v50, %v5197_v44  ;;  %4503 = vtanh.f32 %v2887_v33  ;;  %v2762_v37 = vmul.f32 0.044715, %v5286_v32  ;;  %v4488_v45 = vpop.eup %4487 }
 0xc02   : > { %4301 = vmatprep.mubr.msk.f32.mxu1 %vm386_vm0, %v5225_v15  ;;  %v2873_v46 = vmul.f32 0.7978846, %v2841_v7  ;;  %v2975_v39 = vmul.f32 %v2943_v47, %v5214_v10  ;;  %4505 = vtanh.f32 %v2872_v57  ;;  %v2857_v15 = vadd.f32 %v2825_v38, %v5302_v34 }
 0xc03   : > { %v2810_v5 = vmul.f32 %v2778_v16, %v5343_v53  ;;  %v2707_v8 = vmul.f32 0.5, %v5228_v43  ;;  %4507 = vtanh.f32 %v2888_v52  ;;  %v2794_v63 = vmul.f32 %v2762_v37, %v5286_v32 }
 0xc04   : > { %v2763_v44 = vmul.f32 0.044715, %v5237_v3  ;;  %v2723_v25 = vmul.f32 0.5, %v5234_v11  ;;  %4509 = vtanh.f32 %v2873_v46  ;;  %v2889_v10 = vmul.f32 0.7978846, %v2857_v15 }
 0xc05   : > { %4302 = vmatmul.mubr.msk.f32.gmra.mxu1 %vm386_vm0, %v2974_v4  ;;  %v2842_v18 = vadd.f32 %v2810_v5, %v5343_v53  ;;  %v2706_v29 = vmul.f32 0.5, %v5278_v31  ;;  %v2826_v48 = vmul.f32 %v2794_v63, %v5286_v32  ;;  %v2764_v33 = vmul.f32 0.044715, %v5174_v55 }
 0xc06   : > { %v4490_v50 = vpop.eup %4489  ;;  %4304 = vmatprep.mubr.msk.f32.mxu1 %vm386_vm0, %v2975_v39  ;;  %v2795_v43 = vmul.f32 %v2763_v44, %v5237_v3  ;;  %v2705_v17 = vmul.f32 0.5, %v5296_v35  ;;  %v2721_v47 = vmul.f32 0.5, %v5299_v21  ;;  %4511 = vtanh.f32 %v2889_v10 }
 0xc07   : > { %v4492_v61 = vpop.eup %4491  ;;  %v2874_v11 = vmul.f32 0.7978846, %v2842_v18  ;;  %v2930_v54 = vadd.f32 1.0, %v4490_v50  ;;  %v2931_v51 = vadd.f32 1.0, %v4488_v45  ;;  %v2858_v31 = vadd.f32 %v2826_v48, %v5286_v32 }
 0xc08   : > { %v4494_v20 = vpop.eup %4493  ;;  %v2827_v52 = vmul.f32 %v2795_v43, %v5237_v3  ;;  %v2796_v16 = vmul.f32 %v2764_v33, %v5174_v55  ;;  %v2947_v46 = vadd.f32 1.0, %v4492_v61  ;;  %v2932_v45 = vadd.f32 1.0, %v5353_v62 }
 0xc09   : > { %v4496_v57 = vpop.eup %4495  ;;  %4305 = vmatmul.mubr.msk.f32.gmra.mxu1 %vm386_vm0, %v2976_v12  ;;  %v2946_v38 = vadd.f32 1.0, %v4494_v20  ;;  %4513 = vtanh.f32 %v2874_v11  ;;  %v2890_v21 = vmul.f32 0.7978846, %v2858_v31  ;;  %v2722_v12 = vmul.f32 0.5, %v5282_v27 }
 0xc0a   : > { %v4498_v7 = vpop.eup %4497  ;;  %v2929_v4 = vadd.f32 1.0, %v4496_v57  ;;  %v2859_v37 = vadd.f32 %v2827_v52, %v5237_v3  ;;  %v2828_v15 = vmul.f32 %v2796_v16, %v5174_v55  ;;  %v2962_v63 = vmul.f32 %v2930_v54, %v2706_v29 }
 0xc0b   : > { %v2945_v35 = vadd.f32 1.0, %v4498_v7  ;;  %4515 = vtanh.f32 %v2890_v21  ;;  %v2978_v10 = vmul.f32 %v2946_v38, %v2722_v12  ;;  %v2963_v18 = vmul.f32 %v2931_v51, %v2707_v8 }
 0xc0c   : > { %v2961_v39 = vmul.f32 %v2929_v4, %v2705_v17  ;;  %v2891_v44 = vmul.f32 0.7978846, %v2859_v37  ;;  %v4500_v50 = vpop.eup %4499  ;;  %v2948_v61 = vadd.f32 1.0, %v5358_v0  ;;  %v2860_v48 = vadd.f32 %v2828_v15, %v5174_v55 }
 0xc0d   : > { %v2977_v5 = vmul.f32 %v2945_v35, %v2721_v47  ;;  %v4502_v43 = vpop.eup %4501  ;;  %v2979_v27 = vmul.f32 %v2947_v46, %v2723_v25  ;;  %v2708_v62 = vmul.f32 0.5, %v5168_v49  ;;  %v2949_v29 = vadd.f32 1.0, %v5272_v58 }
 0xc0e   : > { %4283 = vmatprep.mubr.msk.f32.mxu0 %vm386_vm0, %v2961_v39  ;;  %4517 = vtanh.f32 %v2891_v44  ;;  %v4504_v33 = vpop.eup %4503  ;;  %v2724_v0 = vmul.f32 0.5, %v5200_v60  ;;  %v2892_v8 = vmul.f32 0.7978846, %v2860_v48  ;;  %v2965_v25 = vmul.f32 %v5362_v40, %v5152_v41 }
 0xc0f   : > { %4307 = vmatprep.mubr.msk.f32.mxu1 %vm386_vm0, %v2977_v5  ;;  %4284 = vmatmul.mubr.msk.f32.gmra.mxu0 %vm386_vm0, %v2962_v63  ;;  %v4506_v20 = vpop.eup %4505  ;;  %v2964_v17 = vmul.f32 %v2932_v45, %v2708_v62  ;;  %v2725_v49 = vmul.f32 0.5, %v5043_v59  ;;  %v2934_v58 = vadd.f32 1.0, %v5334_v13  ;;  %v2950_v57 = vadd.f32 1.0, %v4500_v50 }
 0xc10   : > { %4308 = vmatmul.mubr.msk.f32.gmra.mxu1 %vm386_vm0, %v2978_v10  ;;  %4286 = vmatprep.mubr.msk.f32.mxu0 %vm386_vm0, %v2963_v18  ;;  %v4508_v47 = vpop.eup %4507  ;;  %v2980_v11 = vmul.f32 %v2948_v61, %v2724_v0  ;;  %v2935_v54 = vadd.f32 1.0, %v4502_v43  ;;  %4519 = vtanh.f32 %v2892_v8  ;;  %v2710_v31 = vmul.f32 0.5, %v5160_v14 }
 0xc11   : > { %4310 = vmatprep.mubr.msk.f32.mxu1 %vm386_vm0, %v2979_v27  ;;  %v4510_v51 = vpop.eup %4509  ;;  %v2981_v60 = vmul.f32 %v2949_v29, %v2725_v49  ;;  %v2951_v52 = vadd.f32 1.0, %v4504_v33  ;;  %v2726_v59 = vmul.f32 0.5, %v5073_v36  ;;  %v2711_v41 = vmul.f32 0.5, %v5208_v42 }
 0xc12   : > { %v2966_v40 = vmul.f32 %v2934_v58, %v2710_v31  ;;  %v2727_v7 = vmul.f32 0.5, %v5124_v23  ;;  %v2936_v4 = vadd.f32 1.0, %v4506_v20  ;;  %v2952_v35 = vadd.f32 1.0, %v4508_v47 }
 0xc13   : > { %4287 = vmatmul.mubr.msk.f32.gmra.mxu0 %vm386_vm0, %v2964_v17  ;;  %v4512_v13 = vpop.eup %4511  ;;  %v2982_v38 = vmul.f32 %v2950_v57, %v2726_v59  ;;  %v2967_v16 = vmul.f32 %v2935_v54, %v2711_v41  ;;  %v2937_v14 = vadd.f32 1.0, %v4510_v51  ;;  %v2712_v37 = vmul.f32 0.5, %v5187_v30 }
 0xc14   : > { %4311 = vmatmul.mubr.msk.f32.gmra.mxu1 %vm386_vm0, %v2980_v11  ;;  %4289 = vmatprep.mubr.msk.f32.mxu0 %vm386_vm0, %v2965_v25  ;;  %v2983_v21 = vmul.f32 %v2951_v52, %v2727_v7  ;;  %v2953_v36 = vadd.f32 1.0, %v4512_v13  ;;  %v2728_v42 = vmul.f32 0.5, %v5087_v1  ;;  %v2713_v23 = vmul.f32 0.5, %v5327_v22 }
 0xc15   : > { %4313 = vmatprep.mubr.msk.f32.mxu1 %vm386_vm0, %v2981_v60  ;;  %v2968_v39 = vmul.f32 %v2936_v4, %v2712_v37  ;;  %v2729_v12 = vmul.f32 0.5, %v5302_v34  ;;  %v2714_v44 = vmul.f32 0.5, %v5343_v53  ;;  %v2730_v1 = vmul.f32 0.5, %v5286_v32 }
 0xc16   : > { %v4514_v46 = vpop.eup %4513  ;;  %v2984_v5 = vmul.f32 %v2952_v35, %v2728_v42  ;;  %v2969_v63 = vmul.f32 %v2937_v14, %v2713_v23  ;;  %v2731_v22 = vmul.f32 0.5, %v5237_v3  ;;  %v2732_v43 = vmul.f32 0.5, %v5174_v55  ;;  %v5442_v3 = vld [vmem:[#allocation2 + $0x5e0] ss:$0 sm:$0xff] }
 0xc17   : > { %4290 = vmatmul.mubr.msk.f32.gmra.mxu0 %vm386_vm0, %v2966_v40  ;;  %v2938_v45 = vadd.f32 1.0, %v4514_v46  ;;  %v2985_v30 = vmul.f32 %v2953_v36, %v2729_v12 }
 0xc18   : > { %4314 = vmatmul.mubr.msk.f32.gmra.mxu1 %vm386_vm0, %v2982_v38  ;;  %4292 = vmatprep.mubr.msk.f32.mxu0 %vm386_vm0, %v2967_v16  ;;  %v4516_v15 = vpop.eup %4515 }
 0xc19   : > { %4316 = vmatprep.mubr.msk.f32.mxu1 %vm386_vm0, %v2983_v21  ;;  %v2954_v50 = vadd.f32 1.0, %v4516_v15  ;;  %v2970_v34 = vmul.f32 %v2938_v45, %v2714_v44 }
 0xc1b   : > { %4293 = vmatmul.mubr.msk.f32.gmra.mxu0 %vm386_vm0, %v2968_v39  ;;  %v4518_v10 = vpop.eup %4517  ;;  %v2986_v61 = vmul.f32 %v2954_v50, %v2730_v1 }
 0xc1c   : > { %4317 = vmatmul.mubr.msk.f32.gmra.mxu1 %vm386_vm0, %v2984_v5  ;;  %4295 = vmatprep.mubr.msk.f32.mxu0 %vm386_vm0, %v2969_v63  ;;  %v2955_v18 = vadd.f32 1.0, %v4518_v10 }
 0xc1d   : > { %4319 = vmatprep.mubr.msk.f32.mxu1 %vm386_vm0, %v2985_v30  ;;  %v4520_v48 = vpop.eup %4519 }
 0xc1e   : > { %v2987_v53 = vmul.f32 %v2955_v18, %v2731_v22  ;;  %v2956_v27 = vadd.f32 1.0, %v4520_v48 }
 0xc1f   : > { %4296 = vmatmul.mubr.msk.f32.gmra.mxu0 %vm386_vm0, %v2970_v34 }
 0xc20   : > { %4320 = vmatmul.mubr.msk.f32.gmra.mxu1 %vm386_vm0, %v2986_v61  ;;  %v2988_v62 = vmul.f32 %v2956_v27, %v2732_v43 }
 0xc21   : > { %4322 = vmatprep.mubr.msk.f32.mxu1 %vm386_vm0, %v2987_v53 }
 0xc24   : > { %4323 = vmatmul.mubr.msk.f32.gmra.mxu1 %vm386_vm0, %v2988_v62 }
 0xc9e   : > { %v4279_v32 = vpop.f32.mrf.mxu0 }
 0xc9f   : > { %v3166_v29 = vadd.f32 %v4279_v32, %v5442_v3 }
 0xca0   : > { %v3160_v55 = vpop.f32.mrf.mxu0 }
 0xca1   : > { %v3320_v33 = vadd.f32 %v3166_v29, %v4912_v56  ;;  %v3161_v0 = vadd.f32 %v5442_v3, %v3160_v55 }
 0xca3   : > { %3352 = vst.msk [vmem:[%s5448_s20 + $0x8] sm:$0xff] %vm1786_vm4, %v3320_v33  ;;  %v3319_v8 = vadd.f32 %v3161_v0, %v4918_v6 }
 0xca5   : > { %3351 = vst.msk [vmem:[%s5448_s20] sm:$0xff] %vm1786_vm4, %v3319_v8 }
 0xca8   : > { %v4282_v20 = vpop.f32.mrf.mxu0 }
 0xca9   : > { %v3176_v17 = vadd.f32 %v4282_v20, %v5442_v3 }
 0xcaa   : > { %v3170_v25 = vpop.f32.mrf.mxu0 }
 0xcab   : > { %v3322_v49 = vadd.f32 %v3176_v17, %v4926_v9  ;;  %v3171_v58 = vadd.f32 %v5442_v3, %v3170_v25 }
 0xcad   : > { %3354 = vst.msk [vmem:[%s5448_s20 + $0x18] sm:$0xff] %vm1786_vm4, %v3322_v49  ;;  %v3321_v47 = vadd.f32 %v3171_v58, %v4932_v19 }
 0xcaf   : > { %3353 = vst.msk [vmem:[%s5448_s20 + $0x10] sm:$0xff] %vm1786_vm4, %v3321_v47 }
 0xcc1   : > { %v4300_v11 = vpop.f32.mrf.mxu1 }
 0xcc2   : > { %v3236_v57 = vadd.f32 %v4300_v11, %v5442_v3 }
 0xcc3   : > { %v3230_v54 = vpop.f32.mrf.mxu1 }
 0xcc4   : > { %v3334_v51 = vadd.f32 %v3236_v57, %v4954_v26  ;;  %v3231_v60 = vadd.f32 %v5442_v3, %v3230_v54 }
 0xcc5   : > { %v4303_v31 = vpop.f32.mrf.mxu1 }
 0xcc6   : > { %3366 = vst.msk [vmem:[%s5448_s20 + $0x78] sm:$0xff] %vm1786_vm4, %v3334_v51  ;;  %v3333_v52 = vadd.f32 %v3231_v60, %v4961_v28  ;;  %v3246_v59 = vadd.f32 %v4303_v31, %v5442_v3 }
 0xcc7   : > { %v3240_v41 = vpop.f32.mrf.mxu1 }
 0xcc8   : > { %3365 = vst.msk [vmem:[%s5448_s20 + $0x70] sm:$0xff] %vm1786_vm4, %v3333_v52  ;;  %v3336_v13 = vadd.f32 %v3246_v59, %v4912_v56  ;;  %v3241_v40 = vadd.f32 %v5442_v3, %v3240_v41 }
 0xcc9   : > { %v4306_v7 = vpop.f32.mrf.mxu1 }
 0xcca   : > { %3368 = vst.msk [vmem:[%s5448_s20 + $0x88] sm:$0xff] %vm1786_vm4, %v3336_v13  ;;  %v3335_v4 = vadd.f32 %v3241_v40, %v4918_v6  ;;  %v3256_v38 = vadd.f32 %v4306_v7, %v5442_v3 }
 0xccb   : > { %v3250_v16 = vpop.f32.mrf.mxu1 }
 0xccc   : > { %3367 = vst.msk [vmem:[%s5448_s20 + $0x80] sm:$0xff] %vm1786_vm4, %v3335_v4  ;;  %v3338_v35 = vadd.f32 %v3256_v38, %v4926_v9  ;;  %v3251_v14 = vadd.f32 %v5442_v3, %v3250_v16 }
 0xcce   : > { %3370 = vst.msk [vmem:[%s5448_s20 + $0x98] sm:$0xff] %vm1786_vm4, %v3338_v35  ;;  %v3337_v46 = vadd.f32 %v3251_v14, %v4932_v19 }
 0xccf   : > { %v4285_v21 = vpop.f32.mrf.mxu0 }
 0xcd0   : > { %3369 = vst.msk [vmem:[%s5448_s20 + $0x90] sm:$0xff] %vm1786_vm4, %v3337_v46  ;;  %v3186_v37 = vadd.f32 %v4285_v21, %v5442_v3  ;;  %v4309_v36 = vpop.f32.mrf.mxu1 }
 0xcd1   : > { %v3266_v42 = vadd.f32 %v4309_v36, %v5442_v3  ;;  %v3180_v23 = vpop.f32.mrf.mxu0 }
 0xcd2   : > { %v3324_v39 = vadd.f32 %v3186_v37, %v4941_v24  ;;  %v3181_v12 = vadd.f32 %v5442_v3, %v3180_v23  ;;  %v3260_v45 = vpop.f32.mrf.mxu1 }
 0xcd3   : > { %v3340_v15 = vadd.f32 %v3266_v42, %v4941_v24  ;;  %v3261_v5 = vadd.f32 %v5442_v3, %v3260_v45  ;;  %v4288_v63 = vpop.f32.mrf.mxu0 }
 0xcd4   : > { %3356 = vst.msk [vmem:[%s5448_s20 + $0x28] sm:$0xff] %vm1786_vm4, %v3324_v39  ;;  %v3323_v30 = vadd.f32 %v3181_v12, %v4947_v2  ;;  %v3196_v44 = vadd.f32 %v4288_v63, %v5442_v3  ;;  %v4312_v50 = vpop.f32.mrf.mxu1 }
 0xcd5   : > { %3372 = vst.msk [vmem:[%s5448_s20 + $0xa8] sm:$0xff] %vm1786_vm4, %v3340_v15  ;;  %v3339_v10 = vadd.f32 %v3261_v5, %v4947_v2  ;;  %v3276_v1 = vadd.f32 %v4312_v50, %v5442_v3  ;;  %v3190_v34 = vpop.f32.mrf.mxu0 }
 0xcd6   : > { %3355 = vst.msk [vmem:[%s5448_s20 + $0x20] sm:$0xff] %vm1786_vm4, %v3323_v30  ;;  %v3326_v22 = vadd.f32 %v3196_v44, %v4954_v26  ;;  %v3191_v18 = vadd.f32 %v5442_v3, %v3190_v34  ;;  %v3270_v61 = vpop.f32.mrf.mxu1 }
 0xcd7   : > { %3371 = vst.msk [vmem:[%s5448_s20 + $0xa0] sm:$0xff] %vm1786_vm4, %v3339_v10  ;;  %v3342_v48 = vadd.f32 %v3276_v1, %v4954_v26  ;;  %v3271_v53 = vadd.f32 %v5442_v3, %v3270_v61  ;;  %v4291_v43 = vpop.f32.mrf.mxu0 }
 0xcd8   : > { %3358 = vst.msk [vmem:[%s5448_s20 + $0x38] sm:$0xff] %vm1786_vm4, %v3326_v22  ;;  %v3325_v27 = vadd.f32 %v3191_v18, %v4961_v28  ;;  %v3206_v62 = vadd.f32 %v4291_v43, %v5442_v3  ;;  %v4315_v32 = vpop.f32.mrf.mxu1 }
 0xcd9   : > { %3374 = vst.msk [vmem:[%s5448_s20 + $0xb8] sm:$0xff] %vm1786_vm4, %v3342_v48  ;;  %v3341_v29 = vadd.f32 %v3271_v53, %v4961_v28  ;;  %v3286_v55 = vadd.f32 %v4315_v32, %v5442_v3  ;;  %v3200_v33 = vpop.f32.mrf.mxu0 }
 0xcda   : > { %3357 = vst.msk [vmem:[%s5448_s20 + $0x30] sm:$0xff] %vm1786_vm4, %v3325_v27  ;;  %v3328_v0 = vadd.f32 %v3206_v62, %v4912_v56  ;;  %v3201_v8 = vadd.f32 %v5442_v3, %v3200_v33  ;;  %v3280_v20 = vpop.f32.mrf.mxu1 }
 0xcdb   : > { %3373 = vst.msk [vmem:[%s5448_s20 + $0xb0] sm:$0xff] %vm1786_vm4, %v3341_v29  ;;  %v3344_v17 = vadd.f32 %v3286_v55, %v4912_v56  ;;  %v3281_v25 = vadd.f32 %v5442_v3, %v3280_v20  ;;  %v4294_v49 = vpop.f32.mrf.mxu0 }
 0xcdc   : > { %3360 = vst.msk [vmem:[%s5448_s20 + $0x48] sm:$0xff] %vm1786_vm4, %v3328_v0  ;;  %v3327_v58 = vadd.f32 %v3201_v8, %v4918_v6  ;;  %v3216_v47 = vadd.f32 %v4294_v49, %v5442_v3  ;;  %v4318_v11 = vpop.f32.mrf.mxu1 }
 0xcdd   : > { %3376 = vst.msk [vmem:[%s5448_s20 + $0xc8] sm:$0xff] %vm1786_vm4, %v3344_v17  ;;  %v3343_v57 = vadd.f32 %v3281_v25, %v4918_v6  ;;  %v3296_v54 = vadd.f32 %v4318_v11, %v5442_v3  ;;  %v3210_v51 = vpop.f32.mrf.mxu0 }
 0xcde   : > { %3359 = vst.msk [vmem:[%s5448_s20 + $0x40] sm:$0xff] %vm1786_vm4, %v3327_v58  ;;  %v3330_v56 = vadd.f32 %v3216_v47, %v4926_v9  ;;  %v3211_v60 = vadd.f32 %v5442_v3, %v3210_v51  ;;  %v3290_v31 = vpop.f32.mrf.mxu1 }
 0xcdf   : > { %3375 = vst.msk [vmem:[%s5448_s20 + $0xc0] sm:$0xff] %vm1786_vm4, %v3343_v57  ;;  %v3346_v52 = vadd.f32 %v3296_v54, %v4926_v9  ;;  %v3291_v59 = vadd.f32 %v5442_v3, %v3290_v31  ;;  %v4297_v41 = vpop.f32.mrf.mxu0 }
 0xce0   : > { %3362 = vst.msk [vmem:[%s5448_s20 + $0x58] sm:$0xff] %vm1786_vm4, %v3330_v56  ;;  %v3329_v6 = vadd.f32 %v3211_v60, %v4932_v19  ;;  %v3226_v13 = vadd.f32 %v4297_v41, %v5442_v3  ;;  %v4321_v40 = vpop.f32.mrf.mxu1 }
 0xce1   : > { %3378 = vst.msk [vmem:[%s5448_s20 + $0xd8] sm:$0xff] %vm1786_vm4, %v3346_v52  ;;  %v3345_v7 = vadd.f32 %v3291_v59, %v4932_v19  ;;  %v3306_v4 = vadd.f32 %v4321_v40, %v5442_v3  ;;  %v3220_v9 = vpop.f32.mrf.mxu0 }
 0xce2   : > { %3361 = vst.msk [vmem:[%s5448_s20 + $0x50] sm:$0xff] %vm1786_vm4, %v3329_v6  ;;  %v3332_v38 = vadd.f32 %v3226_v13, %v4941_v24  ;;  %v3221_v16 = vadd.f32 %v5442_v3, %v3220_v9  ;;  %v3300_v35 = vpop.f32.mrf.mxu1 }
 0xce3   : > { %3377 = vst.msk [vmem:[%s5448_s20 + $0xd0] sm:$0xff] %vm1786_vm4, %v3345_v7  ;;  %v3348_v14 = vadd.f32 %v3306_v4, %v4941_v24  ;;  %v3301_v19 = vadd.f32 %v5442_v3, %v3300_v35 }
 0xce4   : > { %3364 = vst.msk [vmem:[%s5448_s20 + $0x68] sm:$0xff] %vm1786_vm4, %v3332_v38  ;;  %v3331_v46 = vadd.f32 %v3221_v16, %v4947_v2  ;;  %v4324_v21 = vpop.f32.mrf.mxu1 }
 0xce5   : > { %3380 = vst.msk [vmem:[%s5448_s20 + $0xe8] sm:$0xff] %vm1786_vm4, %v3348_v14  ;;  %v3347_v37 = vadd.f32 %v3301_v19, %v4947_v2  ;;  %v3316_v36 = vadd.f32 %v4324_v21, %v5442_v3 }
 0xce6   : > { %3363 = vst.msk [vmem:[%s5448_s20 + $0x60] sm:$0xff] %vm1786_vm4, %v3331_v46  ;;  %v3310_v42 = vpop.f32.mrf.mxu1 }
 0xce7   : > { %3379 = vst.msk [vmem:[%s5448_s20 + $0xe0] sm:$0xff] %vm1786_vm4, %v3347_v37  ;;  %v3350_v24 = vadd.f32 %v3316_v36, %v4954_v26  ;;  %v3311_v23 = vadd.f32 %v5442_v3, %v3310_v42 }
 0xce9   : > { %3382 = vst.msk [vmem:[%s5448_s20 + $0xf8] sm:$0xff] %vm1786_vm4, %v3350_v24  ;;  %v3349_v39 = vadd.f32 %v3311_v23, %v4961_v28 }
 0xceb   : > { %3381 = vst.msk [vmem:[%s5448_s20 + $0xf0] sm:$0xff] %vm1786_vm4, %v3349_v39 }
 0xcec PF: > { %s16_s15 = sadd.s32 1, %s4558_s15  }
 0xced   : > { %p13_p4 = scmp.ge.s32.totalorder %s16_s15, 4  }
 0xcef   :  { %15 = sbr.rel (!%p13_p4) target bundleno = 1 (0x1), region = 87 }
 0xcf4   :  { %3439 = vsyncpa [#allocation3], 1 }
 0xcf5   :  { %3441 = vsyncpa [#allocation3 + $0x1], 1 }

</bundles_post_ra>
